<compile_context>
chip_gen: v6e
topology: v6e:2x2x1
jax: 0.10.0
libtpu: 0.0.40
codegen_flags: <defaults>
</compile_context>

<pallas_src>
import functools

import jax
import jax.numpy as jnp
from jax.experimental import pallas as pl
from jax.experimental.pallas import tpu as pltpu


# ----------------------------------------------------------------------------
# Kernel 1: local 1x1-conv chain + chunked mean pooling over points.
# ----------------------------------------------------------------------------
def _local_kernel(x_ref,                     # (TB, TN, C_in) point chunk
                  w1, b1,                    # Conv1d(3,64)   + folded BN1
                  w2, b2, rs2,               # residual conv  + folded BN2
                  w3, b3,                    # Conv1d(64,128) + folded BN3
                  out_ref,                   # (TB, 128) f32 running mean
                  *, inv_n):
    n_chunk = pl.program_id(1)

    @pl.when(n_chunk == 0)
    def _():
        out_ref[...] = jnp.zeros_like(out_ref)

    tb, tn, c_in = x_ref.shape
    x = x_ref[...].reshape(tb * tn, c_in)

    # Conv1d(3, 64) (+ folded BN1) + ReLU
    h1 = jnp.maximum(
        jnp.dot(x.astype(jnp.bfloat16), w1[...],
                preferred_element_type=jnp.float32) + b1[...], 0.0)

    # residual_Conv1d(64): ReLU(BN2(conv(h1) + h1)); BN fold => residual * rs2
    h2 = jnp.maximum(
        jnp.dot(h1.astype(jnp.bfloat16), w2[...],
                preferred_element_type=jnp.float32)
        + h1 * rs2[...] + b2[...], 0.0)

    # Conv1d(64, 128) (+ folded BN3) + ReLU
    h3 = jnp.maximum(
        jnp.dot(h2.astype(jnp.bfloat16), w3[...],
                preferred_element_type=jnp.float32) + b3[...], 0.0)

    # Chunked mean over points: per-batch-row partial sums, accumulated into
    # the resident output block (one dense (TB, 128) += per step).
    partial = jnp.concatenate(
        [jnp.sum(h3[i * tn:(i + 1) * tn, :], axis=0, keepdims=True)
         for i in range(tb)], axis=0)                       # (TB, 128)
    out_ref[...] += partial * inv_n


# ----------------------------------------------------------------------------
# Kernel 2: global MLP on the pooled features (runs once, full batch).
# ----------------------------------------------------------------------------
def _global_kernel(g_ref,                    # (B, 128) pooled features
                   wg1, bg1,                 # residual_Linear(128)
                   wg2, bg2,                 # Linear(128, 64)
                   wg3, bg3,                 # Linear(64, 1): wg3 as (1, 64)
                   out_ref):                 # (B, 1)
    g = g_ref[...]
    # residual_Linear(128) + ReLU : relu(g @ W + b + g)
    f = jnp.maximum(
        jnp.dot(g.astype(jnp.bfloat16), wg1[...],
                preferred_element_type=jnp.float32) + bg1[...] + g, 0.0)
    # Linear(128, 64) + ReLU
    f = jnp.maximum(
        jnp.dot(f.astype(jnp.bfloat16), wg2[...],
                preferred_element_type=jnp.float32) + bg2[...], 0.0)
    # Linear(64, 1) as an elementwise multiply + lane reduce (avoids an N=1
    # MXU matmul; kept in f32).
    out_ref[...] = jnp.sum(f * wg3[...], axis=-1, keepdims=True) + bg3[...]


# ----------------------------------------------------------------------------
# Wrapper
# ----------------------------------------------------------------------------
def energy_point_forward(x_bnc, params, *, tile_b=8, tile_n=128):
    """x_bnc: (B, num_point, point_dim) f32, channels-last (== PyTorch NCW
    input transposed).  Returns (B, 1) energy."""
    (w1, b1, w2, b2, rs2, w3, b3,
     wg1, bg1, wg2, bg2, wg3, bg3) = params
    B, N, C_in = x_bnc.shape
    C_out = w3.shape[1]

    tb = min(tile_b, B)
    tn = min(tile_n, N)
    assert B % tb == 0 and N % tn == 0, "demo wrapper requires divisible tiles"

    local_weights = (w1, b1, w2, b2, rs2, w3, b3)

    def full_spec(arr):
        nd = arr.ndim
        return pl.BlockSpec(arr.shape, lambda b, n: (0,) * nd)

    pooled = pl.pallas_call(
        functools.partial(_local_kernel, inv_n=1.0 / N),
        out_shape=jax.ShapeDtypeStruct((B, C_out), jnp.float32),
        grid_spec=pltpu.PrefetchScalarGridSpec(
            num_scalar_prefetch=0,
            grid=(B // tb, N // tn),
            in_specs=[pl.BlockSpec((tb, tn, C_in), lambda b, n: (b, n, 0))]
                     + [full_spec(a) for a in local_weights],
            out_specs=pl.BlockSpec((tb, C_out), lambda b, n: (b, 0)),
        ),
        compiler_params=pltpu.CompilerParams(
            dimension_semantics=("parallel", "arbitrary")),
    )(x_bnc, *local_weights)

    # Global MLP: one shot over the whole (B, 128) pooled feature matrix.
    out = pl.pallas_call(
        _global_kernel,
        out_shape=jax.ShapeDtypeStruct((B, 1), jnp.float32),
    )(pooled, wg1, bg1, wg2, bg2, wg3, bg3)
    return out


# ----------------------------------------------------------------------------
# Deterministic parameter construction (fresh init, BN eval mode folded).
# ----------------------------------------------------------------------------
def make_params(key):
    eps = 1e-5
    shapes = [(3, 64), (64, 64), (64, 128),      # local 1x1 convs
              (128, 128), (128, 64), (64, 1)]    # global linears
    keys = jax.random.split(key, 2 * len(shapes))

    raw = []
    for i, (cin, cout) in enumerate(shapes):
        w = 0.1 * jax.random.normal(keys[2 * i], (cin, cout), dtype=jnp.float32)
        b = 0.1 * jax.random.normal(keys[2 * i + 1], (1, cout), dtype=jnp.float32)
        raw.append((w, b))

    def bn_fold(w, b, cout):
        # PyTorch BatchNorm1d fresh init: gamma=1, beta=0, mean=0, var=1.
        gamma = jnp.ones((cout,), jnp.float32)
        beta = jnp.zeros((cout,), jnp.float32)
        mean = jnp.zeros((cout,), jnp.float32)
        var = jnp.ones((cout,), jnp.float32)
        s = gamma / jnp.sqrt(var + eps)
        t = beta - mean * s
        return w * s[None, :], b * s[None, :] + t[None, :], s[None, :]

    (w1, b1), (w2, b2), (w3, b3) = raw[0], raw[1], raw[2]
    w1, b1, _ = bn_fold(w1, b1, 64)
    w2, b2, rs2 = bn_fold(w2, b2, 64)      # rs2 scales the residual branch
    w3, b3, _ = bn_fold(w3, b3, 128)
    (wg1, bg1), (wg2, bg2), (wg3, bg3) = raw[3], raw[4], raw[5]
    wg3_r = jnp.transpose(wg3)             # (1, 64), kept f32

    bf = lambda a: a.astype(jnp.bfloat16)
    return (bf(w1), b1, bf(w2), b2, rs2, bf(w3), b3,
            bf(wg1), bg1, bf(wg2), bg2, wg3_r, bg3)


# ----------------------------------------------------------------------------
# Pure-JAX reference (same folded params, same bf16 matmul operands).
# ----------------------------------------------------------------------------
def reference_forward(x_bnc, params):
    (w1, b1, w2, b2, rs2, w3, b3,
     wg1, bg1, wg2, bg2, wg3, bg3) = params

    def mm(a, w):
        return jnp.einsum('...c,cd->...d', a.astype(jnp.bfloat16), w,
                          preferred_element_type=jnp.float32)

    h1 = jax.nn.relu(mm(x_bnc, w1) + b1)
    h2 = jax.nn.relu(mm(h1, w2) + h1 * rs2 + b2)
    h3 = jax.nn.relu(mm(h2, w3) + b3)
    g = jnp.mean(h3, axis=1)                       # mean over points (pnt_axis)
    f = jax.nn.relu(mm(g, wg1) + bg1 + g)
    f = jax.nn.relu(mm(f, wg2) + bg2)
    return jnp.sum(f * wg3, axis=-1, keepdims=True) + bg3


if __name__ == "__main__":
    B, N, C_IN = 16, 256, 3          # batch, num_point, point_dim
    key = jax.random.PRNGKey(0)
    kx, kp = jax.random.split(key)

    # Channels-last point cloud (== PyTorch (B, point_dim, num_point) input,
    # transposed); the kernel consumes channels-last directly so no HBM
    # transpose is required.
    x = jax.random.normal(kx, (B, N, C_IN), dtype=jnp.float32)
    params = make_params(kp)

    out = energy_point_forward(x, params)
    out = jax.block_until_ready(out)

    ref = reference_forward(x, params)
    assert out.shape == (B, 1)
    err = jnp.max(jnp.abs(out - ref))
    assert jnp.allclose(out, ref, atol=1e-2, rtol=1e-2), (
        f"mismatch vs JAX reference, max abs err = {err:.3e}")

    print("KERNEL_OK")
</pallas_src>

<mosaic_0001>
module attributes {stable_mosaic.version = 11 : i64} {
  func.func @_local_kernel(%arg0: i32, %arg1: i32, %arg2: memref<8x128x3xf32, #tpu.memory_space<vmem>>, %arg3: memref<3x64xbf16, #tpu.memory_space<vmem>>, %arg4: memref<1x64xf32, #tpu.memory_space<vmem>>, %arg5: memref<64x64xbf16, #tpu.memory_space<vmem>>, %arg6: memref<1x64xf32, #tpu.memory_space<vmem>>, %arg7: memref<1x64xf32, #tpu.memory_space<vmem>>, %arg8: memref<64x128xbf16, #tpu.memory_space<vmem>>, %arg9: memref<1x128xf32, #tpu.memory_space<vmem>>, %arg10: memref<8x128xf32, #tpu.memory_space<vmem>>) attributes {dimension_semantics = [#tpu.dimension_semantics<parallel>, #tpu.dimension_semantics<arbitrary>], iteration_bounds = array<i64: 2, 2>, scalar_prefetch = 0 : i64, scratch_operands = 0 : i64, tpu.core_type = #tpu.core_type<tc>, window_params = [{transform_indices = @transform_0, window_bounds = array<i64: 8, 128, 3>}, {pipeline_mode = #tpu.pipeline_mode<synchronous>, transform_indices = @transform_1, window_bounds = array<i64: 3, 64>}, {pipeline_mode = #tpu.pipeline_mode<synchronous>, transform_indices = @transform_2, window_bounds = array<i64: 1, 64>}, {pipeline_mode = #tpu.pipeline_mode<synchronous>, transform_indices = @transform_3, window_bounds = array<i64: 64, 64>}, {pipeline_mode = #tpu.pipeline_mode<synchronous>, transform_indices = @transform_4, window_bounds = array<i64: 1, 64>}, {pipeline_mode = #tpu.pipeline_mode<synchronous>, transform_indices = @transform_5, window_bounds = array<i64: 1, 64>}, {pipeline_mode = #tpu.pipeline_mode<synchronous>, transform_indices = @transform_6, window_bounds = array<i64: 64, 128>}, {pipeline_mode = #tpu.pipeline_mode<synchronous>, transform_indices = @transform_7, window_bounds = array<i64: 1, 128>}, {transform_indices = @transform_8, window_bounds = array<i64: 8, 128>}]} {
    %c0_i32 = arith.constant 0 : i32
    %0 = arith.cmpi eq, %arg1, %c0_i32 : i32
    %1 = arith.extui %0 : i1 to i32
    %c0_i32_0 = arith.constant 0 : i32
    %2 = arith.cmpi ne, %1, %c0_i32_0 : i32
    scf.if %2 {
      %cst_35 = arith.constant 0.000000e+00 : f32
      %63 = vector.broadcast %cst_35 : f32 to vector<8x128xf32>
      %c0_36 = arith.constant 0 : index
      %c0_37 = arith.constant 0 : index
      %64 = vector.load %arg10[%c0_36, %c0_37] : memref<8x128xf32, #tpu.memory_space<vmem>>, vector<8x128xf32>
      tpu.vector_store %arg10[%c0_36, %c0_37], %63 {strides = array<i32>} : memref<8x128xf32, #tpu.memory_space<vmem>>, vector<8x128xf32>,
    } else {
    }
    %c0 = arith.constant 0 : index
    %c0_1 = arith.constant 0 : index
    %c0_2 = arith.constant 0 : index
    %3 = vector.load %arg2[%c0, %c0_1, %c0_2] : memref<8x128x3xf32, #tpu.memory_space<vmem>>, vector<8x128x3xf32>
    %4 = vector.shape_cast %3 : vector<8x128x3xf32> to vector<1024x3xf32>
    %5 = arith.truncf %4 : vector<1024x3xf32> to vector<1024x3xbf16>
    %c0_3 = arith.constant 0 : index
    %c0_4 = arith.constant 0 : index
    %6 = vector.load %arg3[%c0_3, %c0_4] : memref<3x64xbf16, #tpu.memory_space<vmem>>, vector<3x64xbf16>
    %cst = arith.constant dense<0.000000e+00> : vector<1024x64xf32>
    %7 = tpu.matmul %5, %6, %cst {dimension_numbers = #tpu.dot_dimension_numbers<[1], [0], [0], [1], [0, 0, 1, 1], [], []>} : vector<1024x3xbf16>, vector<3x64xbf16>, vector<1024x64xf32> -> vector<1024x64xf32>
    %c0_5 = arith.constant 0 : index
    %c0_6 = arith.constant 0 : index
    %8 = vector.load %arg4[%c0_5, %c0_6] : memref<1x64xf32, #tpu.memory_space<vmem>>, vector<1x64xf32>
    %9 = vector.broadcast %8 : vector<1x64xf32> to vector<1024x64xf32>
    %10 = arith.addf %7, %9 : vector<1024x64xf32>
    %cst_7 = arith.constant 0.000000e+00 : f32
    %11 = vector.broadcast %cst_7 : f32 to vector<1024x64xf32>
    %12 = arith.maximumf %10, %11 : vector<1024x64xf32>
    %13 = arith.truncf %12 : vector<1024x64xf32> to vector<1024x64xbf16>
    %c0_8 = arith.constant 0 : index
    %c0_9 = arith.constant 0 : index
    %14 = vector.load %arg5[%c0_8, %c0_9] : memref<64x64xbf16, #tpu.memory_space<vmem>>, vector<64x64xbf16>
    %cst_10 = arith.constant dense<0.000000e+00> : vector<1024x64xf32>
    %15 = tpu.matmul %13, %14, %cst_10 {dimension_numbers = #tpu.dot_dimension_numbers<[1], [0], [0], [1], [0, 0, 1, 1], [], []>} : vector<1024x64xbf16>, vector<64x64xbf16>, vector<1024x64xf32> -> vector<1024x64xf32>
    %c0_11 = arith.constant 0 : index
    %c0_12 = arith.constant 0 : index
    %16 = vector.load %arg7[%c0_11, %c0_12] : memref<1x64xf32, #tpu.memory_space<vmem>>, vector<1x64xf32>
    %17 = vector.broadcast %16 : vector<1x64xf32> to vector<1024x64xf32>
    %18 = arith.mulf %12, %17 : vector<1024x64xf32>
    %19 = arith.addf %15, %18 : vector<1024x64xf32>
    %c0_13 = arith.constant 0 : index
    %c0_14 = arith.constant 0 : index
    %20 = vector.load %arg6[%c0_13, %c0_14] : memref<1x64xf32, #tpu.memory_space<vmem>>, vector<1x64xf32>
    %21 = vector.broadcast %20 : vector<1x64xf32> to vector<1024x64xf32>
    %22 = arith.addf %19, %21 : vector<1024x64xf32>
    %cst_15 = arith.constant 0.000000e+00 : f32
    %23 = vector.broadcast %cst_15 : f32 to vector<1024x64xf32>
    %24 = arith.maximumf %22, %23 : vector<1024x64xf32>
    %25 = arith.truncf %24 : vector<1024x64xf32> to vector<1024x64xbf16>
    %c0_16 = arith.constant 0 : index
    %c0_17 = arith.constant 0 : index
    %26 = vector.load %arg8[%c0_16, %c0_17] : memref<64x128xbf16, #tpu.memory_space<vmem>>, vector<64x128xbf16>
    %cst_18 = arith.constant dense<0.000000e+00> : vector<1024x128xf32>
    %27 = tpu.matmul %25, %26, %cst_18 {dimension_numbers = #tpu.dot_dimension_numbers<[1], [0], [0], [1], [0, 0, 1, 1], [], []>} : vector<1024x64xbf16>, vector<64x128xbf16>, vector<1024x128xf32> -> vector<1024x128xf32>
    %c0_19 = arith.constant 0 : index
    %c0_20 = arith.constant 0 : index
    %28 = vector.load %arg9[%c0_19, %c0_20] : memref<1x128xf32, #tpu.memory_space<vmem>>, vector<1x128xf32>
    %29 = vector.broadcast %28 : vector<1x128xf32> to vector<1024x128xf32>
    %30 = arith.addf %27, %29 : vector<1024x128xf32>
    %cst_21 = arith.constant 0.000000e+00 : f32
    %31 = vector.broadcast %cst_21 : f32 to vector<1024x128xf32>
    %32 = arith.maximumf %30, %31 : vector<1024x128xf32>
    %33 = vector.extract_strided_slice %32 {offsets = [0, 0], sizes = [128, 128], strides = [1, 1]} : vector<1024x128xf32> to vector<128x128xf32>
    %cst_22 = arith.constant dense<0.000000e+00> : vector<128xf32>
    %34 = vector.multi_reduction <add>, %33, %cst_22 [0] : vector<128x128xf32> to vector<128xf32>
    %35 = vector.shape_cast %34 : vector<128xf32> to vector<1x128xf32>
    %36 = vector.extract_strided_slice %32 {offsets = [128, 0], sizes = [128, 128], strides = [1, 1]} : vector<1024x128xf32> to vector<128x128xf32>
    %cst_23 = arith.constant dense<0.000000e+00> : vector<128xf32>
    %37 = vector.multi_reduction <add>, %36, %cst_23 [0] : vector<128x128xf32> to vector<128xf32>
    %38 = vector.shape_cast %37 : vector<128xf32> to vector<1x128xf32>
    %39 = vector.extract_strided_slice %32 {offsets = [256, 0], sizes = [128, 128], strides = [1, 1]} : vector<1024x128xf32> to vector<128x128xf32>
    %cst_24 = arith.constant dense<0.000000e+00> : vector<128xf32>
    %40 = vector.multi_reduction <add>, %39, %cst_24 [0] : vector<128x128xf32> to vector<128xf32>
    %41 = vector.shape_cast %40 : vector<128xf32> to vector<1x128xf32>
    %42 = vector.extract_strided_slice %32 {offsets = [384, 0], sizes = [128, 128], strides = [1, 1]} : vector<1024x128xf32> to vector<128x128xf32>
    %cst_25 = arith.constant dense<0.000000e+00> : vector<128xf32>
    %43 = vector.multi_reduction <add>, %42, %cst_25 [0] : vector<128x128xf32> to vector<128xf32>
    %44 = vector.shape_cast %43 : vector<128xf32> to vector<1x128xf32>
    %45 = vector.extract_strided_slice %32 {offsets = [512, 0], sizes = [128, 128], strides = [1, 1]} : vector<1024x128xf32> to vector<128x128xf32>
    %cst_26 = arith.constant dense<0.000000e+00> : vector<128xf32>
    %46 = vector.multi_reduction <add>, %45, %cst_26 [0] : vector<128x128xf32> to vector<128xf32>
    %47 = vector.shape_cast %46 : vector<128xf32> to vector<1x128xf32>
    %48 = vector.extract_strided_slice %32 {offsets = [640, 0], sizes = [128, 128], strides = [1, 1]} : vector<1024x128xf32> to vector<128x128xf32>
    %cst_27 = arith.constant dense<0.000000e+00> : vector<128xf32>
    %49 = vector.multi_reduction <add>, %48, %cst_27 [0] : vector<128x128xf32> to vector<128xf32>
    %50 = vector.shape_cast %49 : vector<128xf32> to vector<1x128xf32>
    %51 = vector.extract_strided_slice %32 {offsets = [768, 0], sizes = [128, 128], strides = [1, 1]} : vector<1024x128xf32> to vector<128x128xf32>
    %cst_28 = arith.constant dense<0.000000e+00> : vector<128xf32>
    %52 = vector.multi_reduction <add>, %51, %cst_28 [0] : vector<128x128xf32> to vector<128xf32>
    %53 = vector.shape_cast %52 : vector<128xf32> to vector<1x128xf32>
    %54 = vector.extract_strided_slice %32 {offsets = [896, 0], sizes = [128, 128], strides = [1, 1]} : vector<1024x128xf32> to vector<128x128xf32>
    %cst_29 = arith.constant dense<0.000000e+00> : vector<128xf32>
    %55 = vector.multi_reduction <add>, %54, %cst_29 [0] : vector<128x128xf32> to vector<128xf32>
    %56 = vector.shape_cast %55 : vector<128xf32> to vector<1x128xf32>
    %57 = tpu.concatenate %35, %38, %41, %44, %47, %50, %53, %56 in 0 : vector<1x128xf32>, vector<1x128xf32>, vector<1x128xf32>, vector<1x128xf32>, vector<1x128xf32>, vector<1x128xf32>, vector<1x128xf32>, vector<1x128xf32> -> vector<8x128xf32>
    %c0_30 = arith.constant 0 : index
    %c0_31 = arith.constant 0 : index
    %58 = vector.load %arg10[%c0_30, %c0_31] : memref<8x128xf32, #tpu.memory_space<vmem>>, vector<8x128xf32>
    %cst_32 = arith.constant 3.906250e-03 : f32
    %59 = vector.broadcast %cst_32 : f32 to vector<8x128xf32>
    %60 = arith.mulf %57, %59 : vector<8x128xf32>
    %61 = arith.addf %58, %60 : vector<8x128xf32>
    %c0_33 = arith.constant 0 : index
    %c0_34 = arith.constant 0 : index
    %62 = vector.load %arg10[%c0_33, %c0_34] : memref<8x128xf32, #tpu.memory_space<vmem>>, vector<8x128xf32>
    tpu.vector_store %arg10[%c0_33, %c0_34], %61 {strides = array<i32>} : memref<8x128xf32, #tpu.memory_space<vmem>>, vector<8x128xf32>,
    return
  }
  func.func @transform_0(%arg0: i32, %arg1: i32) -> (i32, i32, i32) {
    %c0_i32 = arith.constant 0 : i32
    %c0_i32_0 = arith.constant 0 : i32
    return %arg0, %arg1, %c0_i32 : i32, i32, i32
  }
  func.func @transform_1(%arg0: i32, %arg1: i32) -> (i32, i32) {
    %c0_i32 = arith.constant 0 : i32
    %c0_i32_0 = arith.constant 0 : i32
    %c0_i32_1 = arith.constant 0 : i32
    return %c0_i32, %c0_i32_0 : i32, i32
  }
  func.func @transform_2(%arg0: i32, %arg1: i32) -> (i32, i32) {
    %c0_i32 = arith.constant 0 : i32
    %c0_i32_0 = arith.constant 0 : i32
    %c0_i32_1 = arith.constant 0 : i32
    return %c0_i32, %c0_i32_0 : i32, i32
  }
  func.func @transform_3(%arg0: i32, %arg1: i32) -> (i32, i32) {
    %c0_i32 = arith.constant 0 : i32
    %c0_i32_0 = arith.constant 0 : i32
    %c0_i32_1 = arith.constant 0 : i32
    return %c0_i32, %c0_i32_0 : i32, i32
  }
  func.func @transform_4(%arg0: i32, %arg1: i32) -> (i32, i32) {
    %c0_i32 = arith.constant 0 : i32
    %c0_i32_0 = arith.constant 0 : i32
    %c0_i32_1 = arith.constant 0 : i32
    return %c0_i32, %c0_i32_0 : i32, i32
  }
  func.func @transform_5(%arg0: i32, %arg1: i32) -> (i32, i32) {
    %c0_i32 = arith.constant 0 : i32
    %c0_i32_0 = arith.constant 0 : i32
    %c0_i32_1 = arith.constant 0 : i32
    return %c0_i32, %c0_i32_0 : i32, i32
  }
  func.func @transform_6(%arg0: i32, %arg1: i32) -> (i32, i32) {
    %c0_i32 = arith.constant 0 : i32
    %c0_i32_0 = arith.constant 0 : i32
    %c0_i32_1 = arith.constant 0 : i32
    return %c0_i32, %c0_i32_0 : i32, i32
  }
  func.func @transform_7(%arg0: i32, %arg1: i32) -> (i32, i32) {
    %c0_i32 = arith.constant 0 : i32
    %c0_i32_0 = arith.constant 0 : i32
    %c0_i32_1 = arith.constant 0 : i32
    return %c0_i32, %c0_i32_0 : i32, i32
  }
  func.func @transform_8(%arg0: i32, %arg1: i32) -> (i32, i32) {
    %c0_i32 = arith.constant 0 : i32
    %c0_i32_0 = arith.constant 0 : i32
    return %arg0, %c0_i32 : i32, i32
  }
}

</mosaic_0001>

<bundles_post_ra>
// kernel: tpu_custom_call.1
= control target key start
LH: loop header
LB: loop body
LE: loop exit
PB: predicated region body
PF: predicated region fallthrough
CT: control target
= control target key end

     0   :  { %13 = vsyncpa [#allocation4], 0  ;;  %s7945_s0 = inlined_call_operand.vmem [shape: f32[16,256,3], index: 0, kind: input, shape index: {}]   ;;  %s7946_s1 = inlined_call_operand.vmem [shape: bf16[3,64], index: 1, kind: input, shape index: {}]   ;;  %s7947_s2 = inlined_call_operand.vmem [shape: f32[1,64], index: 2, kind: input, shape index: {}]   ;;  %s7948_s3 = inlined_call_operand.vmem [shape: bf16[64,64], index: 3, kind: input, shape index: {}]   ;;  %s7949_s4 = inlined_call_operand.vmem [shape: f32[1,64], index: 4, kind: input, shape index: {}]   ;;  %s7950_s5 = inlined_call_operand.vmem [shape: f32[1,64], index: 5, kind: input, shape index: {}]   ;;  %s7951_s6 = inlined_call_operand.vmem [shape: bf16[64,128], index: 6, kind: input, shape index: {}]   ;;  %s7952_s7 = inlined_call_operand.vmem [shape: f32[1,128], index: 7, kind: input, shape index: {}]   ;;  %s7953_s8 = inlined_call_operand.hbm [shape: f32[16,128], index: 8, kind: output, shape index: {}]  }
   0x1   :  { %15 = vsyncpa [#allocation4 + $0x1], 0  ;;  %s5509_s27 = smov 0   ;;  %s5511_s28 = smov 0  }
   0x2   :  { %s5513_s29 = smov 0   ;;  %s5515_s30 = smov 0  }
   0x3   :  { %s5517_s9 = smov 0   ;;  %s5519_s10 = smov 0  }
   0x4   :  { %s5521_s11 = smov 0   ;;  %s5523_s12 = smov 0  }
   0x5   :  { %s5525_s13 = smov 0   ;;  %s5527_s14 = smov 0  }
   0x6 LB: > { %8152 = sst [smem:[#allocation6_spill]] %s5423_s27  ;;  %s4423_s15 = sadd.s32 4294967295, %s5459_s14   ;;  %s5459_s14 = sphi %s5527_s14, %s21_s14   ;;  %s5455_s13 = sphi %s5525_s13, %s8491_s13   ;;  %s5451_s12 = sphi %s5523_s12, %s8490_s12   ;;  %s5447_s11 = sphi %s5521_s11, %s8489_s11   ;;  %s5443_s10 = sphi %s5519_s10, %s8488_s10   ;;  %s5439_s9 = sphi %s5517_s9, %s8487_s9   ;;  %s5435_s30 = sphi %s5515_s30, %s8486_s30   ;;  %s5431_s29 = sphi %s5513_s29, %s8485_s29   ;;  %s5427_s28 = sphi %s5511_s28, %s8484_s28   ;;  %s5423_s27 = sphi %s5509_s27, %s8483_s27  }
   0x7   : > { %s4424_s16 = sadd.s32 4294967294, %s5459_s14   ;;  %s30_s17 = sadd.s32 1, %s5451_s12 }
   0x8   : > { %s33_s18 = sadd.s32 1, %s5455_s13  ;;  %p31_p0 = scmp.ge.s32.totalorder %s30_s17, 2 }
   0x9   : > { %s42_s19 = sadd.s32 1, %s5439_s9  ;;  %p49_p1 = scmp.ne.s32.totalorder %s5439_s9, %s5435_s30 }
   0xa   : > { %p50_p2 = scmp.eq.s32.totalorder %s5459_s14, 0  ;;  %s8493_s17 = smov (%p31_p0, %s30_s17), 0 }
   0xb   : > { %8153 = sst [smem:[#allocation7_spill]] %s8493_s17  ;;  %s8495_s18 = smov (!%p31_p0, %s33_s18), %s5455_s13 }
   0xc   : > { %s38_s20 = ssub.s32 %s5451_s12, %s8493_s17  ;;  %p5572_p3 = por %p50_p2, %p49_p1 }
   0xd   : > { %p35_p4 = scmp.ge.s32.totalorder %s8495_s18, 2  ;;  %s215_s22 = sadd.s32 1, %s5431_s29 }
   0xe   : > { %p225_p5 = scmp.ne.s32.totalorder %s5431_s29, %s5427_s28  ;;  %p226_p6 = scmp.eq.s32.totalorder %s4423_s15, 3 }
   0xf   : > { %s8497_s18 = smov (%p35_p4, %s8495_s18), 0  ;;  %p231_p8 = scmp.ne.s32.totalorder %s5427_s28, %s5423_s27 }
  0x10   : > { %8155 = sst [smem:[#allocation8_spill]] %s8497_s18  ;;  %p5581_p7 = por %p226_p6, %p225_p5 }
  0x11   : > { %s37_s24 = ssub.s32 %s5455_s13, %s8497_s18  ;;  %p232_p9 = scmp.eq.s32.totalorder %s4424_s16, 3 }
  0x12   : > { %s39_s25 = sor.u32 %s38_s20, %s37_s24  ;;  %p213_p10 = scmp.eq.s32.totalorder %s37_s24, 0 }
  0x13   : > { %p40_p11 = scmp.eq.s32.totalorder %s39_s25, 0  ;;  %p5589_p12 = por %p232_p9, %p231_p8 }
  0x14   : > { %s5594_s17 = scalar_select %p213_p10, %s5431_s29, %s215_s22  }
  0x15   : > { %s8157_s26 = scalar_select %p5589_p12, 1, 0 }
  0x16   : > { %s5597_s15 = scalar_select %p40_p11, %s5439_s9, %s42_s19  }
  0x17   : > { %8158 = sst [smem:[#allocation9_spill]] %s8157_s26  ;;  %p4426_p13 = scmp.ge.s32.totalorder %s5459_s14, 4 }
  0x19   : > { %269 = sbr.rel (%p4426_p13) target bundleno = 101 (0x65), region = 44 }
  0x1e   : > { %272 = sbr.rel (!%p5572_p3) target bundleno = 101 (0x65), region = 48  ;;  %s274_s16 = sand.u32 (%p5572_p3), 1, %s5439_s9  }
  0x1f   : > { %s4429_s20 = sshll.u32 (%p5572_p3), %s5451_s12, 4  ;;  %s4427_s24 = sshll.u32 (%p5572_p3), %s274_s16, 10 }
  0x20   : > { %s4644_s25 = sshll.u32 (%p5572_p3), %s5455_s13, 8  ;;  %s5613_s21 = scalar_lea.vmem (%p5572_p3), [#allocation2], %s4427_s24 }
  0x21   : > { %s280_s18 = sadd.s32 (%p5572_p3), %s4644_s25, %s4429_s20 }
  0x22   : > { %s4431_s27 = sshll.u32 (%p5572_p3), %s280_s18, 3 }
  0x23   : > { %s5608_s19 = scalar_lea.vmem %s7945_s0, %s4431_s27 }
  0x24   : > { %v565_v0 = vld [vmem:[%s5608_s19] sm:$0xff]  ;;  %v567_v1 = vld [vmem:[%s5608_s19 + $0x8] sm:$0xff]  ;;  %v569_v2 = vld [vmem:[%s5608_s19 + $0x10] sm:$0xff] }
  0x25   : > { %566 = vst [vmem:[%s5613_s21] sm:$0xff] %v565_v0  ;;  %568 = vst [vmem:[%s5613_s21 + $0x8] sm:$0xff] %v567_v1  ;;  %v571_v3 = vld [vmem:[%s5608_s19 + $0x18] sm:$0xff]  ;;  %v573_v4 = vld [vmem:[%s5608_s19 + $0x20] sm:$0xff] }
  0x26   : > { %570 = vst [vmem:[%s5613_s21 + $0x10] sm:$0xff] %v569_v2  ;;  %v575_v5 = vld [vmem:[%s5608_s19 + $0x28] sm:$0xff]  ;;  %572 = vst [vmem:[%s5613_s21 + $0x18] sm:$0xff] %v571_v3  ;;  %v577_v6 = vld [vmem:[%s5608_s19 + $0x30] sm:$0xff] }
  0x27   : > { %574 = vst [vmem:[%s5613_s21 + $0x20] sm:$0xff] %v573_v4  ;;  %576 = vst [vmem:[%s5613_s21 + $0x28] sm:$0xff] %v575_v5  ;;  %v579_v7 = vld [vmem:[%s5608_s19 + $0x38] sm:$0xff]  ;;  %v581_v8 = vld [vmem:[%s5608_s19 + $0x40] sm:$0xff] }
  0x28   : > { %578 = vst [vmem:[%s5613_s21 + $0x30] sm:$0xff] %v577_v6  ;;  %580 = vst [vmem:[%s5613_s21 + $0x38] sm:$0xff] %v579_v7  ;;  %v583_v9 = vld [vmem:[%s5608_s19 + $0x48] sm:$0xff]  ;;  %v585_v10 = vld [vmem:[%s5608_s19 + $0x50] sm:$0xff] }
  0x29   : > { %582 = vst [vmem:[%s5613_s21 + $0x40] sm:$0xff] %v581_v8  ;;  %v587_v11 = vld [vmem:[%s5608_s19 + $0x58] sm:$0xff]  ;;  %584 = vst [vmem:[%s5613_s21 + $0x48] sm:$0xff] %v583_v9  ;;  %v589_v12 = vld [vmem:[%s5608_s19 + $0x60] sm:$0xff] }
  0x2a   : > { %586 = vst [vmem:[%s5613_s21 + $0x50] sm:$0xff] %v585_v10  ;;  %588 = vst [vmem:[%s5613_s21 + $0x58] sm:$0xff] %v587_v11  ;;  %v591_v13 = vld [vmem:[%s5608_s19 + $0x68] sm:$0xff]  ;;  %v593_v14 = vld [vmem:[%s5608_s19 + $0x70] sm:$0xff] }
  0x2b   : > { %590 = vst [vmem:[%s5613_s21 + $0x60] sm:$0xff] %v589_v12  ;;  %592 = vst [vmem:[%s5613_s21 + $0x68] sm:$0xff] %v591_v13  ;;  %v595_v15 = vld [vmem:[%s5608_s19 + $0x78] sm:$0xff]  ;;  %v597_v16 = vld [vmem:[%s5608_s19 + $0x100] sm:$0xff] }
  0x2c   : > { %594 = vst [vmem:[%s5613_s21 + $0x70] sm:$0xff] %v593_v14  ;;  %v599_v17 = vld [vmem:[%s5608_s19 + $0x108] sm:$0xff]  ;;  %596 = vst [vmem:[%s5613_s21 + $0x78] sm:$0xff] %v595_v15  ;;  %v601_v18 = vld [vmem:[%s5608_s19 + $0x110] sm:$0xff] }
  0x2d   : > { %598 = vst [vmem:[%s5613_s21 + $0x80] sm:$0xff] %v597_v16  ;;  %600 = vst [vmem:[%s5613_s21 + $0x88] sm:$0xff] %v599_v17  ;;  %v603_v19 = vld [vmem:[%s5608_s19 + $0x118] sm:$0xff]  ;;  %v605_v20 = vld [vmem:[%s5608_s19 + $0x120] sm:$0xff] }
  0x2e   : > { %602 = vst [vmem:[%s5613_s21 + $0x90] sm:$0xff] %v601_v18  ;;  %604 = vst [vmem:[%s5613_s21 + $0x98] sm:$0xff] %v603_v19  ;;  %v607_v21 = vld [vmem:[%s5608_s19 + $0x128] sm:$0xff]  ;;  %v609_v22 = vld [vmem:[%s5608_s19 + $0x130] sm:$0xff] }
  0x2f   : > { %606 = vst [vmem:[%s5613_s21 + $0xa0] sm:$0xff] %v605_v20  ;;  %v611_v23 = vld [vmem:[%s5608_s19 + $0x138] sm:$0xff]  ;;  %608 = vst [vmem:[%s5613_s21 + $0xa8] sm:$0xff] %v607_v21  ;;  %v613_v24 = vld [vmem:[%s5608_s19 + $0x140] sm:$0xff] }
  0x30   : > { %610 = vst [vmem:[%s5613_s21 + $0xb0] sm:$0xff] %v609_v22  ;;  %612 = vst [vmem:[%s5613_s21 + $0xb8] sm:$0xff] %v611_v23  ;;  %v615_v25 = vld [vmem:[%s5608_s19 + $0x148] sm:$0xff]  ;;  %v617_v26 = vld [vmem:[%s5608_s19 + $0x150] sm:$0xff] }
  0x31   : > { %614 = vst [vmem:[%s5613_s21 + $0xc0] sm:$0xff] %v613_v24  ;;  %616 = vst [vmem:[%s5613_s21 + $0xc8] sm:$0xff] %v615_v25  ;;  %v619_v27 = vld [vmem:[%s5608_s19 + $0x158] sm:$0xff]  ;;  %v621_v28 = vld [vmem:[%s5608_s19 + $0x160] sm:$0xff] }
  0x32   : > { %618 = vst [vmem:[%s5613_s21 + $0xd0] sm:$0xff] %v617_v26  ;;  %v623_v29 = vld [vmem:[%s5608_s19 + $0x168] sm:$0xff]  ;;  %620 = vst [vmem:[%s5613_s21 + $0xd8] sm:$0xff] %v619_v27  ;;  %v625_v30 = vld [vmem:[%s5608_s19 + $0x170] sm:$0xff] }
  0x33   : > { %622 = vst [vmem:[%s5613_s21 + $0xe0] sm:$0xff] %v621_v28  ;;  %624 = vst [vmem:[%s5613_s21 + $0xe8] sm:$0xff] %v623_v29  ;;  %v627_v31 = vld [vmem:[%s5608_s19 + $0x178] sm:$0xff]  ;;  %v629_v32 = vld [vmem:[%s5608_s19 + $0x200] sm:$0xff] }
  0x34   : > { %626 = vst [vmem:[%s5613_s21 + $0xf0] sm:$0xff] %v625_v30  ;;  %628 = vst [vmem:[%s5613_s21 + $0xf8] sm:$0xff] %v627_v31  ;;  %v631_v33 = vld [vmem:[%s5608_s19 + $0x208] sm:$0xff]  ;;  %v633_v34 = vld [vmem:[%s5608_s19 + $0x210] sm:$0xff] }
  0x35   : > { %630 = vst [vmem:[%s5613_s21 + $0x100] sm:$0xff] %v629_v32  ;;  %v635_v35 = vld [vmem:[%s5608_s19 + $0x218] sm:$0xff]  ;;  %632 = vst [vmem:[%s5613_s21 + $0x108] sm:$0xff] %v631_v33  ;;  %v637_v36 = vld [vmem:[%s5608_s19 + $0x220] sm:$0xff] }
  0x36   : > { %634 = vst [vmem:[%s5613_s21 + $0x110] sm:$0xff] %v633_v34  ;;  %636 = vst [vmem:[%s5613_s21 + $0x118] sm:$0xff] %v635_v35  ;;  %v639_v37 = vld [vmem:[%s5608_s19 + $0x228] sm:$0xff]  ;;  %v641_v38 = vld [vmem:[%s5608_s19 + $0x230] sm:$0xff] }
  0x37   : > { %638 = vst [vmem:[%s5613_s21 + $0x120] sm:$0xff] %v637_v36  ;;  %640 = vst [vmem:[%s5613_s21 + $0x128] sm:$0xff] %v639_v37  ;;  %v643_v39 = vld [vmem:[%s5608_s19 + $0x238] sm:$0xff]  ;;  %v645_v40 = vld [vmem:[%s5608_s19 + $0x240] sm:$0xff] }
  0x38   : > { %642 = vst [vmem:[%s5613_s21 + $0x130] sm:$0xff] %v641_v38  ;;  %v647_v41 = vld [vmem:[%s5608_s19 + $0x248] sm:$0xff]  ;;  %644 = vst [vmem:[%s5613_s21 + $0x138] sm:$0xff] %v643_v39  ;;  %v649_v42 = vld [vmem:[%s5608_s19 + $0x250] sm:$0xff] }
  0x39   : > { %646 = vst [vmem:[%s5613_s21 + $0x140] sm:$0xff] %v645_v40  ;;  %648 = vst [vmem:[%s5613_s21 + $0x148] sm:$0xff] %v647_v41  ;;  %v651_v43 = vld [vmem:[%s5608_s19 + $0x258] sm:$0xff]  ;;  %v653_v44 = vld [vmem:[%s5608_s19 + $0x260] sm:$0xff] }
  0x3a   : > { %650 = vst [vmem:[%s5613_s21 + $0x150] sm:$0xff] %v649_v42  ;;  %652 = vst [vmem:[%s5613_s21 + $0x158] sm:$0xff] %v651_v43  ;;  %v655_v45 = vld [vmem:[%s5608_s19 + $0x268] sm:$0xff]  ;;  %v657_v46 = vld [vmem:[%s5608_s19 + $0x270] sm:$0xff] }
  0x3b   : > { %654 = vst [vmem:[%s5613_s21 + $0x160] sm:$0xff] %v653_v44  ;;  %v659_v47 = vld [vmem:[%s5608_s19 + $0x278] sm:$0xff]  ;;  %656 = vst [vmem:[%s5613_s21 + $0x168] sm:$0xff] %v655_v45  ;;  %v661_v48 = vld [vmem:[%s5608_s19 + $0x300] sm:$0xff] }
  0x3c   : > { %658 = vst [vmem:[%s5613_s21 + $0x170] sm:$0xff] %v657_v46  ;;  %660 = vst [vmem:[%s5613_s21 + $0x178] sm:$0xff] %v659_v47  ;;  %v663_v49 = vld [vmem:[%s5608_s19 + $0x308] sm:$0xff]  ;;  %v665_v50 = vld [vmem:[%s5608_s19 + $0x310] sm:$0xff] }
  0x3d   : > { %662 = vst [vmem:[%s5613_s21 + $0x180] sm:$0xff] %v661_v48  ;;  %664 = vst [vmem:[%s5613_s21 + $0x188] sm:$0xff] %v663_v49  ;;  %v667_v51 = vld [vmem:[%s5608_s19 + $0x318] sm:$0xff]  ;;  %v669_v52 = vld [vmem:[%s5608_s19 + $0x320] sm:$0xff] }
  0x3e   : > { %666 = vst [vmem:[%s5613_s21 + $0x190] sm:$0xff] %v665_v50  ;;  %v671_v53 = vld [vmem:[%s5608_s19 + $0x328] sm:$0xff]  ;;  %668 = vst [vmem:[%s5613_s21 + $0x198] sm:$0xff] %v667_v51  ;;  %v673_v54 = vld [vmem:[%s5608_s19 + $0x330] sm:$0xff] }
  0x3f   : > { %670 = vst [vmem:[%s5613_s21 + $0x1a0] sm:$0xff] %v669_v52  ;;  %672 = vst [vmem:[%s5613_s21 + $0x1a8] sm:$0xff] %v671_v53  ;;  %v675_v55 = vld [vmem:[%s5608_s19 + $0x338] sm:$0xff]  ;;  %v677_v56 = vld [vmem:[%s5608_s19 + $0x340] sm:$0xff] }
  0x40   : > { %674 = vst [vmem:[%s5613_s21 + $0x1b0] sm:$0xff] %v673_v54  ;;  %676 = vst [vmem:[%s5613_s21 + $0x1b8] sm:$0xff] %v675_v55  ;;  %v679_v57 = vld [vmem:[%s5608_s19 + $0x348] sm:$0xff]  ;;  %v681_v58 = vld [vmem:[%s5608_s19 + $0x350] sm:$0xff] }
  0x41   : > { %678 = vst [vmem:[%s5613_s21 + $0x1c0] sm:$0xff] %v677_v56  ;;  %v683_v59 = vld [vmem:[%s5608_s19 + $0x358] sm:$0xff]  ;;  %680 = vst [vmem:[%s5613_s21 + $0x1c8] sm:$0xff] %v679_v57  ;;  %v685_v60 = vld [vmem:[%s5608_s19 + $0x360] sm:$0xff] }
  0x42   : > { %682 = vst [vmem:[%s5613_s21 + $0x1d0] sm:$0xff] %v681_v58  ;;  %684 = vst [vmem:[%s5613_s21 + $0x1d8] sm:$0xff] %v683_v59  ;;  %v687_v61 = vld [vmem:[%s5608_s19 + $0x368] sm:$0xff]  ;;  %v689_v62 = vld [vmem:[%s5608_s19 + $0x370] sm:$0xff] }
  0x43   : > { %686 = vst [vmem:[%s5613_s21 + $0x1e0] sm:$0xff] %v685_v60  ;;  %688 = vst [vmem:[%s5613_s21 + $0x1e8] sm:$0xff] %v687_v61  ;;  %v691_v63 = vld [vmem:[%s5608_s19 + $0x378] sm:$0xff]  ;;  %v693_v0 = vld [vmem:[%s5608_s19 + $0x400] sm:$0xff] }
  0x44   : > { %690 = vst [vmem:[%s5613_s21 + $0x1f0] sm:$0xff] %v689_v62  ;;  %v695_v1 = vld [vmem:[%s5608_s19 + $0x408] sm:$0xff]  ;;  %692 = vst [vmem:[%s5613_s21 + $0x1f8] sm:$0xff] %v691_v63  ;;  %v697_v2 = vld [vmem:[%s5608_s19 + $0x410] sm:$0xff] }
  0x45   : > { %694 = vst [vmem:[%s5613_s21 + $0x200] sm:$0xff] %v693_v0  ;;  %696 = vst [vmem:[%s5613_s21 + $0x208] sm:$0xff] %v695_v1  ;;  %v699_v3 = vld [vmem:[%s5608_s19 + $0x418] sm:$0xff]  ;;  %v701_v4 = vld [vmem:[%s5608_s19 + $0x420] sm:$0xff] }
  0x46   : > { %698 = vst [vmem:[%s5613_s21 + $0x210] sm:$0xff] %v697_v2  ;;  %700 = vst [vmem:[%s5613_s21 + $0x218] sm:$0xff] %v699_v3  ;;  %v703_v5 = vld [vmem:[%s5608_s19 + $0x428] sm:$0xff]  ;;  %v705_v6 = vld [vmem:[%s5608_s19 + $0x430] sm:$0xff] }
  0x47   : > { %702 = vst [vmem:[%s5613_s21 + $0x220] sm:$0xff] %v701_v4  ;;  %v707_v7 = vld [vmem:[%s5608_s19 + $0x438] sm:$0xff]  ;;  %704 = vst [vmem:[%s5613_s21 + $0x228] sm:$0xff] %v703_v5  ;;  %v709_v8 = vld [vmem:[%s5608_s19 + $0x440] sm:$0xff] }
  0x48   : > { %706 = vst [vmem:[%s5613_s21 + $0x230] sm:$0xff] %v705_v6  ;;  %708 = vst [vmem:[%s5613_s21 + $0x238] sm:$0xff] %v707_v7  ;;  %v711_v9 = vld [vmem:[%s5608_s19 + $0x448] sm:$0xff]  ;;  %v713_v10 = vld [vmem:[%s5608_s19 + $0x450] sm:$0xff] }
  0x49   : > { %710 = vst [vmem:[%s5613_s21 + $0x240] sm:$0xff] %v709_v8  ;;  %712 = vst [vmem:[%s5613_s21 + $0x248] sm:$0xff] %v711_v9  ;;  %v715_v11 = vld [vmem:[%s5608_s19 + $0x458] sm:$0xff]  ;;  %v717_v12 = vld [vmem:[%s5608_s19 + $0x460] sm:$0xff] }
  0x4a   : > { %714 = vst [vmem:[%s5613_s21 + $0x250] sm:$0xff] %v713_v10  ;;  %v719_v13 = vld [vmem:[%s5608_s19 + $0x468] sm:$0xff]  ;;  %716 = vst [vmem:[%s5613_s21 + $0x258] sm:$0xff] %v715_v11  ;;  %v721_v14 = vld [vmem:[%s5608_s19 + $0x470] sm:$0xff] }
  0x4b   : > { %718 = vst [vmem:[%s5613_s21 + $0x260] sm:$0xff] %v717_v12  ;;  %720 = vst [vmem:[%s5613_s21 + $0x268] sm:$0xff] %v719_v13  ;;  %v723_v15 = vld [vmem:[%s5608_s19 + $0x478] sm:$0xff]  ;;  %v725_v16 = vld [vmem:[%s5608_s19 + $0x500] sm:$0xff] }
  0x4c   : > { %722 = vst [vmem:[%s5613_s21 + $0x270] sm:$0xff] %v721_v14  ;;  %724 = vst [vmem:[%s5613_s21 + $0x278] sm:$0xff] %v723_v15  ;;  %v727_v17 = vld [vmem:[%s5608_s19 + $0x508] sm:$0xff]  ;;  %v729_v18 = vld [vmem:[%s5608_s19 + $0x510] sm:$0xff] }
  0x4d   : > { %726 = vst [vmem:[%s5613_s21 + $0x280] sm:$0xff] %v725_v16  ;;  %v731_v19 = vld [vmem:[%s5608_s19 + $0x518] sm:$0xff]  ;;  %728 = vst [vmem:[%s5613_s21 + $0x288] sm:$0xff] %v727_v17  ;;  %v733_v20 = vld [vmem:[%s5608_s19 + $0x520] sm:$0xff] }
  0x4e   : > { %730 = vst [vmem:[%s5613_s21 + $0x290] sm:$0xff] %v729_v18  ;;  %732 = vst [vmem:[%s5613_s21 + $0x298] sm:$0xff] %v731_v19  ;;  %v735_v21 = vld [vmem:[%s5608_s19 + $0x528] sm:$0xff]  ;;  %v737_v22 = vld [vmem:[%s5608_s19 + $0x530] sm:$0xff] }
  0x4f   : > { %734 = vst [vmem:[%s5613_s21 + $0x2a0] sm:$0xff] %v733_v20  ;;  %736 = vst [vmem:[%s5613_s21 + $0x2a8] sm:$0xff] %v735_v21  ;;  %v739_v23 = vld [vmem:[%s5608_s19 + $0x538] sm:$0xff]  ;;  %v741_v24 = vld [vmem:[%s5608_s19 + $0x540] sm:$0xff] }
  0x50   : > { %738 = vst [vmem:[%s5613_s21 + $0x2b0] sm:$0xff] %v737_v22  ;;  %v743_v25 = vld [vmem:[%s5608_s19 + $0x548] sm:$0xff]  ;;  %740 = vst [vmem:[%s5613_s21 + $0x2b8] sm:$0xff] %v739_v23  ;;  %v745_v26 = vld [vmem:[%s5608_s19 + $0x550] sm:$0xff] }
  0x51   : > { %742 = vst [vmem:[%s5613_s21 + $0x2c0] sm:$0xff] %v741_v24  ;;  %744 = vst [vmem:[%s5613_s21 + $0x2c8] sm:$0xff] %v743_v25  ;;  %v747_v27 = vld [vmem:[%s5608_s19 + $0x558] sm:$0xff]  ;;  %v749_v28 = vld [vmem:[%s5608_s19 + $0x560] sm:$0xff] }
  0x52   : > { %746 = vst [vmem:[%s5613_s21 + $0x2d0] sm:$0xff] %v745_v26  ;;  %748 = vst [vmem:[%s5613_s21 + $0x2d8] sm:$0xff] %v747_v27  ;;  %v751_v29 = vld [vmem:[%s5608_s19 + $0x568] sm:$0xff]  ;;  %v753_v30 = vld [vmem:[%s5608_s19 + $0x570] sm:$0xff] }
  0x53   : > { %750 = vst [vmem:[%s5613_s21 + $0x2e0] sm:$0xff] %v749_v28  ;;  %v755_v31 = vld [vmem:[%s5608_s19 + $0x578] sm:$0xff]  ;;  %752 = vst [vmem:[%s5613_s21 + $0x2e8] sm:$0xff] %v751_v29  ;;  %v757_v32 = vld [vmem:[%s5608_s19 + $0x600] sm:$0xff] }
  0x54   : > { %754 = vst [vmem:[%s5613_s21 + $0x2f0] sm:$0xff] %v753_v30  ;;  %756 = vst [vmem:[%s5613_s21 + $0x2f8] sm:$0xff] %v755_v31  ;;  %v759_v33 = vld [vmem:[%s5608_s19 + $0x608] sm:$0xff]  ;;  %v761_v34 = vld [vmem:[%s5608_s19 + $0x610] sm:$0xff] }
  0x55   : > { %758 = vst [vmem:[%s5613_s21 + $0x300] sm:$0xff] %v757_v32  ;;  %760 = vst [vmem:[%s5613_s21 + $0x308] sm:$0xff] %v759_v33  ;;  %v763_v35 = vld [vmem:[%s5608_s19 + $0x618] sm:$0xff]  ;;  %v765_v36 = vld [vmem:[%s5608_s19 + $0x620] sm:$0xff] }
  0x56   : > { %762 = vst [vmem:[%s5613_s21 + $0x310] sm:$0xff] %v761_v34  ;;  %v767_v37 = vld [vmem:[%s5608_s19 + $0x628] sm:$0xff]  ;;  %764 = vst [vmem:[%s5613_s21 + $0x318] sm:$0xff] %v763_v35  ;;  %v769_v38 = vld [vmem:[%s5608_s19 + $0x630] sm:$0xff] }
  0x57   : > { %766 = vst [vmem:[%s5613_s21 + $0x320] sm:$0xff] %v765_v36  ;;  %768 = vst [vmem:[%s5613_s21 + $0x328] sm:$0xff] %v767_v37  ;;  %v771_v39 = vld [vmem:[%s5608_s19 + $0x638] sm:$0xff]  ;;  %v773_v40 = vld [vmem:[%s5608_s19 + $0x640] sm:$0xff] }
  0x58   : > { %770 = vst [vmem:[%s5613_s21 + $0x330] sm:$0xff] %v769_v38  ;;  %772 = vst [vmem:[%s5613_s21 + $0x338] sm:$0xff] %v771_v39  ;;  %v775_v41 = vld [vmem:[%s5608_s19 + $0x648] sm:$0xff]  ;;  %v777_v42 = vld [vmem:[%s5608_s19 + $0x650] sm:$0xff] }
  0x59   : > { %774 = vst [vmem:[%s5613_s21 + $0x340] sm:$0xff] %v773_v40  ;;  %v779_v43 = vld [vmem:[%s5608_s19 + $0x658] sm:$0xff]  ;;  %776 = vst [vmem:[%s5613_s21 + $0x348] sm:$0xff] %v775_v41  ;;  %v781_v44 = vld [vmem:[%s5608_s19 + $0x660] sm:$0xff] }
  0x5a   : > { %778 = vst [vmem:[%s5613_s21 + $0x350] sm:$0xff] %v777_v42  ;;  %780 = vst [vmem:[%s5613_s21 + $0x358] sm:$0xff] %v779_v43  ;;  %v783_v45 = vld [vmem:[%s5608_s19 + $0x668] sm:$0xff]  ;;  %v785_v46 = vld [vmem:[%s5608_s19 + $0x670] sm:$0xff] }
  0x5b   : > { %782 = vst [vmem:[%s5613_s21 + $0x360] sm:$0xff] %v781_v44  ;;  %784 = vst [vmem:[%s5613_s21 + $0x368] sm:$0xff] %v783_v45  ;;  %v787_v47 = vld [vmem:[%s5608_s19 + $0x678] sm:$0xff]  ;;  %v789_v48 = vld [vmem:[%s5608_s19 + $0x700] sm:$0xff] }
  0x5c   : > { %786 = vst [vmem:[%s5613_s21 + $0x370] sm:$0xff] %v785_v46  ;;  %v791_v49 = vld [vmem:[%s5608_s19 + $0x708] sm:$0xff]  ;;  %788 = vst [vmem:[%s5613_s21 + $0x378] sm:$0xff] %v787_v47  ;;  %v793_v50 = vld [vmem:[%s5608_s19 + $0x710] sm:$0xff] }
  0x5d   : > { %790 = vst [vmem:[%s5613_s21 + $0x380] sm:$0xff] %v789_v48  ;;  %792 = vst [vmem:[%s5613_s21 + $0x388] sm:$0xff] %v791_v49  ;;  %v795_v51 = vld [vmem:[%s5608_s19 + $0x718] sm:$0xff]  ;;  %v797_v52 = vld [vmem:[%s5608_s19 + $0x720] sm:$0xff] }
  0x5e   : > { %794 = vst [vmem:[%s5613_s21 + $0x390] sm:$0xff] %v793_v50  ;;  %796 = vst [vmem:[%s5613_s21 + $0x398] sm:$0xff] %v795_v51  ;;  %v799_v53 = vld [vmem:[%s5608_s19 + $0x728] sm:$0xff]  ;;  %v801_v54 = vld [vmem:[%s5608_s19 + $0x730] sm:$0xff] }
  0x5f   : > { %798 = vst [vmem:[%s5613_s21 + $0x3a0] sm:$0xff] %v797_v52  ;;  %v803_v55 = vld [vmem:[%s5608_s19 + $0x738] sm:$0xff]  ;;  %800 = vst [vmem:[%s5613_s21 + $0x3a8] sm:$0xff] %v799_v53  ;;  %v805_v56 = vld [vmem:[%s5608_s19 + $0x740] sm:$0xff] }
  0x60   : > { %802 = vst [vmem:[%s5613_s21 + $0x3b0] sm:$0xff] %v801_v54  ;;  %804 = vst [vmem:[%s5613_s21 + $0x3b8] sm:$0xff] %v803_v55  ;;  %v807_v57 = vld [vmem:[%s5608_s19 + $0x748] sm:$0xff]  ;;  %v809_v58 = vld [vmem:[%s5608_s19 + $0x750] sm:$0xff] }
  0x61   : > { %806 = vst [vmem:[%s5613_s21 + $0x3c0] sm:$0xff] %v805_v56  ;;  %808 = vst [vmem:[%s5613_s21 + $0x3c8] sm:$0xff] %v807_v57  ;;  %v811_v59 = vld [vmem:[%s5608_s19 + $0x758] sm:$0xff]  ;;  %v813_v60 = vld [vmem:[%s5608_s19 + $0x760] sm:$0xff] }
  0x62   : > { %810 = vst [vmem:[%s5613_s21 + $0x3d0] sm:$0xff] %v809_v58  ;;  %v815_v61 = vld [vmem:[%s5608_s19 + $0x768] sm:$0xff]  ;;  %812 = vst [vmem:[%s5613_s21 + $0x3d8] sm:$0xff] %v811_v59  ;;  %v817_v62 = vld [vmem:[%s5608_s19 + $0x770] sm:$0xff] }
  0x63   : > { %814 = vst [vmem:[%s5613_s21 + $0x3e0] sm:$0xff] %v813_v60  ;;  %816 = vst [vmem:[%s5613_s21 + $0x3e8] sm:$0xff] %v815_v61  ;;  %v819_v63 = vld [vmem:[%s5608_s19 + $0x778] sm:$0xff] }
  0x64   : > { %818 = vst [vmem:[%s5613_s21 + $0x3f0] sm:$0xff] %v817_v62  ;;  %820 = vst [vmem:[%s5613_s21 + $0x3f8] sm:$0xff] %v819_v63 }
  0x65 PF: > { %p4432_p0 = scmp.ge.s32.totalorder %s5459_s14, 1  ;;  %p825_p1 = scmp.lt.s32.totalorder %s5459_s14, 5 }
  0x67   : > { %p826_p2 = pnand %p4432_p0, %p825_p1 }
  0x69   : > { %829 = sbr.rel (%p826_p2) target bundleno = 1033 (0x409), region = 86 }
  0x6e   : > { %s832_s27 = sand.u32 1, %s5435_s30   ;;  %s862_s18 = sand.u32 1, %s5427_s28  }
  0x6f   : > { %s4433_s26 = sshll.u32 %s832_s27, 10  ;;  %s4434_s16 = sshll.u32 %s862_s18, 3 }
  0x70   : > { %s5874_s20 = scalar_lea.vmem [#allocation2], %s4433_s26  ;;  %s5876_s24 = scalar_lea.vmem [#allocation3], %s4434_s16 }
  0x71   : > { %p4435_p3 = scmp.ne.s32.totalorder %s5443_s10, 0 }
  0x73   : > { %871 = sbr.rel (%p4435_p3) target bundleno = 122 (0x7a), region = 94 }
  0x78   : > { %v5461_v0 = vmov 0.0  }
  0x79   : > { %872 = vst [vmem:[%s5876_s24] sm:$0xff] %v5461_v0 }
  0x7a PF: > { %v1065_v1 = vld [vmem:[%s7946_s1] sm:$0x3]  ;;  %vm1266_vm0 = vcmask 1040384   ;;  %vm1267_vm1 = vcmask 1041408   ;;  %v5462_v3 = vmov 65535   ;;  %v874_v5 = vld [vmem:[%s5874_s20 + $0x8] sm:$0xff] }
  0x7b   : > { %v873_v2 = vld [vmem:[%s5874_s20] sm:$0xff]  ;;  %v1268_v4 = vsel %vm1266_vm0, 4294967295, %v5462_v3  ;;  %vm1073_vm2 = vcmask 23552   ;;  %v875_v8 = vld [vmem:[%s5874_s20 + $0x10] sm:$0xff]  ;;  %v876_v9 = vld [vmem:[%s5874_s20 + $0x18] sm:$0xff]  ;;  %vm2177_vm3 = vcmask 523264  }
  0x7c   : > { %v1269_v6 = vsel %vm1267_vm1, %v1268_v4, 0  ;;  %v1001_v7 = vpack.c.bf16 %v874_v5, %v873_v2  ;;  %v877_v11 = vld [vmem:[%s5874_s20 + $0x20] sm:$0xff]  ;;  %v878_v12 = vld [vmem:[%s5874_s20 + $0x28] sm:$0xff]  ;;  %v1002_v13 = vpack.c.bf16 %v876_v9, %v875_v8  ;;  %v879_v15 = vld [vmem:[%s5874_s20 + $0x30] sm:$0xff]  ;;  %vm4316_vm4 = vcmask 1042432   ;;  %s4641_s21 = sshll.u32 %s5447_s11, 7 }
  0x7d   : > { %v1271_v10 = vand.u32 %v1269_v6, %v1065_v1  ;;  %v1003_v14 = vpack.c.bf16 %v878_v12, %v877_v11  ;;  %v880_v16 = vld [vmem:[%s5874_s20 + $0x38] sm:$0xff]  ;;  %v881_v17 = vld [vmem:[%s5874_s20 + $0x40] sm:$0xff]  ;;  %v882_v18 = vld [vmem:[%s5874_s20 + $0x48] sm:$0xff]  ;;  %vm4318_vm5 = vcmask 1043456   ;;  %vm4320_vm6 = vcmask 1044480   ;;  %s4344_s27 = sshll.u32 %s5876_s24, 4  ;;  %s4342_s16 = scalar_lea.hbm %s7953_s8, %s4641_s21  ;;  %s4345_s27 = int_to_ptr.vmem [resolvable:$true] %s4344_s27 }
  0x7e   : > { %4848 = vmatprep.mubr.msk.bf16.mxu0 %vm1073_vm2, %v1001_v7  ;;  %v1004_v19 = vpack.c.bf16 %v880_v16, %v879_v15  ;;  %v937_v20 = vld [vmem:[%s5874_s20 + $0x200] sm:$0xff]  ;;  %v938_v21 = vld [vmem:[%s5874_s20 + $0x208] sm:$0xff]  ;;  %v1005_v22 = vpack.c.bf16 %v882_v18, %v881_v17  ;;  %v939_v24 = vld [vmem:[%s5874_s20 + $0x210] sm:$0xff]  ;;  %vm4322_vm7 = vcmask 1045504   ;;  %vm4324_vm8 = vcmask 1046528   ;;  %s4331_s25 = scalar_lea.sflag [#allocation4], %s862_s18 }
  0x7f   : > { %4846 = vmatprep.subr.bf16.mxu0 %v1271_v10  ;;  %5248 = vmatprep.subr.bf16.mxu1 %v1271_v10  ;;  %v1033_v23 = vpack.c.bf16 %v938_v21, %v937_v20  ;;  %v940_v25 = vld [vmem:[%s5874_s20 + $0x218] sm:$0xff]  ;;  %v941_v28 = vld [vmem:[%s5874_s20 + $0x220] sm:$0xff]  ;;  %v942_v29 = vld [vmem:[%s5874_s20 + $0x228] sm:$0xff]  ;;  %s5351_s22 = scalar_lea.vmem %s4345_s27, 128  ;;  %s5463_s30 = smov [#allocation3]  }
  0x80   : > { %4847 = vmatpush3.bf16.msra.mxu0 %v1271_v10  ;;  %5249 = vmatpush3.bf16.msra.mxu1 %v1271_v10  ;;  %v1034_v26 = vpack.c.bf16 %v940_v25, %v939_v24  ;;  %v5339_v27 = vld [vmem:[%s7948_s3 + $0x18] sm:$0xff]   ;;  %v883_v30 = vld [vmem:[%s5874_s20 + $0x50] sm:$0xff]  ;;  %v885_v32 = vld [vmem:[%s5874_s20 + $0x60] sm:$0xff]  ;;  %v1035_v33 = vpack.c.bf16 %v942_v29, %v941_v28  ;;  %p5352_p4 = scmp.ne.s32.totalorder %s4345_s27, %s5351_s22  ;;  %s5355_s10 = sshll.u32 %s5463_s30, 4  ;;  %s5356_s10 = int_to_ptr.vmem [resolvable:$false] %s5355_s10 }
  0x81   : > { %4912 = vmatprep.mubr.msk.bf16.mxu1 %vm1073_vm2, %v1033_v23  ;;  %v884_v31 = vld [vmem:[%s5874_s20 + $0x58] sm:$0xff]  ;;  %v886_v34 = vld [vmem:[%s5874_s20 + $0x68] sm:$0xff]  ;;  %4976 = vmatprep.subr.bf16.mxu1 %v5339_v27  ;;  %v943_v35 = vld [vmem:[%s5874_s20 + $0x230] sm:$0xff]  ;;  %s5357_s11 = scalar_lea.vmem %s5356_s10, 256  ;;  %p5358_p8 = scmp.lt.s32.totalorder %s4345_s27, %s5356_s10 }
  0x82   : > { %v944_v36 = vld [vmem:[%s5874_s20 + $0x238] sm:$0xff]  ;;  %v945_v37 = vld [vmem:[%s5874_s20 + $0x240] sm:$0xff]  ;;  %v946_v38 = vld [vmem:[%s5874_s20 + $0x248] sm:$0xff]  ;;  %v1006_v39 = vpack.c.bf16 %v884_v31, %v883_v30  ;;  %v1007_v40 = vpack.c.bf16 %v886_v34, %v885_v32  ;;  %p5353_p5 = pnand %p5352_p4, %p5581_p7  ;;  %p5359_p9 = scmp.lt.s32.totalorder %s5357_s11, %s5351_s22 }
  0x83   : > { %4849 = vmatmul.mubr.msk.bf16.vlgmr.msra.gmra.mxu0 %vm1073_vm2, %v1002_v13  ;;  %4913 = vmatmul.mubr.msk.bf16.vlgmr.msra.gmra.mxu1 %vm1073_vm2, %v1034_v26  ;;  %v1036_v41 = vpack.c.bf16 %v944_v36, %v943_v35  ;;  %v1037_v42 = vpack.c.bf16 %v946_v38, %v945_v37  ;;  %v887_v43 = vld [vmem:[%s5874_s20 + $0x70] sm:$0xff]  ;;  %v888_v44 = vld [vmem:[%s5874_s20 + $0x78] sm:$0xff]  ;;  %v889_v45 = vld [vmem:[%s5874_s20 + $0x80] sm:$0xff] }
  0x84   : > { %4852 = vmatprep.mubr.msk.bf16.mxu0 %vm1073_vm2, %v1003_v14  ;;  %4977 = vmatpush3.bf16.msra.mxu1 %v5339_v27  ;;  %v890_v46 = vld [vmem:[%s5874_s20 + $0x88] sm:$0xff]  ;;  %v947_v47 = vld [vmem:[%s5874_s20 + $0x250] sm:$0xff]  ;;  %v948_v48 = vld [vmem:[%s5874_s20 + $0x258] sm:$0xff]  ;;  %v1008_v52 = vpack.c.bf16 %v888_v44, %v887_v43  ;;  %p5354_p6 = pneg %p5353_p5  ;;  %p5360_p10 = por %p5359_p9, %p5358_p8 }
  0x85   : > { %4916 = vmatprep.mubr.msk.bf16.mxu1 %vm1073_vm2, %v1035_v33  ;;  %v5340_v49 = vld [vmem:[%s7948_s3 + $0x10] sm:$0xff]   ;;  %v949_v50 = vld [vmem:[%s5874_s20 + $0x260] sm:$0xff]  ;;  %v950_v51 = vld [vmem:[%s5874_s20 + $0x268] sm:$0xff]  ;;  %v1009_v53 = vpack.c.bf16 %v890_v46, %v889_v45  ;;  %v1038_v54 = vpack.c.bf16 %v948_v48, %v947_v47 }
  0x86   : > { %4978 = vmatprep.subr.bf16.mxu1 %v5340_v49  ;;  %v1039_v55 = vpack.c.bf16 %v950_v51, %v949_v50  ;;  %v891_v56 = vld [vmem:[%s5874_s20 + $0x90] sm:$0xff]  ;;  %v892_v57 = vld [vmem:[%s5874_s20 + $0x98] sm:$0xff]  ;;  %v893_v58 = vld [vmem:[%s5874_s20 + $0xa0] sm:$0xff]  ;;  %p5361_p11 = pnand %p5360_p10, %p5354_p6 }
  0x87   : > { %v894_v59 = vld [vmem:[%s5874_s20 + $0xa8] sm:$0xff]  ;;  %v951_v60 = vld [vmem:[%s5874_s20 + $0x270] sm:$0xff]  ;;  %v952_v61 = vld [vmem:[%s5874_s20 + $0x278] sm:$0xff]  ;;  %v1010_v1 = vpack.c.bf16 %v892_v57, %v891_v56 }
  0x88   : > { %4979 = vmatpush3.bf16.msra.mxu1 %v5340_v49  ;;  %v953_v62 = vld [vmem:[%s5874_s20 + $0x280] sm:$0xff]  ;;  %v954_v63 = vld [vmem:[%s5874_s20 + $0x288] sm:$0xff]  ;;  %v1011_v2 = vpack.c.bf16 %v894_v59, %v893_v58  ;;  %v1040_v3 = vpack.c.bf16 %v952_v61, %v951_v60  ;;  %v895_v5 = vld [vmem:[%s5874_s20 + $0xb0] sm:$0xff] }
  0x89   : > { %v5341_v0 = vld [vmem:[%s7948_s3 + $0x8] sm:$0xff]   ;;  %v1041_v4 = vpack.c.bf16 %v954_v63, %v953_v62  ;;  %v896_v6 = vld [vmem:[%s5874_s20 + $0xb8] sm:$0xff]  ;;  %v897_v7 = vld [vmem:[%s5874_s20 + $0xc0] sm:$0xff] }
  0x8a   : > { %4980 = vmatprep.subr.bf16.mxu1 %v5341_v0  ;;  %v898_v8 = vld [vmem:[%s5874_s20 + $0xc8] sm:$0xff]  ;;  %v955_v9 = vld [vmem:[%s5874_s20 + $0x290] sm:$0xff]  ;;  %v956_v10 = vld [vmem:[%s5874_s20 + $0x298] sm:$0xff]  ;;  %v1012_v14 = vpack.c.bf16 %v896_v6, %v895_v5 }
  0x8b   : > { %4853 = vmatmul.mubr.msk.bf16.gmra.mxu0 %vm1073_vm2, %v1004_v19  ;;  %4917 = vmatmul.mubr.msk.bf16.gmra.mxu1 %vm1073_vm2, %v1036_v41  ;;  %v5342_v11 = vld [vmem:[%s7948_s3] sm:$0xff]   ;;  %v958_v13 = vld [vmem:[%s5874_s20 + $0x2a8] sm:$0xff]  ;;  %v1013_v15 = vpack.c.bf16 %v898_v8, %v897_v7  ;;  %v1042_v16 = vpack.c.bf16 %v956_v10, %v955_v9  ;;  %v899_v18 = vld [vmem:[%s5874_s20 + $0xd0] sm:$0xff] }
  0x8c   : > { %4856 = vmatprep.mubr.msk.bf16.mxu0 %vm1073_vm2, %v1005_v22  ;;  %4920 = vmatprep.mubr.msk.bf16.mxu1 %vm1073_vm2, %v1037_v42  ;;  %v957_v12 = vld [vmem:[%s5874_s20 + $0x2a0] sm:$0xff]  ;;  %v900_v19 = vld [vmem:[%s5874_s20 + $0xd8] sm:$0xff]  ;;  %v902_v21 = vld [vmem:[%s5874_s20 + $0xe8] sm:$0xff] }
  0x8d   : > { %4981 = vmatpush3.bf16.msra.mxu1 %v5341_v0  ;;  %v1043_v17 = vpack.c.bf16 %v958_v13, %v957_v12  ;;  %v901_v20 = vld [vmem:[%s5874_s20 + $0xe0] sm:$0xff]  ;;  %v959_v22 = vld [vmem:[%s5874_s20 + $0x2b0] sm:$0xff]  ;;  %v960_v23 = vld [vmem:[%s5874_s20 + $0x2b8] sm:$0xff]  ;;  %v1014_v26 = vpack.c.bf16 %v900_v19, %v899_v18 }
  0x8e   : > { %4982 = vmatprep.subr.bf16.mxu1 %v5342_v11  ;;  %v961_v24 = vld [vmem:[%s5874_s20 + $0x2c0] sm:$0xff]  ;;  %v962_v25 = vld [vmem:[%s5874_s20 + $0x2c8] sm:$0xff]  ;;  %v1015_v27 = vpack.c.bf16 %v902_v21, %v901_v20  ;;  %v1044_v28 = vpack.c.bf16 %v960_v23, %v959_v22  ;;  %v903_v30 = vld [vmem:[%s5874_s20 + $0xf0] sm:$0xff] }
  0x8f   : > { %v1045_v29 = vpack.c.bf16 %v962_v25, %v961_v24  ;;  %v904_v31 = vld [vmem:[%s5874_s20 + $0xf8] sm:$0xff]  ;;  %v905_v32 = vld [vmem:[%s5874_s20 + $0x100] sm:$0xff]  ;;  %v906_v33 = vld [vmem:[%s5874_s20 + $0x108] sm:$0xff] }
  0x90   : > { %v963_v34 = vld [vmem:[%s5874_s20 + $0x2d0] sm:$0xff]  ;;  %v964_v35 = vld [vmem:[%s5874_s20 + $0x2d8] sm:$0xff]  ;;  %v965_v36 = vld [vmem:[%s5874_s20 + $0x2e0] sm:$0xff]  ;;  %v1016_v38 = vpack.c.bf16 %v904_v31, %v903_v30 }
  0x91   : > { %4983 = vmatpush3.bf16.msra.mxu1 %v5342_v11  ;;  %v966_v37 = vld [vmem:[%s5874_s20 + $0x2e8] sm:$0xff]  ;;  %v907_v42 = vld [vmem:[%s5874_s20 + $0x110] sm:$0xff]  ;;  %v908_v43 = vld [vmem:[%s5874_s20 + $0x118] sm:$0xff] }
  0x92   : > { %v1047_v41 = vpack.c.bf16 %v966_v37, %v965_v36  ;;  %v909_v44 = vld [vmem:[%s5874_s20 + $0x120] sm:$0xff]  ;;  %v910_v45 = vld [vmem:[%s5874_s20 + $0x128] sm:$0xff]  ;;  %v967_v46 = vld [vmem:[%s5874_s20 + $0x2f0] sm:$0xff]  ;;  %v1018_v50 = vpack.c.bf16 %v908_v43, %v907_v42 }
  0x93   : > { %4857 = vmatmul.mubr.msk.bf16.gmra.mxu0 %vm1073_vm2, %v1006_v39  ;;  %4921 = vmatmul.mubr.msk.bf16.gmra.mxu1 %vm1073_vm2, %v1038_v54  ;;  %v1017_v39 = vpack.c.bf16 %v906_v33, %v905_v32  ;;  %v968_v47 = vld [vmem:[%s5874_s20 + $0x2f8] sm:$0xff]  ;;  %v969_v48 = vld [vmem:[%s5874_s20 + $0x300] sm:$0xff]  ;;  %v970_v49 = vld [vmem:[%s5874_s20 + $0x308] sm:$0xff]  ;;  %v1019_v51 = vpack.c.bf16 %v910_v45, %v909_v44 }
  0x94   : > { %4860 = vmatprep.mubr.msk.bf16.mxu0 %vm1073_vm2, %v1007_v40  ;;  %4924 = vmatprep.mubr.msk.bf16.mxu1 %vm1073_vm2, %v1039_v55  ;;  %v1046_v40 = vpack.c.bf16 %v964_v35, %v963_v34  ;;  %v911_v54 = vld [vmem:[%s5874_s20 + $0x130] sm:$0xff]  ;;  %v912_v55 = vld [vmem:[%s5874_s20 + $0x138] sm:$0xff]  ;;  %v913_v56 = vld [vmem:[%s5874_s20 + $0x140] sm:$0xff] }
  0x95   : > { %v914_v57 = vld [vmem:[%s5874_s20 + $0x148] sm:$0xff]  ;;  %v971_v58 = vld [vmem:[%s5874_s20 + $0x310] sm:$0xff]  ;;  %v972_v59 = vld [vmem:[%s5874_s20 + $0x318] sm:$0xff]  ;;  %v1020_v62 = vpack.c.bf16 %v912_v55, %v911_v54 }
  0x96   : > { %v973_v60 = vld [vmem:[%s5874_s20 + $0x320] sm:$0xff]  ;;  %v974_v61 = vld [vmem:[%s5874_s20 + $0x328] sm:$0xff]  ;;  %v1021_v63 = vpack.c.bf16 %v914_v57, %v913_v56  ;;  %v1050_v0 = vpack.c.bf16 %v972_v59, %v971_v58  ;;  %v975_v6 = vld [vmem:[%s5874_s20 + $0x330] sm:$0xff] }
  0x97   : > { %v918_v5 = vld [vmem:[%s5874_s20 + $0x168] sm:$0xff]  ;;  %v976_v7 = vld [vmem:[%s5874_s20 + $0x338] sm:$0xff]  ;;  %v977_v8 = vld [vmem:[%s5874_s20 + $0x340] sm:$0xff] }
  0x98   : > { %v978_v9 = vld [vmem:[%s5874_s20 + $0x348] sm:$0xff]  ;;  %v1052_v12 = vpack.c.bf16 %v976_v7, %v975_v6  ;;  %v979_v18 = vld [vmem:[%s5874_s20 + $0x350] sm:$0xff]  ;;  %v980_v19 = vld [vmem:[%s5874_s20 + $0x358] sm:$0xff] }
  0x99   : > { %v1053_v13 = vpack.c.bf16 %v978_v9, %v977_v8  ;;  %v981_v20 = vld [vmem:[%s5874_s20 + $0x360] sm:$0xff]  ;;  %v982_v21 = vld [vmem:[%s5874_s20 + $0x368] sm:$0xff]  ;;  %v1054_v24 = vpack.c.bf16 %v980_v19, %v979_v18  ;;  %v983_v30 = vld [vmem:[%s5874_s20 + $0x370] sm:$0xff] }
  0x9a   : > { %v1055_v25 = vpack.c.bf16 %v982_v21, %v981_v20  ;;  %v984_v31 = vld [vmem:[%s5874_s20 + $0x378] sm:$0xff]  ;;  %v985_v32 = vld [vmem:[%s5874_s20 + $0x380] sm:$0xff]  ;;  %v986_v33 = vld [vmem:[%s5874_s20 + $0x388] sm:$0xff] }
  0x9b   : > { %4861 = vmatmul.mubr.msk.bf16.gmra.mxu0 %vm1073_vm2, %v1008_v52  ;;  %4925 = vmatmul.mubr.msk.bf16.gmra.mxu1 %vm1073_vm2, %v1040_v3  ;;  %v1048_v52 = vpack.c.bf16 %v968_v47, %v967_v46  ;;  %v916_v3 = vld [vmem:[%s5874_s20 + $0x158] sm:$0xff]  ;;  %v1056_v36 = vpack.c.bf16 %v984_v31, %v983_v30  ;;  %v1057_v37 = vpack.c.bf16 %v986_v33, %v985_v32  ;;  %v987_v42 = vld [vmem:[%s5874_s20 + $0x390] sm:$0xff]  ;;  %v989_v44 = vld [vmem:[%s5874_s20 + $0x3a0] sm:$0xff] }
  0x9c   : > { %4864 = vmatprep.mubr.msk.bf16.mxu0 %vm1073_vm2, %v1009_v53  ;;  %4928 = vmatprep.mubr.msk.bf16.mxu1 %vm1073_vm2, %v1041_v4  ;;  %v1049_v53 = vpack.c.bf16 %v970_v49, %v969_v48  ;;  %v917_v4 = vld [vmem:[%s5874_s20 + $0x160] sm:$0xff]  ;;  %v988_v43 = vld [vmem:[%s5874_s20 + $0x398] sm:$0xff]  ;;  %v990_v45 = vld [vmem:[%s5874_s20 + $0x3a8] sm:$0xff] }
  0x9d   : > { %v1023_v11 = vpack.c.bf16 %v918_v5, %v917_v4  ;;  %v1058_v48 = vpack.c.bf16 %v988_v43, %v987_v42  ;;  %v1059_v49 = vpack.c.bf16 %v990_v45, %v989_v44  ;;  %v991_v54 = vld [vmem:[%s5874_s20 + $0x3b0] sm:$0xff]  ;;  %v992_v55 = vld [vmem:[%s5874_s20 + $0x3b8] sm:$0xff]  ;;  %v993_v56 = vld [vmem:[%s5874_s20 + $0x3c0] sm:$0xff] }
  0x9e   : > { %v994_v57 = vld [vmem:[%s5874_s20 + $0x3c8] sm:$0xff]  ;;  %v999_v7 = vld [vmem:[%s5874_s20 + $0x3f0] sm:$0xff]  ;;  %v1000_v8 = vld [vmem:[%s5874_s20 + $0x3f8] sm:$0xff] }
  0x9f   : > { %v1064_v9 = vpack.c.bf16 %v1000_v8, %v999_v7 }
  0xa3   : > { %4865 = vmatmul.mubr.msk.bf16.gmra.mxu0 %vm1073_vm2, %v1010_v1  ;;  %4929 = vmatmul.mubr.msk.bf16.gmra.mxu1 %vm1073_vm2, %v1042_v16  ;;  %v1051_v1 = vpack.c.bf16 %v974_v61, %v973_v60  ;;  %v921_v16 = vld [vmem:[%s5874_s20 + $0x180] sm:$0xff]  ;;  %v1060_v60 = vpack.c.bf16 %v992_v55, %v991_v54  ;;  %v1061_v61 = vpack.c.bf16 %v994_v57, %v993_v56  ;;  %v5345_v57 = vld [vmem:[%s7951_s6 + $0x8] sm:$0xff]  }
  0xa4   : > { %4868 = vmatprep.mubr.msk.bf16.mxu0 %vm1073_vm2, %v1011_v2  ;;  %4932 = vmatprep.mubr.msk.bf16.mxu1 %vm1073_vm2, %v1043_v17  ;;  %v915_v2 = vld [vmem:[%s5874_s20 + $0x150] sm:$0xff]  ;;  %v922_v17 = vld [vmem:[%s5874_s20 + $0x188] sm:$0xff] }
  0xa5   : > { %v1022_v10 = vpack.c.bf16 %v916_v3, %v915_v2  ;;  %v1025_v23 = vpack.c.bf16 %v922_v17, %v921_v16  ;;  %v997_v2 = vld [vmem:[%s5874_s20 + $0x3e0] sm:$0xff]  ;;  %v998_v3 = vld [vmem:[%s5874_s20 + $0x3e8] sm:$0xff] }
  0xa6   : > { %v1063_v6 = vpack.c.bf16 %v998_v3, %v997_v2 }
  0xab   : > { %4869 = vmatmul.mubr.msk.bf16.gmra.mxu0 %vm1073_vm2, %v1012_v14  ;;  %4933 = vmatmul.mubr.msk.bf16.gmra.mxu1 %vm1073_vm2, %v1044_v28  ;;  %v919_v14 = vld [vmem:[%s5874_s20 + $0x170] sm:$0xff]  ;;  %v925_v28 = vld [vmem:[%s5874_s20 + $0x1a0] sm:$0xff] }
  0xac   : > { %4872 = vmatprep.mubr.msk.bf16.mxu0 %vm1073_vm2, %v1013_v15  ;;  %4936 = vmatprep.mubr.msk.bf16.mxu1 %vm1073_vm2, %v1045_v29  ;;  %v920_v15 = vld [vmem:[%s5874_s20 + $0x178] sm:$0xff]  ;;  %v926_v29 = vld [vmem:[%s5874_s20 + $0x1a8] sm:$0xff] }
  0xad   : > { %v1024_v22 = vpack.c.bf16 %v920_v15, %v919_v14  ;;  %v1027_v35 = vpack.c.bf16 %v926_v29, %v925_v28  ;;  %v6098_v14 = vld [vmem:[%s7947_s2] ss:$0 sm:$0xff] }
  0xb3   : > { %4873 = vmatmul.mubr.msk.bf16.gmra.mxu0 %vm1073_vm2, %v1014_v26  ;;  %4937 = vmatmul.mubr.msk.bf16.gmra.mxu1 %vm1073_vm2, %v1046_v40  ;;  %v923_v26 = vld [vmem:[%s5874_s20 + $0x190] sm:$0xff]  ;;  %v929_v40 = vld [vmem:[%s5874_s20 + $0x1c0] sm:$0xff] }
  0xb4   : > { %4876 = vmatprep.mubr.msk.bf16.mxu0 %vm1073_vm2, %v1015_v27  ;;  %4940 = vmatprep.mubr.msk.bf16.mxu1 %vm1073_vm2, %v1047_v41  ;;  %v924_v27 = vld [vmem:[%s5874_s20 + $0x198] sm:$0xff]  ;;  %v930_v41 = vld [vmem:[%s5874_s20 + $0x1c8] sm:$0xff] }
  0xb5   : > { %v1026_v34 = vpack.c.bf16 %v924_v27, %v923_v26  ;;  %v1029_v47 = vpack.c.bf16 %v930_v41, %v929_v40 }
  0xbb   : > { %4877 = vmatmul.mubr.msk.bf16.gmra.mxu0 %vm1073_vm2, %v1016_v38  ;;  %4941 = vmatmul.mubr.msk.bf16.gmra.mxu1 %vm1073_vm2, %v1048_v52  ;;  %v927_v38 = vld [vmem:[%s5874_s20 + $0x1b0] sm:$0xff]  ;;  %v933_v52 = vld [vmem:[%s5874_s20 + $0x1e0] sm:$0xff] }
  0xbc   : > { %4880 = vmatprep.mubr.msk.bf16.mxu0 %vm1073_vm2, %v1017_v39  ;;  %4944 = vmatprep.mubr.msk.bf16.mxu1 %vm1073_vm2, %v1049_v53  ;;  %v928_v39 = vld [vmem:[%s5874_s20 + $0x1b8] sm:$0xff]  ;;  %v934_v53 = vld [vmem:[%s5874_s20 + $0x1e8] sm:$0xff] }
  0xbd   : > { %v1028_v46 = vpack.c.bf16 %v928_v39, %v927_v38  ;;  %v1031_v59 = vpack.c.bf16 %v934_v53, %v933_v52 }
  0xc3   : > { %4881 = vmatmul.mubr.msk.bf16.gmra.mxu0 %vm1073_vm2, %v1018_v50  ;;  %4945 = vmatmul.mubr.msk.bf16.gmra.mxu1 %vm1073_vm2, %v1050_v0  ;;  %v931_v50 = vld [vmem:[%s5874_s20 + $0x1d0] sm:$0xff] }
  0xc4   : > { %4884 = vmatprep.mubr.msk.bf16.mxu0 %vm1073_vm2, %v1019_v51  ;;  %4948 = vmatprep.mubr.msk.bf16.mxu1 %vm1073_vm2, %v1051_v1  ;;  %v932_v51 = vld [vmem:[%s5874_s20 + $0x1d8] sm:$0xff]  ;;  %v995_v0 = vld [vmem:[%s5874_s20 + $0x3d0] sm:$0xff] }
  0xc5   : > { %v1030_v58 = vpack.c.bf16 %v932_v51, %v931_v50  ;;  %v996_v1 = vld [vmem:[%s5874_s20 + $0x3d8] sm:$0xff] }
  0xc6   : > { %v1062_v5 = vpack.c.bf16 %v996_v1, %v995_v0 }
  0xcb   : > { %4885 = vmatmul.mubr.msk.bf16.gmra.mxu0 %vm1073_vm2, %v1020_v62  ;;  %4949 = vmatmul.mubr.msk.bf16.gmra.mxu1 %vm1073_vm2, %v1052_v12  ;;  %v935_v62 = vld [vmem:[%s5874_s20 + $0x1f0] sm:$0xff] }
  0xcc   : > { %4888 = vmatprep.mubr.msk.bf16.mxu0 %vm1073_vm2, %v1021_v63  ;;  %4952 = vmatprep.mubr.msk.bf16.mxu1 %vm1073_vm2, %v1053_v13  ;;  %v936_v63 = vld [vmem:[%s5874_s20 + $0x1f8] sm:$0xff]  ;;  %v5344_v12 = vld [vmem:[%s7951_s6 + $0x10] sm:$0xff]  }
  0xcd   : > { %v1032_v4 = vpack.c.bf16 %v936_v63, %v935_v62 }
  0xd3   : > { %4889 = vmatmul.mubr.msk.bf16.gmra.mxu0 %vm1073_vm2, %v1022_v10  ;;  %4953 = vmatmul.mubr.msk.bf16.gmra.mxu1 %vm1073_vm2, %v1054_v24  ;;  %v5343_v10 = vld [vmem:[%s7951_s6 + $0x18] sm:$0xff]  }
  0xd4   : > { %4892 = vmatprep.mubr.msk.bf16.mxu0 %vm1073_vm2, %v1023_v11  ;;  %4956 = vmatprep.mubr.msk.bf16.mxu1 %vm1073_vm2, %v1055_v25 }
  0xd5   : > { %5112 = vmatprep.subr.bf16.mxu0 %v5343_v10 }
  0xd6   : > { %5113 = vmatpush3.bf16.msra.mxu0 %v5343_v10 }
  0xd7   : > { %5114 = vmatprep.subr.bf16.mxu0 %v5344_v12 }
  0xda   : > { %5115 = vmatpush3.bf16.msra.mxu0 %v5344_v12 }
  0xdb   : > { %4893 = vmatmul.mubr.msk.bf16.gmra.mxu0 %vm1073_vm2, %v1024_v22  ;;  %4957 = vmatmul.mubr.msk.bf16.gmra.mxu1 %vm1073_vm2, %v1056_v36 }
  0xdc   : > { %4896 = vmatprep.mubr.msk.bf16.mxu0 %vm1073_vm2, %v1025_v23  ;;  %4960 = vmatprep.mubr.msk.bf16.mxu1 %vm1073_vm2, %v1057_v37 }
  0xdd   : > { %5116 = vmatprep.subr.bf16.mxu0 %v5345_v57 }
  0xde   : > { %5117 = vmatpush3.bf16.msra.mxu0 %v5345_v57 }
  0xe3   : > { %4897 = vmatmul.mubr.msk.bf16.gmra.mxu0 %vm1073_vm2, %v1026_v34  ;;  %4961 = vmatmul.mubr.msk.bf16.gmra.mxu1 %vm1073_vm2, %v1058_v48 }
  0xe4   : > { %4900 = vmatprep.mubr.msk.bf16.mxu0 %vm1073_vm2, %v1027_v35  ;;  %4964 = vmatprep.mubr.msk.bf16.mxu1 %vm1073_vm2, %v1059_v49 }
  0xeb   : > { %4901 = vmatmul.mubr.msk.bf16.gmra.mxu0 %vm1073_vm2, %v1028_v46  ;;  %4965 = vmatmul.mubr.msk.bf16.gmra.mxu1 %vm1073_vm2, %v1060_v60 }
  0xec   : > { %4904 = vmatprep.mubr.msk.bf16.mxu0 %vm1073_vm2, %v1029_v47  ;;  %4968 = vmatprep.mubr.msk.bf16.mxu1 %vm1073_vm2, %v1061_v61 }
  0xf3   : > { %4905 = vmatmul.mubr.msk.bf16.gmra.mxu0 %vm1073_vm2, %v1030_v58  ;;  %4969 = vmatmul.mubr.msk.bf16.gmra.mxu1 %vm1073_vm2, %v1062_v5 }
  0xf4   : > { %4908 = vmatprep.mubr.msk.bf16.mxu0 %vm1073_vm2, %v1031_v59  ;;  %4972 = vmatprep.mubr.msk.bf16.mxu1 %vm1073_vm2, %v1063_v6 }
  0xfb   : > { %4909 = vmatmul.mubr.msk.bf16.gmra.mxu0 %vm1073_vm2, %v1032_v4  ;;  %4973 = vmatmul.mubr.msk.bf16.gmra.mxu1 %vm1073_vm2, %v1064_v9 }
 0x143   : > { %v4850_v11 = vpop.f32.mrf.mxu0  ;;  %v6115_v25 = vpop.f32.mrf.mxu1 }
 0x144   : > { %v6107_v18 = vadd.f32 %v4850_v11, %v6098_v14 }
 0x145   : > { %v1307_v13 = vpop.f32.mrf.mxu0  ;;  %v6122_v29 = vpop.f32.mrf.mxu1 }
 0x146   : > { %v6101_v16 = vadd.f32 %v6098_v14, %v1307_v13  ;;  %v7981_v26 = vmax.f32 %v6107_v18, 0.0 }
 0x147   : > { %v4851_v15 = vpop.f32.mrf.mxu0  ;;  %v6135_v34 = vpop.f32.mrf.mxu1 }
 0x148   : > { %v6104_v17 = vadd.f32 %v4851_v15, %v6098_v14  ;;  %v7980_v23 = vmax.f32 %v6101_v16, 0.0 }
 0x149   : > { %v1310_v19 = vpop.f32.mrf.mxu0  ;;  %v6144_v38 = vpop.f32.mrf.mxu1 }
 0x14a   : > { %v6110_v20 = vadd.f32 %v6098_v14, %v1310_v19  ;;  %v7979_v21 = vmax.f32 %v6104_v17, 0.0 }
 0x14b   : > { %v4854_v22 = vpop.f32.mrf.mxu0  ;;  %v6149_v43 = vpop.f32.mrf.mxu1 }
 0x14c   : > { %v7978_v24 = vmax.f32 %v6110_v20, 0.0  ;;  %v1947_v30 = vpack.c.bf16 %v7979_v21, %v7981_v26  ;;  %v6138_v35 = vadd.f32 %v4854_v22, %v6098_v14 }
 0x14d   : > { %v1323_v27 = vpop.f32.mrf.mxu0  ;;  %v6156_v47 = vpop.f32.mrf.mxu1 }
 0x14e   : > { %v1946_v28 = vpack.c.bf16 %v7978_v24, %v7980_v23  ;;  %v6129_v32 = vadd.f32 %v6098_v14, %v1323_v27  ;;  %v7975_v44 = vmax.f32 %v6138_v35, 0.0 }
 0x14f   : > { %v4855_v31 = vpop.f32.mrf.mxu0  ;;  %v6169_v52 = vpop.f32.mrf.mxu1 }
 0x150   : > { %8159 = vst [vmem:[#allocation10_spill] sm:$0xff] %v6129_v32  ;;  %v6132_v33 = vadd.f32 %v4855_v31, %v6098_v14  ;;  %4984 = vmatprep.mubr.msk.bf16.mxu1 %vm2177_vm3, %v1946_v28  ;;  %v7972_v41 = vmax.f32 %v6129_v32, 0.0  ;;  %v6584_v32 = vadd.f32 %v6098_v14, %v6122_v29 }
 0x151   : > { %v1326_v36 = vpop.f32.mrf.mxu0  ;;  %4985 = vmatmul.mubr.msk.bf16.vlgmr.msra.gmra.mxu1 %vm2177_vm3, %v1947_v30  ;;  %v6178_v56 = vpop.f32.mrf.mxu1 }
 0x152   : > { %8160 = vst [vmem:[#allocation11_spill] sm:$0xff] %v6132_v33  ;;  %v6142_v37 = vadd.f32 %v6098_v14, %v1326_v36  ;;  %v7971_v39 = vmax.f32 %v6132_v33, 0.0 }
 0x153   : > { %v4858_v40 = vpop.f32.mrf.mxu0  ;;  %v6186_v62 = vpop.f32.mrf.mxu1 }
 0x154   : > { %8161 = vst [vmem:[#allocation12_spill] sm:$0xff] %v6142_v37  ;;  %v7970_v42 = vmax.f32 %v6142_v37, 0.0  ;;  %v1949_v48 = vpack.c.bf16 %v7971_v39, %v7975_v44  ;;  %v6172_v53 = vadd.f32 %v4858_v40, %v6098_v14 }
 0x155   : > { %v1339_v45 = vpop.f32.mrf.mxu0  ;;  %v6193_v2 = vpop.f32.mrf.mxu1 }
 0x156   : > { %v1948_v46 = vpack.c.bf16 %v7970_v42, %v7972_v41  ;;  %v6163_v50 = vadd.f32 %v6098_v14, %v1339_v45  ;;  %8164 = vst [vmem:[#allocation15_spill] sm:$0xff] %v6172_v53  ;;  %v7969_v63 = vmax.f32 %v6172_v53, 0.0 }
 0x157   : > { %v4859_v49 = vpop.f32.mrf.mxu0  ;;  %v6206_v7 = vpop.f32.mrf.mxu1 }
 0x158   : > { %8162 = vst [vmem:[#allocation13_spill] sm:$0xff] %v6163_v50  ;;  %v6166_v51 = vadd.f32 %v4859_v49, %v6098_v14  ;;  %4988 = vmatprep.mubr.msk.bf16.mxu1 %vm2177_vm3, %v1948_v46  ;;  %v7968_v60 = vmax.f32 %v6163_v50, 0.0 }
 0x159   : > { %v1342_v54 = vpop.f32.mrf.mxu0  ;;  %4989 = vmatmul.mubr.msk.bf16.gmra.mxu1 %vm2177_vm3, %v1949_v48  ;;  %v6215_v11 = vpop.f32.mrf.mxu1 }
 0x15a   : > { %8163 = vst [vmem:[#allocation14_spill] sm:$0xff] %v6166_v51  ;;  %v6176_v55 = vadd.f32 %v6098_v14, %v1342_v54  ;;  %v7967_v58 = vmax.f32 %v6166_v51, 0.0 }
 0x15b   : > { %v4862_v59 = vpop.f32.mrf.mxu0  ;;  %v6220_v22 = vpop.f32.mrf.mxu1 }
 0x15c   : > { %8165 = vst [vmem:[#allocation16_spill] sm:$0xff] %v6176_v55  ;;  %v7966_v61 = vmax.f32 %v6176_v55, 0.0  ;;  %v1951_v3 = vpack.c.bf16 %v7967_v58, %v7969_v63  ;;  %v6209_v8 = vadd.f32 %v4862_v59, %v6098_v14 }
 0x15d   : > { %v1355_v0 = vpop.f32.mrf.mxu0  ;;  %v6227_v31 = vpop.f32.mrf.mxu1 }
 0x15e   : > { %v1950_v1 = vpack.c.bf16 %v7966_v61, %v7968_v60  ;;  %v6200_v5 = vadd.f32 %v6098_v14, %v1355_v0  ;;  %8168 = vst [vmem:[#allocation19_spill] sm:$0xff] %v6209_v8  ;;  %v7963_v27 = vmax.f32 %v6209_v8, 0.0 }
 0x15f   : > { %v4863_v4 = vpop.f32.mrf.mxu0  ;;  %v6240_v48 = vpop.f32.mrf.mxu1 }
 0x160   : > { %8166 = vst [vmem:[#allocation17_spill] sm:$0xff] %v6200_v5  ;;  %v6203_v6 = vadd.f32 %v4863_v4, %v6098_v14  ;;  %4992 = vmatprep.mubr.msk.bf16.mxu1 %vm2177_vm3, %v1950_v1  ;;  %v7960_v15 = vmax.f32 %v6200_v5, 0.0 }
 0x161   : > { %v1358_v9 = vpop.f32.mrf.mxu0  ;;  %4993 = vmatmul.mubr.msk.bf16.gmra.mxu1 %vm2177_vm3, %v1951_v3  ;;  %v6249_v59 = vpop.f32.mrf.mxu1 }
 0x162   : > { %8167 = vst [vmem:[#allocation18_spill] sm:$0xff] %v6203_v6  ;;  %v6213_v10 = vadd.f32 %v6098_v14, %v1358_v9  ;;  %v7959_v12 = vmax.f32 %v6203_v6, 0.0 }
 0x163   : > { %v4866_v13 = vpop.f32.mrf.mxu0  ;;  %v6254_v9 = vpop.f32.mrf.mxu1 }
 0x164   : > { %8169 = vst [vmem:[#allocation20_spill] sm:$0xff] %v6213_v10  ;;  %v7958_v19 = vmax.f32 %v6213_v10, 0.0  ;;  %v1953_v36 = vpack.c.bf16 %v7959_v12, %v7963_v27  ;;  %v6243_v49 = vadd.f32 %v4866_v13, %v6098_v14 }
 0x165   : > { %v1371_v28 = vpop.f32.mrf.mxu0 }
 0x166   : > { %v1952_v30 = vpack.c.bf16 %v7958_v19, %v7960_v15  ;;  %v6234_v45 = vadd.f32 %v6098_v14, %v1371_v28  ;;  %8172 = vst [vmem:[#allocation23_spill] sm:$0xff] %v6243_v49  ;;  %v7965_v13 = vmax.f32 %v6243_v49, 0.0 }
 0x167   : > { %v4867_v40 = vpop.f32.mrf.mxu0 }
 0x168   : > { %8170 = vst [vmem:[#allocation21_spill] sm:$0xff] %v6234_v45  ;;  %v6237_v46 = vadd.f32 %v4867_v40, %v6098_v14  ;;  %4996 = vmatprep.mubr.msk.bf16.mxu1 %vm2177_vm3, %v1952_v30  ;;  %v7962_v3 = vmax.f32 %v6234_v45, 0.0 }
 0x169   : > { %v1374_v54 = vpop.f32.mrf.mxu0  ;;  %4997 = vmatmul.mubr.msk.bf16.gmra.mxu1 %vm2177_vm3, %v1953_v36  ;;  %v6261_v36 = vpop.f32.mrf.mxu1 }
 0x16a   : > { %8171 = vst [vmem:[#allocation22_spill] sm:$0xff] %v6237_v46  ;;  %v6247_v57 = vadd.f32 %v6098_v14, %v1374_v54  ;;  %v7964_v0 = vmax.f32 %v6237_v46, 0.0 }
 0x16b   : > { %v4870_v1 = vpop.f32.mrf.mxu0  ;;  %v6274_v15 = vpop.f32.mrf.mxu1 }
 0x16c   : > { %8173 = vst [vmem:[#allocation24_spill] sm:$0xff] %v6247_v57  ;;  %v7961_v4 = vmax.f32 %v6247_v57, 0.0  ;;  %v1955_v40 = vpack.c.bf16 %v7964_v0, %v7965_v13 }
 0x16d   : > { %v1387_v28 = vpop.f32.mrf.mxu0  ;;  %v6283_v0 = vpop.f32.mrf.mxu1 }
 0x16e   : > { %v1954_v30 = vpack.c.bf16 %v7961_v4, %v7962_v3  ;;  %v6268_v19 = vadd.f32 %v6098_v14, %v1387_v28  ;;  %v6277_v4 = vadd.f32 %v4870_v1, %v6098_v14 }
 0x16f   : > { %v4871_v54 = vpop.f32.mrf.mxu0  ;;  %v6288_v61 = vpop.f32.mrf.mxu1 }
 0x170   : > { %8174 = vst [vmem:[#allocation25_spill] sm:$0xff] %v6268_v19  ;;  %v6271_v12 = vadd.f32 %v4871_v54, %v6098_v14  ;;  %5000 = vmatprep.mubr.msk.bf16.mxu1 %vm2177_vm3, %v1954_v30  ;;  %8176 = vst [vmem:[#allocation27_spill] sm:$0xff] %v6277_v4  ;;  %v7974_v54 = vmax.f32 %v6268_v19, 0.0  ;;  %v7977_v1 = vmax.f32 %v6277_v4, 0.0 }
 0x171   : > { %v1390_v3 = vpop.f32.mrf.mxu0  ;;  %5001 = vmatmul.mubr.msk.bf16.gmra.mxu1 %vm2177_vm3, %v1955_v40  ;;  %v6295_v40 = vpop.f32.mrf.mxu1 }
 0x172   : > { %8175 = vst [vmem:[#allocation26_spill] sm:$0xff] %v6271_v12  ;;  %v6281_v27 = vadd.f32 %v6098_v14, %v1390_v3  ;;  %v7976_v28 = vmax.f32 %v6271_v12, 0.0 }
 0x173   : > { %v4874_v13 = vpop.f32.mrf.mxu0  ;;  %v6308_v41 = vpop.f32.mrf.mxu1 }
 0x174   : > { %8177 = vst [vmem:[#allocation28_spill] sm:$0xff] %v6281_v27  ;;  %v7973_v30 = vmax.f32 %v6281_v27, 0.0  ;;  %v1957_v60 = vpack.c.bf16 %v7976_v28, %v7977_v1 }
 0x175   : > { %v1403_v58 = vpop.f32.mrf.mxu0  ;;  %v6317_v28 = vpop.f32.mrf.mxu1 }
 0x176   : > { %v1956_v3 = vpack.c.bf16 %v7973_v30, %v7974_v54  ;;  %v6302_v42 = vadd.f32 %v6098_v14, %v1403_v58  ;;  %v6311_v30 = vadd.f32 %v4874_v13, %v6098_v14  ;;  %v5346_v58 = vld [vmem:[%s7951_s6] sm:$0xff]  }
 0x177   : > { %v4875_v63 = vpop.f32.mrf.mxu0  ;;  %v6325_v24 = vpop.f32.mrf.mxu1  ;;  %5118 = vmatprep.subr.bf16.mxu0 %v5346_v58 }
 0x178   : > { %8178 = vst [vmem:[#allocation29_spill] sm:$0xff] %v6302_v42  ;;  %v6305_v39 = vadd.f32 %v4875_v63, %v6098_v14  ;;  %5004 = vmatprep.mubr.msk.bf16.mxu1 %vm2177_vm3, %v1956_v3  ;;  %8180 = vst [vmem:[#allocation31_spill] sm:$0xff] %v6311_v30  ;;  %v7986_v1 = vmax.f32 %v6302_v42, 0.0  ;;  %5119 = vmatpush3.bf16.msra.mxu0 %v5346_v58 }
 0x179   : > { %v1406_v54 = vpop.f32.mrf.mxu0  ;;  %5005 = vmatmul.mubr.msk.bf16.gmra.mxu1 %vm2177_vm3, %v1957_v60  ;;  %v7989_v60 = vmax.f32 %v6311_v30, 0.0  ;;  %v6332_v23 = vpop.f32.mrf.mxu1 }
 0x17a   : > { %8179 = vst [vmem:[#allocation30_spill] sm:$0xff] %v6305_v39  ;;  %v6315_v44 = vadd.f32 %v6098_v14, %v1406_v54  ;;  %v7988_v63 = vmax.f32 %v6305_v39, 0.0 }
 0x17b   : > { %v4878_v3 = vpop.f32.mrf.mxu0  ;;  %v6345_v58 = vpop.f32.mrf.mxu1 }
 0x17c   : > { %8181 = vst [vmem:[#allocation32_spill] sm:$0xff] %v6315_v44  ;;  %v7985_v13 = vmax.f32 %v6315_v44, 0.0  ;;  %v1959_v26 = vpack.c.bf16 %v7988_v63, %v7989_v60 }
 0x17d   : > { %v1419_v54 = vpop.f32.mrf.mxu0  ;;  %v6354_v63 = vpop.f32.mrf.mxu1 }
 0x17e   : > { %v1958_v21 = vpack.c.bf16 %v7985_v13, %v7986_v1  ;;  %v6339_v12 = vadd.f32 %v6098_v14, %v1419_v54  ;;  %v6348_v13 = vadd.f32 %v4878_v3, %v6098_v14 }
 0x17f   : > { %v4879_v27 = vpop.f32.mrf.mxu0  ;;  %v6359_v39 = vpop.f32.mrf.mxu1 }
 0x180   : > { %8182 = vst [vmem:[#allocation33_spill] sm:$0xff] %v6339_v12  ;;  %v6342_v19 = vadd.f32 %v4879_v27, %v6098_v14  ;;  %5008 = vmatprep.mubr.msk.bf16.mxu1 %vm2177_vm3, %v1958_v21  ;;  %8184 = vst [vmem:[#allocation35_spill] sm:$0xff] %v6348_v13  ;;  %v7998_v27 = vmax.f32 %v6339_v12, 0.0  ;;  %v8000_v3 = vmax.f32 %v6348_v13, 0.0 }
 0x181   : > { %v1422_v1 = vpop.f32.mrf.mxu0  ;;  %5009 = vmatmul.mubr.msk.bf16.gmra.mxu1 %vm2177_vm3, %v1959_v26  ;;  %v6370_v4 = vpop.f32.mrf.mxu1 }
 0x182   : > { %8183 = vst [vmem:[#allocation34_spill] sm:$0xff] %v6342_v19  ;;  %v6352_v44 = vadd.f32 %v6098_v14, %v1422_v1  ;;  %v7999_v54 = vmax.f32 %v6342_v19, 0.0 }
 0x183   : > { %v4882_v60 = vpop.f32.mrf.mxu0 }
 0x184   : > { %8185 = vst [vmem:[#allocation36_spill] sm:$0xff] %v6352_v44  ;;  %v7997_v21 = vmax.f32 %v6352_v44, 0.0  ;;  %v1961_v1 = vpack.c.bf16 %v7999_v54, %v8000_v3  ;;  %v6380_v12 = vadd.f32 %v4882_v60, %v6098_v14  ;;  %v6387_v44 = vpop.f32.mrf.mxu1 }
 0x185   : > { %v1435_v42 = vpop.f32.mrf.mxu0 }
 0x186   : > { %v1960_v26 = vpack.c.bf16 %v7997_v21, %v7998_v27  ;;  %v6373_v57 = vadd.f32 %v6098_v14, %v1435_v42  ;;  %8188 = vst [vmem:[#allocation39_spill] sm:$0xff] %v6380_v12  ;;  %v6400_v13 = vpop.f32.mrf.mxu1 }
 0x187   : > { %v4883_v30 = vpop.f32.mrf.mxu0 }
 0x188   : > { %8186 = vst [vmem:[#allocation37_spill] sm:$0xff] %v6373_v57  ;;  %v6376_v46 = vadd.f32 %v4883_v30, %v6098_v14  ;;  %5012 = vmatprep.mubr.msk.bf16.mxu1 %vm2177_vm3, %v1960_v26  ;;  %v8008_v42 = vmax.f32 %v6373_v57, 0.0  ;;  %v8010_v26 = vmax.f32 %v6380_v12, 0.0 }
 0x189   : > { %v1438_v21 = vpop.f32.mrf.mxu0  ;;  %5013 = vmatmul.mubr.msk.bf16.gmra.mxu1 %vm2177_vm3, %v1961_v1 }
 0x18a   : > { %8187 = vst [vmem:[#allocation38_spill] sm:$0xff] %v6376_v46  ;;  %v6384_v27 = vadd.f32 %v6098_v14, %v1438_v21  ;;  %v8009_v54 = vmax.f32 %v6376_v46, 0.0 }
 0x18b   : > { %v4886_v3 = vpop.f32.mrf.mxu0 }
 0x18c   : > { %8189 = vst [vmem:[#allocation40_spill] sm:$0xff] %v6384_v27  ;;  %v8007_v30 = vmax.f32 %v6384_v27, 0.0  ;;  %v1963_v21 = vpack.c.bf16 %v8009_v54, %v8010_v26  ;;  %v6410_v57 = vadd.f32 %v4886_v3, %v6098_v14  ;;  %v6417_v27 = vpop.f32.mrf.mxu1 }
 0x18d   : > { %v1451_v19 = vpop.f32.mrf.mxu0 }
 0x18e   : > { %v1962_v60 = vpack.c.bf16 %v8007_v30, %v8008_v42  ;;  %v6403_v45 = vadd.f32 %v6098_v14, %v1451_v19  ;;  %8192 = vst [vmem:[#allocation43_spill] sm:$0xff] %v6410_v57  ;;  %v6430_v12 = vpop.f32.mrf.mxu1 }
 0x18f   : > { %v4887_v1 = vpop.f32.mrf.mxu0 }
 0x190   : > { %8190 = vst [vmem:[#allocation41_spill] sm:$0xff] %v6403_v45  ;;  %v6406_v49 = vadd.f32 %v4887_v1, %v6098_v14  ;;  %5016 = vmatprep.mubr.msk.bf16.mxu1 %vm2177_vm3, %v1962_v60  ;;  %v8018_v19 = vmax.f32 %v6403_v45, 0.0  ;;  %v8020_v60 = vmax.f32 %v6410_v57, 0.0 }
 0x191   : > { %v1454_v30 = vpop.f32.mrf.mxu0  ;;  %5017 = vmatmul.mubr.msk.bf16.gmra.mxu1 %vm2177_vm3, %v1963_v21 }
 0x192   : > { %8191 = vst [vmem:[#allocation42_spill] sm:$0xff] %v6406_v49  ;;  %v6414_v42 = vadd.f32 %v6098_v14, %v1454_v30  ;;  %v8019_v54 = vmax.f32 %v6406_v49, 0.0 }
 0x193   : > { %v4890_v26 = vpop.f32.mrf.mxu0 }
 0x194   : > { %8193 = vst [vmem:[#allocation44_spill] sm:$0xff] %v6414_v42  ;;  %v8017_v1 = vmax.f32 %v6414_v42, 0.0  ;;  %v1965_v30 = vpack.c.bf16 %v8019_v54, %v8020_v60  ;;  %v6440_v45 = vadd.f32 %v4890_v26, %v6098_v14  ;;  %v6447_v42 = vpop.f32.mrf.mxu1 }
 0x195   : > { %v1467_v46 = vpop.f32.mrf.mxu0 }
 0x196   : > { %v1964_v3 = vpack.c.bf16 %v8017_v1, %v8018_v19  ;;  %v6433_v10 = vadd.f32 %v6098_v14, %v1467_v46  ;;  %8196 = vst [vmem:[#allocation47_spill] sm:$0xff] %v6440_v45  ;;  %v6460_v57 = vpop.f32.mrf.mxu1 }
 0x197   : > { %v4891_v21 = vpop.f32.mrf.mxu0 }
 0x198   : > { %8194 = vst [vmem:[#allocation45_spill] sm:$0xff] %v6433_v10  ;;  %v6436_v6 = vadd.f32 %v4891_v21, %v6098_v14  ;;  %5020 = vmatprep.mubr.msk.bf16.mxu1 %vm2177_vm3, %v1964_v3  ;;  %v8028_v46 = vmax.f32 %v6433_v10, 0.0  ;;  %v8030_v3 = vmax.f32 %v6440_v45, 0.0 }
 0x199   : > { %v1470_v1 = vpop.f32.mrf.mxu0  ;;  %5021 = vmatmul.mubr.msk.bf16.gmra.mxu1 %vm2177_vm3, %v1965_v30 }
 0x19a   : > { %8195 = vst [vmem:[#allocation46_spill] sm:$0xff] %v6436_v6  ;;  %v6444_v19 = vadd.f32 %v6098_v14, %v1470_v1  ;;  %v8029_v54 = vmax.f32 %v6436_v6, 0.0 }
 0x19b   : > { %v4894_v60 = vpop.f32.mrf.mxu0 }
 0x19c   : > { %8197 = vst [vmem:[#allocation48_spill] sm:$0xff] %v6444_v19  ;;  %v8027_v21 = vmax.f32 %v6444_v19, 0.0  ;;  %v1967_v1 = vpack.c.bf16 %v8029_v54, %v8030_v3  ;;  %v6470_v10 = vadd.f32 %v4894_v60, %v6098_v14  ;;  %v6477_v19 = vpop.f32.mrf.mxu1 }
 0x19d   : > { %v1483_v49 = vpop.f32.mrf.mxu0 }
 0x19e   : > { %v1966_v26 = vpack.c.bf16 %v8027_v21, %v8028_v46  ;;  %v6463_v5 = vadd.f32 %v6098_v14, %v1483_v49  ;;  %8200 = vst [vmem:[#allocation51_spill] sm:$0xff] %v6470_v10  ;;  %v6490_v45 = vpop.f32.mrf.mxu1 }
 0x19f   : > { %v4895_v30 = vpop.f32.mrf.mxu0 }
 0x1a0   : > { %8198 = vst [vmem:[#allocation49_spill] sm:$0xff] %v6463_v5  ;;  %v6466_v8 = vadd.f32 %v4895_v30, %v6098_v14  ;;  %5024 = vmatprep.mubr.msk.bf16.mxu1 %vm2177_vm3, %v1966_v26  ;;  %v8038_v49 = vmax.f32 %v6463_v5, 0.0  ;;  %v8040_v26 = vmax.f32 %v6470_v10, 0.0 }
 0x1a1   : > { %v1486_v21 = vpop.f32.mrf.mxu0  ;;  %5025 = vmatmul.mubr.msk.bf16.gmra.mxu1 %vm2177_vm3, %v1967_v1 }
 0x1a2   : > { %8199 = vst [vmem:[#allocation50_spill] sm:$0xff] %v6466_v8  ;;  %v6474_v46 = vadd.f32 %v6098_v14, %v1486_v21  ;;  %v8039_v54 = vmax.f32 %v6466_v8, 0.0 }
 0x1a3   : > { %v4898_v3 = vpop.f32.mrf.mxu0 }
 0x1a4   : > { %8201 = vst [vmem:[#allocation52_spill] sm:$0xff] %v6474_v46  ;;  %v8037_v30 = vmax.f32 %v6474_v46, 0.0  ;;  %v1969_v21 = vpack.c.bf16 %v8039_v54, %v8040_v26  ;;  %v6500_v5 = vadd.f32 %v4898_v3, %v6098_v14  ;;  %v6507_v46 = vpop.f32.mrf.mxu1 }
 0x1a5   : > { %v1499_v6 = vpop.f32.mrf.mxu0 }
 0x1a6   : > { %v1968_v60 = vpack.c.bf16 %v8037_v30, %v8038_v49  ;;  %v6493_v55 = vadd.f32 %v6098_v14, %v1499_v6  ;;  %8204 = vst [vmem:[#allocation55_spill] sm:$0xff] %v6500_v5  ;;  %v6520_v10 = vpop.f32.mrf.mxu1 }
 0x1a7   : > { %v4899_v1 = vpop.f32.mrf.mxu0 }
 0x1a8   : > { %8202 = vst [vmem:[#allocation53_spill] sm:$0xff] %v6493_v55  ;;  %v6496_v51 = vadd.f32 %v4899_v1, %v6098_v14  ;;  %5028 = vmatprep.mubr.msk.bf16.mxu1 %vm2177_vm3, %v1968_v60  ;;  %v8048_v6 = vmax.f32 %v6493_v55, 0.0  ;;  %v8050_v60 = vmax.f32 %v6500_v5, 0.0 }
 0x1a9   : > { %v1502_v30 = vpop.f32.mrf.mxu0  ;;  %5029 = vmatmul.mubr.msk.bf16.gmra.mxu1 %vm2177_vm3, %v1969_v21 }
 0x1aa   : > { %8203 = vst [vmem:[#allocation54_spill] sm:$0xff] %v6496_v51  ;;  %v6504_v49 = vadd.f32 %v6098_v14, %v1502_v30  ;;  %v8049_v54 = vmax.f32 %v6496_v51, 0.0 }
 0x1ab   : > { %v4902_v26 = vpop.f32.mrf.mxu0 }
 0x1ac   : > { %8205 = vst [vmem:[#allocation56_spill] sm:$0xff] %v6504_v49  ;;  %v8047_v1 = vmax.f32 %v6504_v49, 0.0  ;;  %v1971_v30 = vpack.c.bf16 %v8049_v54, %v8050_v60  ;;  %v6530_v55 = vadd.f32 %v4902_v26, %v6098_v14  ;;  %v6537_v49 = vpop.f32.mrf.mxu1 }
 0x1ad   : > { %v1515_v8 = vpop.f32.mrf.mxu0 }
 0x1ae   : > { %v1970_v3 = vpack.c.bf16 %v8047_v1, %v8048_v6  ;;  %v6523_v50 = vadd.f32 %v6098_v14, %v1515_v8  ;;  %8208 = vst [vmem:[#allocation59_spill] sm:$0xff] %v6530_v55  ;;  %v6550_v5 = vpop.f32.mrf.mxu1 }
 0x1af   : > { %v4903_v21 = vpop.f32.mrf.mxu0 }
 0x1b0   : > { %8206 = vst [vmem:[#allocation57_spill] sm:$0xff] %v6523_v50  ;;  %v6526_v53 = vadd.f32 %v4903_v21, %v6098_v14  ;;  %5032 = vmatprep.mubr.msk.bf16.mxu1 %vm2177_vm3, %v1970_v3  ;;  %v8058_v8 = vmax.f32 %v6523_v50, 0.0  ;;  %v8060_v3 = vmax.f32 %v6530_v55, 0.0 }
 0x1b1   : > { %v1518_v1 = vpop.f32.mrf.mxu0  ;;  %5033 = vmatmul.mubr.msk.bf16.gmra.mxu1 %vm2177_vm3, %v1971_v30 }
 0x1b2   : > { %8207 = vst [vmem:[#allocation58_spill] sm:$0xff] %v6526_v53  ;;  %v6534_v6 = vadd.f32 %v6098_v14, %v1518_v1  ;;  %v8059_v54 = vmax.f32 %v6526_v53, 0.0 }
 0x1b3   : > { %v4906_v60 = vpop.f32.mrf.mxu0 }
 0x1b4   : > { %8209 = vst [vmem:[#allocation60_spill] sm:$0xff] %v6534_v6  ;;  %v8057_v21 = vmax.f32 %v6534_v6, 0.0  ;;  %v1973_v1 = vpack.c.bf16 %v8059_v54, %v8060_v3  ;;  %v6560_v50 = vadd.f32 %v4906_v60, %v6098_v14  ;;  %v6567_v6 = vpop.f32.mrf.mxu1 }
 0x1b5   : > { %v1531_v51 = vpop.f32.mrf.mxu0  ;;  %8213 = vst [vmem:[#allocation64_spill] sm:$0xff] %v6567_v6  ;;  %v6588_v6 = vadd.f32 %v6098_v14, %v6144_v38 }
 0x1b6   : > { %v1972_v26 = vpack.c.bf16 %v8057_v21, %v8058_v8  ;;  %v6553_v37 = vadd.f32 %v6098_v14, %v1531_v51  ;;  %v6580_v55 = vpop.f32.mrf.mxu1 }
 0x1b7   : > { %v4907_v30 = vpop.f32.mrf.mxu0  ;;  %8214 = vst [vmem:[#allocation65_spill] sm:$0xff] %v6588_v6 }
 0x1b8   : > { %8210 = vst [vmem:[#allocation61_spill] sm:$0xff] %v6553_v37  ;;  %v6556_v33 = vadd.f32 %v4907_v30, %v6098_v14  ;;  %5036 = vmatprep.mubr.msk.bf16.mxu1 %vm2177_vm3, %v1972_v26  ;;  %v8068_v51 = vmax.f32 %v6553_v37, 0.0  ;;  %v8069_v26 = vmax.f32 %v6560_v50, 0.0 }
 0x1b9   : > { %v1534_v21 = vpop.f32.mrf.mxu0  ;;  %5037 = vmatmul.mubr.msk.bf16.gmra.mxu1 %vm2177_vm3, %v1973_v1 }
 0x1ba   : > { %8211 = vst [vmem:[#allocation62_spill] sm:$0xff] %v6556_v33  ;;  %v6564_v8 = vadd.f32 %v6098_v14, %v1534_v21  ;;  %v8067_v54 = vmax.f32 %v6556_v33, 0.0 }
 0x1bb   : > { %v4910_v3 = vpop.f32.mrf.mxu0 }
 0x1bc   : > { %8212 = vst [vmem:[#allocation63_spill] sm:$0xff] %v6564_v8  ;;  %v8066_v30 = vmax.f32 %v6564_v8, 0.0  ;;  %v1975_v21 = vpack.c.bf16 %v8067_v54, %v8069_v26  ;;  %v6598_v54 = vadd.f32 %v4910_v3, %v6098_v14  ;;  %v6605_v26 = vpop.f32.mrf.mxu1 }
 0x1bd   : > { %v1547_v53 = vpop.f32.mrf.mxu0 }
 0x1be   : > { %v1974_v60 = vpack.c.bf16 %v8066_v30, %v8068_v51  ;;  %v6591_v37 = vadd.f32 %v6098_v14, %v1547_v53  ;;  %v8077_v3 = vmax.f32 %v6598_v54, 0.0  ;;  %v6622_v53 = vadd.f32 %v6135_v34, %v6098_v14  ;;  %v6628_v33 = vpop.f32.mrf.mxu1 }
 0x1bf   : > { %v4911_v1 = vpop.f32.mrf.mxu0  ;;  %v6640_v34 = vadd.f32 %v6098_v14, %v6178_v56 }
 0x1c0   : > { %8215 = vst [vmem:[#allocation66_spill] sm:$0xff] %v6591_v37  ;;  %v6594_v30 = vadd.f32 %v4911_v1, %v6098_v14  ;;  %5040 = vmatprep.mubr.msk.bf16.mxu1 %vm2177_vm3, %v1974_v60  ;;  %v8076_v8 = vmax.f32 %v6591_v37, 0.0  ;;  %v8217_v37 = vmax.f32 %v6584_v32, 0.0 }
 0x1c1   : > { %v1550_v51 = vpop.f32.mrf.mxu0  ;;  %5041 = vmatmul.mubr.msk.bf16.gmra.mxu1 %vm2177_vm3, %v1975_v21  ;;  %v6618_v21 = vadd.f32 %v6115_v25, %v6098_v14  ;;  %v6636_v25 = vadd.f32 %v6098_v14, %v6156_v47  ;;  %8220 = vst [vmem:[#allocation69_spill] sm:$0xff] %v6640_v34  ;;  %v8081_v47 = vmax.f32 %v6640_v34, 0.0 }
 0x1c2   : > { %v6602_v29 = vadd.f32 %v6098_v14, %v1550_v51  ;;  %v8075_v38 = vmax.f32 %v6594_v30, 0.0 }
 0x1c3   : > { %8219 = vst [vmem:[#allocation68_spill] sm:$0xff] %v6636_v25 }
 0x1c4   : > { %8216 = vst [vmem:[#allocation67_spill] sm:$0xff] %v6602_v29  ;;  %v8074_v60 = vmax.f32 %v6602_v29, 0.0  ;;  %v1977_v1 = vpack.c.bf16 %v8075_v38, %v8077_v3  ;;  %v8218_v29 = vmax.f32 %v6588_v6, 0.0  ;;  %v8080_v38 = vmax.f32 %v6618_v21, 0.0  ;;  %v6647_v3 = vpop.f32.mrf.mxu1 }
 0x1c5   : > { %v6671_v6 = vadd.f32 %v6098_v14, %v6193_v2 }
 0x1c6   : > { %v1976_v51 = vpack.c.bf16 %v8074_v60, %v8076_v8  ;;  %v1978_v60 = vpack.c.bf16 %v8218_v29, %v8217_v37  ;;  %v8079_v8 = vmax.f32 %v6622_v53, 0.0  ;;  %v8082_v37 = vmax.f32 %v6636_v25, 0.0 }
 0x1c7   : > { %v6657_v29 = vadd.f32 %v6149_v43, %v6098_v14  ;;  %8221 = vst [vmem:[#allocation70_spill] sm:$0xff] %v6671_v6  ;;  %v6705_v25 = vadd.f32 %v6098_v14, %v6227_v31 }
 0x1c8   : > { %5044 = vmatprep.mubr.msk.bf16.mxu1 %vm2177_vm3, %v1976_v51  ;;  %v1979_v56 = vpack.c.bf16 %v8079_v8, %v8080_v38  ;;  %v1980_v51 = vpack.c.bf16 %v8081_v47, %v8082_v37  ;;  %v6675_v8 = vadd.f32 %v6098_v14, %v6215_v11  ;;  %v8088_v47 = vmax.f32 %v6671_v6, 0.0 }
 0x1c9   : > { %5045 = vmatmul.mubr.msk.bf16.gmra.mxu1 %vm2177_vm3, %v1977_v1  ;;  %v6661_v1 = vadd.f32 %v6169_v52, %v6098_v14  ;;  %v8086_v43 = vmax.f32 %v6657_v29, 0.0  ;;  %v6691_v11 = vadd.f32 %v6186_v62, %v6098_v14  ;;  %8223 = vst [vmem:[#allocation72_spill] sm:$0xff] %v6705_v25  ;;  %v6739_v6 = vadd.f32 %v6098_v14, %v6261_v36 }
 0x1ca   : > { %5048 = vmatprep.mubr.msk.bf16.mxu1 %vm2177_vm3, %v1978_v60  ;;  %v6663_v60 = vpop.f32.mrf.mxu1  ;;  %8222 = vst [vmem:[#allocation71_spill] sm:$0xff] %v6675_v8  ;;  %v8087_v37 = vmax.f32 %v6675_v8, 0.0  ;;  %v6759_v36 = vadd.f32 %v6254_v9, %v6098_v14 }
 0x1cb   : > { %v8085_v52 = vmax.f32 %v6661_v1, 0.0  ;;  %v8092_v62 = vmax.f32 %v6691_v11, 0.0  ;;  %8225 = vst [vmem:[#allocation74_spill] sm:$0xff] %v6739_v6 }
 0x1cc   : > { %v6681_v38 = vpop.f32.mrf.mxu1  ;;  %v1982_v34 = vpack.c.bf16 %v8087_v37, %v8088_v47  ;;  %v8094_v37 = vmax.f32 %v6705_v25, 0.0  ;;  %v6773_v25 = vadd.f32 %v6098_v14, %v6295_v40  ;;  %v6793_v40 = vadd.f32 %v6288_v61, %v6098_v14 }
 0x1cd   : > { %v1981_v2 = vpack.c.bf16 %v8085_v52, %v8086_v43  ;;  %v6709_v52 = vadd.f32 %v6098_v14, %v6249_v59  ;;  %v6725_v59 = vadd.f32 %v6220_v22, %v6098_v14 }
 0x1ce   : > { %8227 = vst [vmem:[#allocation76_spill] sm:$0xff] %v6773_v25 }
 0x1cf   : > { %8224 = vst [vmem:[#allocation73_spill] sm:$0xff] %v6709_v52  ;;  %v8093_v47 = vmax.f32 %v6709_v52, 0.0  ;;  %v8098_v22 = vmax.f32 %v6725_v59, 0.0 }
 0x1d1   : > { %5049 = vmatmul.mubr.msk.bf16.gmra.mxu1 %vm2177_vm3, %v1979_v56  ;;  %v6695_v56 = vadd.f32 %v6206_v7, %v6098_v14  ;;  %v1984_v8 = vpack.c.bf16 %v8093_v47, %v8094_v37  ;;  %v8100_v47 = vmax.f32 %v6739_v6, 0.0  ;;  %v6807_v6 = vadd.f32 %v6098_v14, %v6332_v23 }
 0x1d2   : > { %5052 = vmatprep.mubr.msk.bf16.mxu1 %vm2177_vm3, %v1980_v51  ;;  %v6697_v51 = vpop.f32.mrf.mxu1 }
 0x1d3   : > { %v8091_v7 = vmax.f32 %v6695_v56, 0.0  ;;  %8229 = vst [vmem:[#allocation78_spill] sm:$0xff] %v6807_v6 }
 0x1d4   : > { %v6715_v43 = vpop.f32.mrf.mxu1 }
 0x1d5   : > { %v1983_v31 = vpack.c.bf16 %v8091_v7, %v8092_v62  ;;  %v6743_v7 = vadd.f32 %v6098_v14, %v6283_v0 }
 0x1d7   : > { %8226 = vst [vmem:[#allocation75_spill] sm:$0xff] %v6743_v7  ;;  %v8099_v37 = vmax.f32 %v6743_v7, 0.0 }
 0x1d9   : > { %5053 = vmatmul.mubr.msk.bf16.gmra.mxu1 %vm2177_vm3, %v1981_v2  ;;  %v6731_v2 = vpop.f32.mrf.mxu1  ;;  %v1986_v52 = vpack.c.bf16 %v8099_v37, %v8100_v47  ;;  %v8106_v37 = vmax.f32 %v6773_v25, 0.0  ;;  %v6841_v25 = vadd.f32 %v6098_v14, %v6370_v4 }
 0x1da   : > { %5056 = vmatprep.mubr.msk.bf16.mxu1 %vm2177_vm3, %v1982_v34  ;;  %v6729_v34 = vadd.f32 %v6240_v48, %v6098_v14 }
 0x1db   : > { %v6749_v62 = vpop.f32.mrf.mxu1  ;;  %8233 = vst [vmem:[#allocation82_spill] sm:$0xff] %v6841_v25 }
 0x1dc   : > { %v8097_v48 = vmax.f32 %v6729_v34, 0.0 }
 0x1de   : > { %v1985_v0 = vpack.c.bf16 %v8097_v48, %v8098_v22  ;;  %v6777_v48 = vadd.f32 %v6098_v14, %v6317_v28 }
 0x1e0   : > { %8228 = vst [vmem:[#allocation77_spill] sm:$0xff] %v6777_v48  ;;  %v8105_v47 = vmax.f32 %v6777_v48, 0.0 }
 0x1e1   : > { %5057 = vmatmul.mubr.msk.bf16.gmra.mxu1 %vm2177_vm3, %v1983_v31  ;;  %v6765_v31 = vpop.f32.mrf.mxu1 }
 0x1e2   : > { %5060 = vmatprep.mubr.msk.bf16.mxu1 %vm2177_vm3, %v1984_v8  ;;  %v6763_v8 = vadd.f32 %v6274_v15, %v6098_v14  ;;  %v8104_v15 = vmax.f32 %v6759_v36, 0.0  ;;  %v1988_v7 = vpack.c.bf16 %v8105_v47, %v8106_v37  ;;  %v8112_v47 = vmax.f32 %v6807_v6, 0.0 }
 0x1e3   : > { %v6783_v22 = vpop.f32.mrf.mxu1  ;;  %v6875_v6 = vadd.f32 %v6098_v14, %v6430_v12 }
 0x1e4   : > { %v8103_v9 = vmax.f32 %v6763_v8, 0.0 }
 0x1e5   : > { %8237 = vst [vmem:[#allocation86_spill] sm:$0xff] %v6875_v6 }
 0x1e6   : > { %v1987_v28 = vpack.c.bf16 %v8103_v9, %v8104_v15  ;;  %v6811_v9 = vadd.f32 %v6098_v14, %v6354_v63  ;;  %v6827_v63 = vadd.f32 %v6325_v24, %v6098_v14 }
 0x1e8   : > { %8230 = vst [vmem:[#allocation79_spill] sm:$0xff] %v6811_v9  ;;  %v8111_v37 = vmax.f32 %v6811_v9, 0.0  ;;  %8231 = vst [vmem:[#allocation80_spill] sm:$0xff] %v6827_v63  ;;  %v8116_v24 = vmax.f32 %v6827_v63, 0.0 }
 0x1e9   : > { %5061 = vmatmul.mubr.msk.bf16.gmra.mxu1 %vm2177_vm3, %v1985_v0  ;;  %v6799_v0 = vpop.f32.mrf.mxu1 }
 0x1ea   : > { %5064 = vmatprep.mubr.msk.bf16.mxu1 %vm2177_vm3, %v1986_v52  ;;  %v6797_v52 = vadd.f32 %v6308_v41, %v6098_v14  ;;  %v8110_v41 = vmax.f32 %v6793_v40, 0.0  ;;  %v1990_v48 = vpack.c.bf16 %v8111_v37, %v8112_v47  ;;  %v8118_v37 = vmax.f32 %v6841_v25, 0.0 }
 0x1eb   : > { %v6817_v15 = vpop.f32.mrf.mxu1  ;;  %v6909_v25 = vadd.f32 %v6098_v14, %v6490_v45  ;;  %v6926_v45 = vld [vmem:[%s7950_s5] ss:$0 sm:$0xff] }
 0x1ec   : > { %v8109_v61 = vmax.f32 %v6797_v52, 0.0 }
 0x1ed   : > { %8241 = vst [vmem:[#allocation90_spill] sm:$0xff] %v6909_v25 }
 0x1ee   : > { %v1989_v23 = vpack.c.bf16 %v8109_v61, %v8110_v41  ;;  %v6845_v61 = vadd.f32 %v6098_v14, %v6400_v13  ;;  %v6861_v13 = vadd.f32 %v6359_v39, %v6098_v14 }
 0x1f0   : > { %8234 = vst [vmem:[#allocation83_spill] sm:$0xff] %v6845_v61  ;;  %v8117_v47 = vmax.f32 %v6845_v61, 0.0  ;;  %8235 = vst [vmem:[#allocation84_spill] sm:$0xff] %v6861_v13  ;;  %v8122_v39 = vmax.f32 %v6861_v13, 0.0 }
 0x1f1   : > { %5065 = vmatmul.mubr.msk.bf16.gmra.mxu1 %vm2177_vm3, %v1987_v28  ;;  %v6833_v28 = vpop.f32.mrf.mxu1 }
 0x1f2   : > { %5068 = vmatprep.mubr.msk.bf16.mxu1 %vm2177_vm3, %v1988_v7  ;;  %v6831_v7 = vadd.f32 %v6345_v58, %v6098_v14  ;;  %v1992_v9 = vpack.c.bf16 %v8117_v47, %v8118_v37  ;;  %v8124_v47 = vmax.f32 %v6875_v6, 0.0 }
 0x1f3   : > { %v6851_v41 = vpop.f32.mrf.mxu1 }
 0x1f4   : > { %8232 = vst [vmem:[#allocation81_spill] sm:$0xff] %v6831_v7  ;;  %v8115_v58 = vmax.f32 %v6831_v7, 0.0 }
 0x1f6   : > { %v1991_v4 = vpack.c.bf16 %v8115_v58, %v8116_v24  ;;  %v6879_v58 = vadd.f32 %v6098_v14, %v6460_v57  ;;  %v6895_v57 = vadd.f32 %v6417_v27, %v6098_v14 }
 0x1f8   : > { %8238 = vst [vmem:[#allocation87_spill] sm:$0xff] %v6879_v58  ;;  %v8123_v37 = vmax.f32 %v6879_v58, 0.0  ;;  %8239 = vst [vmem:[#allocation88_spill] sm:$0xff] %v6895_v57  ;;  %v8130_v27 = vmax.f32 %v6895_v57, 0.0  ;;  %v8248_v57 = vmax.f32 %v6107_v18, 0.0 }
 0x1f9   : > { %5069 = vmatmul.mubr.msk.bf16.gmra.mxu1 %vm2177_vm3, %v1989_v23  ;;  %v6867_v23 = vpop.f32.mrf.mxu1  ;;  %v6967_v18 = vld [vmem:[%s7949_s4] ss:$0 sm:$0xff] }
 0x1fa   : > { %5072 = vmatprep.mubr.msk.bf16.mxu1 %vm2177_vm3, %v1990_v48  ;;  %v6865_v48 = vadd.f32 %v6387_v44, %v6098_v14  ;;  %v1994_v61 = vpack.c.bf16 %v8123_v37, %v8124_v47  ;;  %v8245_v47 = vmax.f32 %v6909_v25, 0.0 }
 0x1fb   : > { %v6885_v24 = vpop.f32.mrf.mxu1 }
 0x1fc   : > { %8236 = vst [vmem:[#allocation85_spill] sm:$0xff] %v6865_v48  ;;  %v8121_v44 = vmax.f32 %v6865_v48, 0.0 }
 0x1fe   : > { %v1993_v12 = vpack.c.bf16 %v8121_v44, %v8122_v39  ;;  %v6913_v44 = vadd.f32 %v6098_v14, %v6520_v10  ;;  %v6930_v10 = vadd.f32 %v6477_v19, %v6098_v14  ;;  %v6948_v19 = vadd.f32 %v6098_v14, %v6550_v5 }
 0x1ff   : > { %v8249_v5 = vmax.f32 %v6101_v16, 0.0  ;;  %v8251_v16 = vmax.f32 %v6110_v20, 0.0  ;;  %v8255_v20 = vld [vmem:[#allocation64_spill] sm:$0xff] }
 0x200   : > { %8242 = vst [vmem:[#allocation91_spill] sm:$0xff] %v6913_v44  ;;  %8243 = vst [vmem:[#allocation92_spill] sm:$0xff] %v6930_v10  ;;  %v8246_v58 = vmax.f32 %v6913_v44, 0.0  ;;  %v8250_v44 = vmax.f32 %v6104_v17, 0.0  ;;  %v6987_v17 = vadd.f32 %v6537_v49, %v6098_v14 }
 0x201   : > { %5073 = vmatmul.mubr.msk.bf16.gmra.mxu1 %vm2177_vm3, %v1991_v4  ;;  %v6901_v4 = vpop.f32.mrf.mxu1  ;;  %8247 = vst [vmem:[#allocation94_spill] sm:$0xff] %v6948_v19 }
 0x202   : > { %5076 = vmatprep.mubr.msk.bf16.mxu1 %vm2177_vm3, %v1992_v9  ;;  %v6899_v9 = vadd.f32 %v6447_v42, %v6098_v14  ;;  %v1996_v6 = vpack.c.bf16 %v8246_v58, %v8245_v47  ;;  %v2025_v58 = vmul.f32 %v6926_v45, %v8249_v5  ;;  %v8252_v5 = vmax.f32 %v6930_v10, 0.0 }
 0x203   : > { %v6919_v39 = vpop.f32.mrf.mxu1 }
 0x204   : > { %8240 = vst [vmem:[#allocation89_spill] sm:$0xff] %v6899_v9  ;;  %v8129_v42 = vmax.f32 %v6899_v9, 0.0  ;;  %v2027_v9 = vmul.f32 %v6926_v45, %v8248_v57 }
 0x205   : > { %v6940_v37 = vpop.f32.mrf.mxu1 }
 0x209   : > { %5077 = vmatmul.mubr.msk.bf16.gmra.mxu1 %vm2177_vm3, %v1993_v12  ;;  %v1995_v12 = vpack.c.bf16 %v8129_v42, %v8130_v27 }
 0x20a   : > { %5080 = vmatprep.mubr.msk.bf16.mxu1 %vm2177_vm3, %v1994_v61  ;;  %v6934_v61 = vadd.f32 %v6507_v46, %v6098_v14  ;;  %v6952_v46 = vadd.f32 %v6098_v14, %v6580_v55 }
 0x20c   : > { %8244 = vst [vmem:[#allocation93_spill] sm:$0xff] %v6934_v61  ;;  %v8253_v25 = vmax.f32 %v6934_v61, 0.0 }
 0x20e   : > { %v1997_v48 = vpack.c.bf16 %v8253_v25, %v8252_v5  ;;  %v6999_v25 = vadd.f32 %v6098_v14, %v6663_v60  ;;  %v8261_v60 = vld [vmem:[#allocation11_spill] sm:$0xff] }
 0x20f   : > { %v8262_v10 = vmax.f32 %v8261_v60, 0.0 }
 0x210   : > { %8256 = vst [vmem:[#allocation64_spill] sm:$0xff] %v6999_v25 }
 0x211   : > { %v4986_v42 = vpop.f32.mrf.mxu1  ;;  %5081 = vmatmul.mubr.msk.bf16.gmra.mxu1 %vm2177_vm3, %v1995_v12  ;;  %v8254_v12 = vmax.f32 %v6138_v35, 0.0  ;;  %v8257_v35 = vmax.f32 %v6948_v19, 0.0  ;;  %v2032_v7 = vmul.f32 %v6926_v45, %v8262_v10 }
 0x212   : > { %v2413_v47 = vadd.f32 %v4986_v42, %v2027_v9  ;;  %5084 = vmatprep.mubr.msk.bf16.mxu1 %vm2177_vm3, %v1996_v6  ;;  %v2028_v9 = vmul.f32 %v6926_v45, %v8250_v44  ;;  %v2026_v42 = vmul.f32 %v6926_v45, %v8251_v16  ;;  %v6991_v44 = vadd.f32 %v8255_v20, %v6098_v14 }
 0x213   : > { %v2404_v55 = vpop.f32.mrf.mxu1 }
 0x214   : > { %v2405_v27 = vadd.f32 %v2404_v55, %v2025_v58  ;;  %v2924_v13 = vadd.f32 %v6967_v18, %v2413_v47  ;;  %v2031_v58 = vmul.f32 %v6926_v45, %v8254_v12  ;;  %v6995_v55 = vadd.f32 %v6098_v14, %v6628_v33  ;;  %v8259_v33 = vld [vmem:[#allocation10_spill] sm:$0xff] }
 0x215   : > { %v4987_v6 = vpop.f32.mrf.mxu1  ;;  %v8258_v12 = vmax.f32 %v6952_v46, 0.0  ;;  %v8260_v20 = vmax.f32 %v8259_v33, 0.0 }
 0x216   : > { %v2416_v57 = vadd.f32 %v4987_v6, %v2028_v9  ;;  %v2922_v49 = vadd.f32 %v6967_v18, %v2405_v27  ;;  %v3052_v19 = vmax.f32 %v2924_v13, 0.0  ;;  %v8141_v27 = vmax.f32 %v6987_v17, 0.0 }
 0x217   : > { %v2407_v47 = vpop.f32.mrf.mxu1  ;;  %v1998_v9 = vpack.c.bf16 %v8258_v12, %v8257_v35  ;;  %v2029_v61 = vmul.f32 %v6926_v45, %v8260_v20  ;;  %v7022_v13 = vadd.f32 %v6605_v26, %v6098_v14  ;;  %v7038_v26 = vadd.f32 %v6098_v14, %v6697_v51 }
 0x218   : > { %v2925_v6 = vadd.f32 %v6967_v18, %v2416_v57  ;;  %v2408_v16 = vadd.f32 %v2407_v47, %v2026_v42  ;;  %v8140_v57 = vmax.f32 %v6991_v44, 0.0  ;;  %v3050_v33 = vmax.f32 %v2922_v49, 0.0 }
 0x219   : > { %v4990_v5 = vpop.f32.mrf.mxu1  ;;  %5085 = vmatmul.mubr.msk.bf16.gmra.mxu1 %vm2177_vm3, %v1997_v48  ;;  %v8263_v48 = vld [vmem:[#allocation12_spill] sm:$0xff] }
 0x21a   : > { %v3053_v63 = vmax.f32 %v2925_v6, 0.0  ;;  %v2923_v35 = vadd.f32 %v6967_v18, %v2408_v16  ;;  %v2429_v12 = vadd.f32 %v4990_v5, %v2031_v58  ;;  %5088 = vmatprep.mubr.msk.bf16.mxu1 %vm2177_vm3, %v1998_v9  ;;  %v7026_v58 = vadd.f32 %v6647_v3, %v6098_v14 }
 0x21b   : > { %v2420_v47 = vpop.f32.mrf.mxu1  ;;  %v8264_v42 = vmax.f32 %v8263_v48, 0.0  ;;  %v7042_v3 = vadd.f32 %v6098_v14, %v6731_v2  ;;  %v8268_v48 = vmax.f32 %v6999_v25, 0.0 }
 0x21c   : > { %v3179_v20 = vpack.c.bf16 %v3053_v63, %v3052_v19  ;;  %v3051_v60 = vmax.f32 %v2923_v35, 0.0  ;;  %v2421_v10 = vadd.f32 %v2420_v47, %v2029_v61  ;;  %v2928_v16 = vadd.f32 %v6967_v18, %v2429_v12  ;;  %v8265_v19 = vld [vmem:[#allocation15_spill] sm:$0xff] }
 0x21d   : > { %v4991_v9 = vpop.f32.mrf.mxu1  ;;  %v2030_v49 = vmul.f32 %v6926_v45, %v8264_v42  ;;  %v1999_v63 = vpack.c.bf16 %v8140_v57, %v8141_v27  ;;  %v8267_v12 = vmax.f32 %v6995_v55, 0.0  ;;  %v8271_v57 = vld [vmem:[#allocation14_spill] sm:$0xff] }
 0x21e   : > { %v3178_v6 = vpack.c.bf16 %v3051_v60, %v3050_v33  ;;  %v2432_v5 = vadd.f32 %v4991_v9, %v2032_v7  ;;  %v8266_v7 = vmax.f32 %v8265_v19, 0.0  ;;  %v2926_v47 = vadd.f32 %v6967_v18, %v2421_v10  ;;  %v8269_v9 = vld [vmem:[#allocation13_spill] sm:$0xff] }
 0x21f   : > { %v2423_v61 = vpop.f32.mrf.mxu1  ;;  %v2000_v42 = vpack.c.bf16 %v8268_v48, %v8267_v12  ;;  %v8270_v19 = vmax.f32 %v8269_v9, 0.0  ;;  %v3056_v12 = vmax.f32 %v2928_v16, 0.0 }
 0x220   : > { %v2035_v35 = vmul.f32 %v6926_v45, %v8266_v7  ;;  %v2929_v33 = vadd.f32 %v6967_v18, %v2432_v5  ;;  %v2424_v51 = vadd.f32 %v2423_v61, %v2030_v49  ;;  %5120 = vmatprep.mubr.msk.bf16.mxu0 %vm2177_vm3, %v3178_v6  ;;  %v3054_v27 = vmax.f32 %v2926_v47, 0.0 }
 0x221   : > { %v4994_v60 = vpop.f32.mrf.mxu1  ;;  %5089 = vmatmul.mubr.msk.bf16.gmra.mxu1 %vm2177_vm3, %v1999_v63  ;;  %5121 = vmatmul.mubr.msk.bf16.vlgmr.msra.gmra.mxu0 %vm2177_vm3, %v3179_v20  ;;  %v2033_v7 = vmul.f32 %v6926_v45, %v8270_v19  ;;  %v8272_v63 = vmax.f32 %v8271_v57, 0.0  ;;  %v8277_v61 = vmax.f32 %v7022_v13, 0.0  ;;  %v8278_v6 = vmax.f32 %v7026_v58, 0.0 }
 0x222   : > { %v3057_v10 = vmax.f32 %v2929_v33, 0.0  ;;  %v2927_v5 = vadd.f32 %v6967_v18, %v2424_v51  ;;  %v2445_v49 = vadd.f32 %v4994_v60, %v2035_v35  ;;  %5092 = vmatprep.mubr.msk.bf16.mxu1 %vm2177_vm3, %v2000_v42  ;;  %v8273_v33 = vld [vmem:[#allocation16_spill] sm:$0xff]  ;;  %v8275_v51 = vld [vmem:[#allocation19_spill] sm:$0xff] }
 0x223   : > { %v2436_v48 = vpop.f32.mrf.mxu1  ;;  %v2036_v20 = vmul.f32 %v6926_v45, %v8272_v63  ;;  %v8274_v14 = vmax.f32 %v8273_v33, 0.0  ;;  %v8276_v42 = vmax.f32 %v8275_v51, 0.0  ;;  %v2001_v57 = vpack.c.bf16 %v8278_v6, %v8277_v61 }
 0x224   : > { %v3181_v9 = vpack.c.bf16 %v3057_v10, %v3056_v12  ;;  %v3055_v2 = vmax.f32 %v2927_v5, 0.0  ;;  %v2437_v19 = vadd.f32 %v2436_v48, %v2033_v7  ;;  %v2932_v47 = vadd.f32 %v6967_v18, %v2445_v49  ;;  %v7082_v7 = vld [vmem:[%s7947_s2] ss:$0 sm:$0xff] }
 0x225   : > { %v4995_v16 = vpop.f32.mrf.mxu1  ;;  %v2034_v35 = vmul.f32 %v6926_v45, %v8274_v14  ;;  %v2039_v60 = vmul.f32 %v6926_v45, %v8276_v42  ;;  %v7086_v14 = vadd.f32 %v7082_v7, %v6681_v38  ;;  %v7090_v10 = vadd.f32 %v7082_v7, %v6715_v43 }
 0x226   : > { %v3180_v25 = vpack.c.bf16 %v3055_v2, %v3054_v27  ;;  %v2448_v12 = vadd.f32 %v4995_v16, %v2036_v20  ;;  %v7094_v5 = vadd.f32 %v7082_v7, %v6765_v31  ;;  %v7098_v27 = vadd.f32 %v7082_v7, %v6799_v0  ;;  %v8282_v31 = vld [vmem:[#allocation17_spill] sm:$0xff]  ;;  %v8284_v16 = vld [vmem:[#allocation18_spill] sm:$0xff] }
 0x227   : > { %v2439_v2 = vpop.f32.mrf.mxu1  ;;  %v8280_v49 = vmax.f32 %v7038_v26, 0.0  ;;  %v8281_v6 = vmax.f32 %v7042_v3, 0.0  ;;  %v2930_v38 = vadd.f32 %v6967_v18, %v2437_v19  ;;  %v8283_v0 = vmax.f32 %v8282_v31, 0.0 }
 0x228   : > { %8279 = vst [vmem:[#allocation10_spill] sm:$0xff] %v7098_v27  ;;  %v2933_v48 = vadd.f32 %v6967_v18, %v2448_v12  ;;  %v2440_v43 = vadd.f32 %v2439_v2, %v2034_v35  ;;  %5124 = vmatprep.mubr.msk.bf16.mxu0 %vm2177_vm3, %v3180_v25  ;;  %v8285_v33 = vmax.f32 %v8284_v16, 0.0  ;;  %v3060_v42 = vmax.f32 %v2932_v47, 0.0 }
 0x229   : > { %v2002_v61 = vpack.c.bf16 %v8281_v6, %v8280_v49  ;;  %v4998_v63 = vpop.f32.mrf.mxu1  ;;  %5093 = vmatmul.mubr.msk.bf16.gmra.mxu1 %vm2177_vm3, %v2001_v57  ;;  %5125 = vmatmul.mubr.msk.bf16.gmra.mxu0 %vm2177_vm3, %v3181_v9  ;;  %v2037_v20 = vmul.f32 %v6926_v45, %v8283_v0  ;;  %v8145_v25 = vmax.f32 %v7086_v14, 0.0  ;;  %v8144_v57 = vmax.f32 %v7090_v10, 0.0 }
 0x22a   : > { %v2040_v51 = vmul.f32 %v6926_v45, %v8285_v33  ;;  %v3061_v19 = vmax.f32 %v2933_v48, 0.0  ;;  %v2931_v12 = vadd.f32 %v6967_v18, %v2440_v43  ;;  %v2461_v35 = vadd.f32 %v4998_v63, %v2039_v60  ;;  %v8286_v33 = vld [vmem:[#allocation20_spill] sm:$0xff] }
 0x22b   : > { %5096 = vmatprep.mubr.msk.bf16.mxu1 %vm2177_vm3, %v2002_v61  ;;  %v8143_v9 = vmax.f32 %v7094_v5, 0.0  ;;  %v2452_v49 = vpop.f32.mrf.mxu1  ;;  %v3058_v6 = vmax.f32 %v2930_v38, 0.0  ;;  %v7123_v47 = vadd.f32 %v7082_v7, %v6749_v62  ;;  %v7127_v60 = vadd.f32 %v7082_v7, %v6783_v22 }
 0x22c   : > { %v3183_v31 = vpack.c.bf16 %v3061_v19, %v3060_v42  ;;  %v3059_v0 = vmax.f32 %v2931_v12, 0.0  ;;  %v2453_v16 = vadd.f32 %v2452_v49, %v2037_v20  ;;  %v2936_v43 = vadd.f32 %v6967_v18, %v2461_v35  ;;  %v8288_v19 = vld [vmem:[#allocation23_spill] sm:$0xff] }
 0x22d   : > { %v4999_v61 = vpop.f32.mrf.mxu1  ;;  %v8287_v2 = vmax.f32 %v8286_v33, 0.0  ;;  %v2003_v20 = vpack.c.bf16 %v8144_v57, %v8145_v25  ;;  %v7139_v62 = vadd.f32 %v7082_v7, %v6833_v28  ;;  %v7143_v22 = vadd.f32 %v7082_v7, %v6867_v23  ;;  %v8291_v33 = vld [vmem:[#allocation21_spill] sm:$0xff]  ;;  %v8293_v57 = vld [vmem:[#allocation22_spill] sm:$0xff] }
 0x22e   : > { %v3182_v48 = vpack.c.bf16 %v3059_v0, %v3058_v6  ;;  %v2464_v63 = vadd.f32 %v4999_v61, %v2040_v51  ;;  %v8289_v51 = vmax.f32 %v8288_v19, 0.0  ;;  %v8290_v35 = vmax.f32 %v7098_v27, 0.0 }
 0x22f   : > { %v2038_v38 = vmul.f32 %v6926_v45, %v8287_v2  ;;  %v2455_v42 = vpop.f32.mrf.mxu1  ;;  %v2934_v49 = vadd.f32 %v6967_v18, %v2453_v16  ;;  %v8292_v19 = vmax.f32 %v8291_v33, 0.0 }
 0x230   : > { %v2043_v12 = vmul.f32 %v6926_v45, %v8289_v51  ;;  %v2004_v2 = vpack.c.bf16 %v8290_v35, %v8143_v9  ;;  %v2937_v6 = vadd.f32 %v6967_v18, %v2464_v63  ;;  %5128 = vmatprep.mubr.msk.bf16.mxu0 %vm2177_vm3, %v3182_v48  ;;  %v3064_v35 = vmax.f32 %v2936_v43, 0.0 }
 0x231   : > { %v2456_v28 = vadd.f32 %v2455_v42, %v2038_v38  ;;  %v5002_v61 = vpop.f32.mrf.mxu1  ;;  %5097 = vmatmul.mubr.msk.bf16.gmra.mxu1 %vm2177_vm3, %v2003_v20  ;;  %5129 = vmatmul.mubr.msk.bf16.gmra.mxu0 %vm2177_vm3, %v3183_v31  ;;  %v2041_v51 = vmul.f32 %v6926_v45, %v8292_v19  ;;  %v8294_v20 = vmax.f32 %v8293_v57, 0.0  ;;  %v3062_v25 = vmax.f32 %v2934_v49, 0.0 }
 0x232   : > { %v3065_v16 = vmax.f32 %v2937_v6, 0.0  ;;  %v2477_v38 = vadd.f32 %v5002_v61, %v2043_v12  ;;  %5100 = vmatprep.mubr.msk.bf16.mxu1 %vm2177_vm3, %v2004_v2  ;;  %v8295_v6 = vld [vmem:[#allocation24_spill] sm:$0xff]  ;;  %v8299_v42 = vmax.f32 %v7123_v47, 0.0  ;;  %v8300_v48 = vmax.f32 %v7127_v60, 0.0 }
 0x233   : > { %v2935_v63 = vadd.f32 %v6967_v18, %v2456_v28  ;;  %v2468_v9 = vpop.f32.mrf.mxu1  ;;  %v2044_v31 = vmul.f32 %v6926_v45, %v8294_v20  ;;  %v8296_v23 = vmax.f32 %v8295_v6, 0.0  ;;  %v8297_v28 = vld [vmem:[#allocation27_spill] sm:$0xff] }
 0x234   : > { %v3185_v33 = vpack.c.bf16 %v3065_v16, %v3064_v35  ;;  %v2469_v19 = vadd.f32 %v2468_v9, %v2041_v51  ;;  %v8298_v2 = vmax.f32 %v8297_v28, 0.0  ;;  %v2005_v57 = vpack.c.bf16 %v8300_v48, %v8299_v42 }
 0x235   : > { %v3063_v0 = vmax.f32 %v2935_v63, 0.0  ;;  %v5003_v43 = vpop.f32.mrf.mxu1  ;;  %v2042_v12 = vmul.f32 %v6926_v45, %v8296_v23  ;;  %v2940_v49 = vadd.f32 %v6967_v18, %v2477_v38  ;;  %v7182_v9 = vadd.f32 %v7082_v7, %v6817_v15 }
 0x236   : > { %v2047_v61 = vmul.f32 %v6926_v45, %v8298_v2  ;;  %v2480_v35 = vadd.f32 %v5003_v43, %v2044_v31  ;;  %v7186_v23 = vadd.f32 %v7082_v7, %v6851_v41  ;;  %v7190_v51 = vadd.f32 %v7082_v7, %v6901_v4  ;;  %v8305_v31 = vld [vmem:[#allocation26_spill] sm:$0xff] }
 0x237   : > { %v3184_v27 = vpack.c.bf16 %v3063_v0, %v3062_v25  ;;  %v7194_v16 = vadd.f32 %v7082_v7, %v6940_v37  ;;  %v2471_v25 = vpop.f32.mrf.mxu1  ;;  %v8301_v0 = vmax.f32 %v7139_v62, 0.0  ;;  %v8302_v63 = vmax.f32 %v7143_v22, 0.0  ;;  %v8303_v37 = vld [vmem:[#allocation25_spill] sm:$0xff] }
 0x238   : > { %v2938_v15 = vadd.f32 %v6967_v18, %v2469_v19  ;;  %v2941_v48 = vadd.f32 %v6967_v18, %v2480_v35  ;;  %v2472_v41 = vadd.f32 %v2471_v25, %v2042_v12  ;;  %v8304_v4 = vmax.f32 %v8303_v37, 0.0 }
 0x239   : > { %v2006_v38 = vpack.c.bf16 %v8302_v63, %v8301_v0  ;;  %5132 = vmatprep.mubr.msk.bf16.mxu0 %vm2177_vm3, %v3184_v27  ;;  %v5006_v42 = vpop.f32.mrf.mxu1  ;;  %5101 = vmatmul.mubr.msk.bf16.gmra.mxu1 %vm2177_vm3, %v2005_v57  ;;  %v8306_v43 = vmax.f32 %v8305_v31, 0.0  ;;  %v3068_v28 = vmax.f32 %v2940_v49, 0.0  ;;  %v1940_v27 = vmax.f32 %v7182_v9, 0.0 }
 0x23a   : > { %5133 = vmatmul.mubr.msk.bf16.gmra.mxu0 %vm2177_vm3, %v3185_v33  ;;  %v2045_v20 = vmul.f32 %v6926_v45, %v8304_v4  ;;  %v3069_v19 = vmax.f32 %v2941_v48, 0.0  ;;  %v2939_v2 = vadd.f32 %v6967_v18, %v2472_v41  ;;  %v2493_v12 = vadd.f32 %v5006_v42, %v2047_v61  ;;  %v8307_v42 = vld [vmem:[#allocation28_spill] sm:$0xff] }
 0x23b   : > { %v2048_v6 = vmul.f32 %v6926_v45, %v8306_v43  ;;  %5104 = vmatprep.mubr.msk.bf16.mxu1 %vm2177_vm3, %v2006_v38  ;;  %v8149_v57 = vmax.f32 %v7186_v23, 0.0  ;;  %v8148_v33 = vmax.f32 %v7190_v51, 0.0  ;;  %v8147_v35 = vmax.f32 %v7194_v16, 0.0  ;;  %v2484_v25 = vpop.f32.mrf.mxu1 }
 0x23c   : > { %v3066_v0 = vmax.f32 %v2938_v15, 0.0  ;;  %v3187_v63 = vpack.c.bf16 %v3069_v19, %v3068_v28  ;;  %v3067_v37 = vmax.f32 %v2939_v2, 0.0  ;;  %v2485_v4 = vadd.f32 %v2484_v25, %v2045_v20  ;;  %v8309_v19 = vld [vmem:[#allocation31_spill] sm:$0xff] }
 0x23d   : > { %v5007_v49 = vpop.f32.mrf.mxu1  ;;  %v2944_v41 = vadd.f32 %v6967_v18, %v2493_v12  ;;  %v8308_v38 = vmax.f32 %v8307_v42, 0.0  ;;  %v2007_v43 = vpack.c.bf16 %v8149_v57, %v1940_v27  ;;  %v7227_v15 = vadd.f32 %v7082_v7, %v6885_v24 }
 0x23e   : > { %v3186_v48 = vpack.c.bf16 %v3067_v37, %v3066_v0  ;;  %v2496_v61 = vadd.f32 %v5007_v49, %v2048_v6  ;;  %v7231_v20 = vadd.f32 %v7082_v7, %v6919_v39  ;;  %v8310_v6 = vmax.f32 %v8309_v19, 0.0  ;;  %v8311_v39 = vld [vmem:[#allocation29_spill] sm:$0xff] }
 0x23f   : > { %v2046_v31 = vmul.f32 %v6926_v45, %v8308_v38  ;;  %v2487_v28 = vpop.f32.mrf.mxu1  ;;  %v2008_v12 = vpack.c.bf16 %v8147_v35, %v8148_v33  ;;  %v2942_v25 = vadd.f32 %v6967_v18, %v2485_v4  ;;  %v8312_v7 = vmax.f32 %v8311_v39, 0.0 }
 0x240   : > { %v2051_v2 = vmul.f32 %v6926_v45, %v8310_v6  ;;  %v2945_v0 = vadd.f32 %v6967_v18, %v2496_v61  ;;  %5136 = vmatprep.mubr.msk.bf16.mxu0 %vm2177_vm3, %v3186_v48  ;;  %v3072_v42 = vmax.f32 %v2944_v41, 0.0  ;;  %v8151_v4 = vmax.f32 %v7227_v15, 0.0 }
 0x241   : > { %v2488_v24 = vadd.f32 %v2487_v28, %v2046_v31  ;;  %v5010_v37 = vpop.f32.mrf.mxu1  ;;  %5105 = vmatmul.mubr.msk.bf16.gmra.mxu1 %vm2177_vm3, %v2007_v43  ;;  %v2049_v49 = vmul.f32 %v6926_v45, %v8312_v7  ;;  %v8150_v48 = vmax.f32 %v7231_v20, 0.0  ;;  %v8313_v31 = vld [vmem:[#allocation30_spill] sm:$0xff]  ;;  %v3070_v28 = vmax.f32 %v2942_v25, 0.0 }
 0x242   : > { %5137 = vmatmul.mubr.msk.bf16.gmra.mxu0 %vm2177_vm3, %v3187_v63  ;;  %v3073_v38 = vmax.f32 %v2945_v0, 0.0  ;;  %v2509_v6 = vadd.f32 %v5010_v37, %v2051_v2  ;;  %5108 = vmatprep.mubr.msk.bf16.mxu1 %vm2177_vm3, %v2008_v12  ;;  %v8314_v43 = vmax.f32 %v8313_v31, 0.0  ;;  %v8315_v37 = vld [vmem:[#allocation32_spill] sm:$0xff] }
 0x243   : > { %v2943_v19 = vadd.f32 %v6967_v18, %v2488_v24  ;;  %v2500_v61 = vpop.f32.mrf.mxu1  ;;  %v8316_v12 = vmax.f32 %v8315_v37, 0.0  ;;  %v2009_v31 = vpack.c.bf16 %v8150_v48, %v8151_v4 }
 0x244   : > { %v2052_v63 = vmul.f32 %v6926_v45, %v8314_v43  ;;  %v3189_v39 = vpack.c.bf16 %v3073_v38, %v3072_v42  ;;  %v2501_v7 = vadd.f32 %v2500_v61, %v2049_v49  ;;  %v2948_v24 = vadd.f32 %v6967_v18, %v2509_v6  ;;  %v8319_v61 = vld [vmem:[#allocation33_spill] sm:$0xff] }
 0x245   : > { %v3071_v35 = vmax.f32 %v2943_v19, 0.0  ;;  %v5011_v41 = vpop.f32.mrf.mxu1  ;;  %v2050_v33 = vmul.f32 %v6926_v45, %v8316_v12  ;;  %v8320_v43 = vmax.f32 %v8319_v61, 0.0 }
 0x246   : > { %v2512_v2 = vadd.f32 %v5011_v41, %v2052_v63  ;;  %v2946_v25 = vadd.f32 %v6967_v18, %v2501_v7 }
 0x247   : > { %v3188_v0 = vpack.c.bf16 %v3071_v35, %v3070_v28  ;;  %v2503_v57 = vpop.f32.mrf.mxu1  ;;  %v8317_v35 = vld [vmem:[#allocation35_spill] sm:$0xff]  ;;  %v2053_v63 = vmul.f32 %v6926_v45, %v8320_v43  ;;  %v3076_v28 = vmax.f32 %v2948_v24, 0.0  ;;  %v8323_v43 = vld [vmem:[#allocation36_spill] sm:$0xff] }
 0x248   : > { %v2949_v42 = vadd.f32 %v6967_v18, %v2512_v2  ;;  %v2504_v49 = vadd.f32 %v2503_v57, %v2050_v33  ;;  %v8318_v38 = vmax.f32 %v8317_v35, 0.0  ;;  %v3074_v12 = vmax.f32 %v2946_v25, 0.0  ;;  %v8325_v25 = vld [vmem:[#allocation39_spill] sm:$0xff] }
 0x249   : > { %5140 = vmatprep.mubr.msk.bf16.mxu0 %vm2177_vm3, %v3188_v0  ;;  %v5014_v6 = vpop.f32.mrf.mxu1  ;;  %5109 = vmatmul.mubr.msk.bf16.gmra.mxu1 %vm2177_vm3, %v2009_v31  ;;  %v8321_v0 = vld [vmem:[#allocation34_spill] sm:$0xff]  ;;  %v8324_v24 = vmax.f32 %v8323_v43, 0.0 }
 0x24a   : > { %v2055_v19 = vmul.f32 %v6926_v45, %v8318_v38  ;;  %5141 = vmatmul.mubr.msk.bf16.gmra.mxu0 %vm2177_vm3, %v3189_v39  ;;  %v3077_v7 = vmax.f32 %v2949_v42, 0.0  ;;  %v2947_v41 = vadd.f32 %v6967_v18, %v2504_v49  ;;  %v8322_v2 = vmax.f32 %v8321_v0, 0.0 }
 0x24b   : > { %v2516_v33 = vpop.f32.mrf.mxu1  ;;  %v2054_v42 = vmul.f32 %v6926_v45, %v8324_v24 }
 0x24c   : > { %v2525_v57 = vadd.f32 %v5014_v6, %v2055_v19  ;;  %v2056_v37 = vmul.f32 %v6926_v45, %v8322_v2  ;;  %v3191_v35 = vpack.c.bf16 %v3077_v7, %v3076_v28  ;;  %v3075_v38 = vmax.f32 %v2947_v41, 0.0 }
 0x24d   : > { %v2517_v31 = vadd.f32 %v2516_v33, %v2053_v63  ;;  %v5015_v48 = vpop.f32.mrf.mxu1  ;;  %v8326_v28 = vmax.f32 %v8325_v25, 0.0 }
 0x24e   : > { %v3190_v39 = vpack.c.bf16 %v3075_v38, %v3074_v12  ;;  %v2952_v61 = vadd.f32 %v6967_v18, %v2525_v57  ;;  %v2528_v4 = vadd.f32 %v5015_v48, %v2056_v37  ;;  %v8327_v48 = vld [vmem:[#allocation37_spill] sm:$0xff]  ;;  %v8329_v38 = vld [vmem:[#allocation38_spill] sm:$0xff] }
 0x24f   : > { %v2519_v49 = vpop.f32.mrf.mxu1  ;;  %v2950_v19 = vadd.f32 %v6967_v18, %v2517_v31  ;;  %v2059_v63 = vmul.f32 %v6926_v45, %v8326_v28  ;;  %v8328_v41 = vmax.f32 %v8327_v48, 0.0  ;;  %v8330_v31 = vmax.f32 %v8329_v38, 0.0 }
 0x250   : > { %v2953_v6 = vadd.f32 %v6967_v18, %v2528_v4  ;;  %v2520_v0 = vadd.f32 %v2519_v49, %v2054_v42  ;;  %5144 = vmatprep.mubr.msk.bf16.mxu0 %vm2177_vm3, %v3190_v39  ;;  %v3080_v33 = vmax.f32 %v2952_v61, 0.0 }
 0x251   : > { %v5018_v7 = vpop.f32.mrf.mxu1  ;;  %v2057_v57 = vmul.f32 %v6926_v45, %v8328_v41  ;;  %v2060_v39 = vmul.f32 %v6926_v45, %v8330_v31  ;;  %v3078_v43 = vmax.f32 %v2950_v19, 0.0  ;;  %v8331_v41 = vld [vmem:[#allocation40_spill] sm:$0xff]  ;;  %v8333_v19 = vld [vmem:[#allocation43_spill] sm:$0xff] }
 0x252   : > { %5145 = vmatmul.mubr.msk.bf16.gmra.mxu0 %vm2177_vm3, %v3191_v35  ;;  %v3081_v2 = vmax.f32 %v2953_v6, 0.0  ;;  %v2951_v37 = vadd.f32 %v6967_v18, %v2520_v0  ;;  %v2541_v12 = vadd.f32 %v5018_v7, %v2059_v63  ;;  %v8332_v61 = vmax.f32 %v8331_v41, 0.0 }
 0x253   : > { %v2532_v4 = vpop.f32.mrf.mxu1 }
 0x254   : > { %v3193_v24 = vpack.c.bf16 %v3081_v2, %v3080_v33  ;;  %v3079_v42 = vmax.f32 %v2951_v37, 0.0  ;;  %v2533_v49 = vadd.f32 %v2532_v4, %v2057_v57  ;;  %v2956_v28 = vadd.f32 %v6967_v18, %v2541_v12  ;;  %v8335_v37 = vld [vmem:[#allocation41_spill] sm:$0xff] }
 0x255   : > { %v5019_v25 = vpop.f32.mrf.mxu1  ;;  %v2058_v6 = vmul.f32 %v6926_v45, %v8332_v61  ;;  %v8334_v33 = vmax.f32 %v8333_v19, 0.0  ;;  %v8336_v12 = vmax.f32 %v8335_v37, 0.0 }
 0x256   : > { %v3192_v35 = vpack.c.bf16 %v3079_v42, %v3078_v43  ;;  %v2544_v48 = vadd.f32 %v5019_v25, %v2060_v39  ;;  %v2954_v63 = vadd.f32 %v6967_v18, %v2533_v49  ;;  %v3084_v31 = vmax.f32 %v2956_v28, 0.0  ;;  %v8337_v25 = vld [vmem:[#allocation42_spill] sm:$0xff] }
 0x257   : > { %v2535_v0 = vpop.f32.mrf.mxu1  ;;  %v2063_v57 = vmul.f32 %v6926_v45, %v8334_v33  ;;  %v2061_v4 = vmul.f32 %v6926_v45, %v8336_v12  ;;  %v8339_v12 = vld [vmem:[#allocation44_spill] sm:$0xff] }
 0x258   : > { %v2957_v7 = vadd.f32 %v6967_v18, %v2544_v48  ;;  %v2536_v38 = vadd.f32 %v2535_v0, %v2058_v6  ;;  %5148 = vmatprep.mubr.msk.bf16.mxu0 %vm2177_vm3, %v3192_v35  ;;  %v8338_v48 = vmax.f32 %v8337_v25, 0.0  ;;  %v3082_v41 = vmax.f32 %v2954_v63, 0.0  ;;  %v8341_v63 = vld [vmem:[#allocation47_spill] sm:$0xff] }
 0x259   : > { %v5022_v2 = vpop.f32.mrf.mxu1  ;;  %v8340_v28 = vmax.f32 %v8339_v12, 0.0 }
 0x25a   : > { %5149 = vmatmul.mubr.msk.bf16.gmra.mxu0 %vm2177_vm3, %v3193_v24  ;;  %v3085_v39 = vmax.f32 %v2957_v7, 0.0  ;;  %v2955_v43 = vadd.f32 %v6967_v18, %v2536_v38  ;;  %v2557_v42 = vadd.f32 %v5022_v2, %v2063_v57  ;;  %v2064_v35 = vmul.f32 %v6926_v45, %v8338_v48 }
 0x25b   : > { %v2548_v49 = vpop.f32.mrf.mxu1  ;;  %v2062_v7 = vmul.f32 %v6926_v45, %v8340_v28 }
 0x25c   : > { %v3195_v61 = vpack.c.bf16 %v3085_v39, %v3084_v31  ;;  %v3083_v6 = vmax.f32 %v2955_v43, 0.0  ;;  %v2549_v0 = vadd.f32 %v2548_v49, %v2061_v4  ;;  %v2960_v33 = vadd.f32 %v6967_v18, %v2557_v42  ;;  %v8343_v43 = vld [vmem:[#allocation45_spill] sm:$0xff] }
 0x25d   : > { %v5023_v19 = vpop.f32.mrf.mxu1  ;;  %v8342_v31 = vmax.f32 %v8341_v63, 0.0  ;;  %v8344_v42 = vmax.f32 %v8343_v43, 0.0 }
 0x25e   : > { %v3194_v24 = vpack.c.bf16 %v3083_v6, %v3082_v41  ;;  %v2560_v37 = vadd.f32 %v5023_v19, %v2064_v35  ;;  %v2958_v57 = vadd.f32 %v6967_v18, %v2549_v0  ;;  %v3088_v48 = vmax.f32 %v2960_v33, 0.0  ;;  %v8345_v19 = vld [vmem:[#allocation46_spill] sm:$0xff] }
 0x25f   : > { %v2551_v38 = vpop.f32.mrf.mxu1  ;;  %v2067_v4 = vmul.f32 %v6926_v45, %v8342_v31  ;;  %v2065_v49 = vmul.f32 %v6926_v45, %v8344_v42  ;;  %v8347_v42 = vld [vmem:[#allocation48_spill] sm:$0xff] }
 0x260   : > { %v2961_v2 = vadd.f32 %v6967_v18, %v2560_v37  ;;  %v2552_v25 = vadd.f32 %v2551_v38, %v2062_v7  ;;  %5152 = vmatprep.mubr.msk.bf16.mxu0 %vm2177_vm3, %v3194_v24  ;;  %v8346_v37 = vmax.f32 %v8345_v19, 0.0  ;;  %v3086_v12 = vmax.f32 %v2958_v57, 0.0  ;;  %v8349_v57 = vld [vmem:[#allocation51_spill] sm:$0xff] }
 0x261   : > { %v5026_v39 = vpop.f32.mrf.mxu1  ;;  %v8348_v33 = vmax.f32 %v8347_v42, 0.0 }
 0x262   : > { %5153 = vmatmul.mubr.msk.bf16.gmra.mxu0 %vm2177_vm3, %v3195_v61  ;;  %v3089_v35 = vmax.f32 %v2961_v2, 0.0  ;;  %v2959_v41 = vadd.f32 %v6967_v18, %v2552_v25  ;;  %v2573_v6 = vadd.f32 %v5026_v39, %v2067_v4  ;;  %v2068_v24 = vmul.f32 %v6926_v45, %v8346_v37 }
 0x263   : > { %v2564_v0 = vpop.f32.mrf.mxu1  ;;  %v2066_v2 = vmul.f32 %v6926_v45, %v8348_v33 }
 0x264   : > { %v3197_v28 = vpack.c.bf16 %v3089_v35, %v3088_v48  ;;  %v3087_v7 = vmax.f32 %v2959_v41, 0.0  ;;  %v2565_v38 = vadd.f32 %v2564_v0, %v2065_v49  ;;  %v2964_v31 = vadd.f32 %v6967_v18, %v2573_v6  ;;  %v8351_v41 = vld [vmem:[#allocation49_spill] sm:$0xff] }
 0x265   : > { %v5027_v63 = vpop.f32.mrf.mxu1  ;;  %v8350_v48 = vmax.f32 %v8349_v57, 0.0  ;;  %v8352_v6 = vmax.f32 %v8351_v41, 0.0 }
 0x266   : > { %v3196_v61 = vpack.c.bf16 %v3087_v7, %v3086_v12  ;;  %v2576_v43 = vadd.f32 %v5027_v63, %v2068_v24  ;;  %v2962_v4 = vadd.f32 %v6967_v18, %v2565_v38  ;;  %v3092_v37 = vmax.f32 %v2964_v31, 0.0  ;;  %v8353_v63 = vld [vmem:[#allocation50_spill] sm:$0xff] }
 0x267   : > { %v2567_v25 = vpop.f32.mrf.mxu1  ;;  %v2071_v49 = vmul.f32 %v6926_v45, %v8350_v48  ;;  %v2069_v0 = vmul.f32 %v6926_v45, %v8352_v6  ;;  %v8355_v6 = vld [vmem:[#allocation52_spill] sm:$0xff] }
 0x268   : > { %v2965_v39 = vadd.f32 %v6967_v18, %v2576_v43  ;;  %v2568_v19 = vadd.f32 %v2567_v25, %v2066_v2  ;;  %5156 = vmatprep.mubr.msk.bf16.mxu0 %vm2177_vm3, %v3196_v61  ;;  %v8354_v43 = vmax.f32 %v8353_v63, 0.0  ;;  %v3090_v42 = vmax.f32 %v2962_v4, 0.0  ;;  %v8357_v4 = vld [vmem:[#allocation55_spill] sm:$0xff] }
 0x269   : > { %v5030_v35 = vpop.f32.mrf.mxu1  ;;  %v8356_v31 = vmax.f32 %v8355_v6, 0.0 }
 0x26a   : > { %5157 = vmatmul.mubr.msk.bf16.gmra.mxu0 %vm2177_vm3, %v3197_v28  ;;  %v3093_v24 = vmax.f32 %v2965_v39, 0.0  ;;  %v2963_v12 = vadd.f32 %v6967_v18, %v2568_v19  ;;  %v2589_v7 = vadd.f32 %v5030_v35, %v2071_v49  ;;  %v2072_v61 = vmul.f32 %v6926_v45, %v8354_v43 }
 0x26b   : > { %v2580_v38 = vpop.f32.mrf.mxu1  ;;  %v2070_v39 = vmul.f32 %v6926_v45, %v8356_v31 }
 0x26c   : > { %v3199_v33 = vpack.c.bf16 %v3093_v24, %v3092_v37  ;;  %v3091_v2 = vmax.f32 %v2963_v12, 0.0  ;;  %v2581_v25 = vadd.f32 %v2580_v38, %v2069_v0  ;;  %v2968_v48 = vadd.f32 %v6967_v18, %v2589_v7  ;;  %v8359_v12 = vld [vmem:[#allocation53_spill] sm:$0xff] }
 0x26d   : > { %v5031_v57 = vpop.f32.mrf.mxu1  ;;  %v8358_v37 = vmax.f32 %v8357_v4, 0.0  ;;  %v8360_v7 = vmax.f32 %v8359_v12, 0.0 }
 0x26e   : > { %v3198_v28 = vpack.c.bf16 %v3091_v2, %v3090_v42  ;;  %v2592_v41 = vadd.f32 %v5031_v57, %v2072_v61  ;;  %v2966_v49 = vadd.f32 %v6967_v18, %v2581_v25  ;;  %v3096_v43 = vmax.f32 %v2968_v48, 0.0  ;;  %v8361_v57 = vld [vmem:[#allocation54_spill] sm:$0xff] }
 0x26f   : > { %v2583_v19 = vpop.f32.mrf.mxu1  ;;  %v2075_v0 = vmul.f32 %v6926_v45, %v8358_v37  ;;  %v2073_v38 = vmul.f32 %v6926_v45, %v8360_v7  ;;  %v8363_v7 = vld [vmem:[#allocation56_spill] sm:$0xff] }
 0x270   : > { %v2969_v35 = vadd.f32 %v6967_v18, %v2592_v41  ;;  %v2584_v63 = vadd.f32 %v2583_v19, %v2070_v39  ;;  %5160 = vmatprep.mubr.msk.bf16.mxu0 %vm2177_vm3, %v3198_v28  ;;  %v8362_v41 = vmax.f32 %v8361_v57, 0.0  ;;  %v3094_v6 = vmax.f32 %v2966_v49, 0.0  ;;  %v8365_v49 = vld [vmem:[#allocation59_spill] sm:$0xff] }
 0x271   : > { %v5034_v24 = vpop.f32.mrf.mxu1  ;;  %v8364_v48 = vmax.f32 %v8363_v7, 0.0 }
 0x272   : > { %5161 = vmatmul.mubr.msk.bf16.gmra.mxu0 %vm2177_vm3, %v3199_v33  ;;  %v3097_v61 = vmax.f32 %v2969_v35, 0.0  ;;  %v2967_v42 = vadd.f32 %v6967_v18, %v2584_v63  ;;  %v2605_v2 = vadd.f32 %v5034_v24, %v2075_v0  ;;  %v2076_v28 = vmul.f32 %v6926_v45, %v8362_v41 }
 0x273   : > { %v2596_v25 = vpop.f32.mrf.mxu1  ;;  %v2074_v35 = vmul.f32 %v6926_v45, %v8364_v48 }
 0x274   : > { %v3201_v31 = vpack.c.bf16 %v3097_v61, %v3096_v43  ;;  %v3095_v39 = vmax.f32 %v2967_v42, 0.0  ;;  %v2597_v19 = vadd.f32 %v2596_v25, %v2073_v38  ;;  %v2972_v37 = vadd.f32 %v6967_v18, %v2605_v2  ;;  %v8367_v42 = vld [vmem:[#allocation57_spill] sm:$0xff] }
 0x275   : > { %v5035_v4 = vpop.f32.mrf.mxu1  ;;  %v8366_v43 = vmax.f32 %v8365_v49, 0.0  ;;  %v8368_v2 = vmax.f32 %v8367_v42, 0.0 }
 0x276   : > { %v3200_v33 = vpack.c.bf16 %v3095_v39, %v3094_v6  ;;  %v2608_v12 = vadd.f32 %v5035_v4, %v2076_v28  ;;  %v2970_v0 = vadd.f32 %v6967_v18, %v2597_v19  ;;  %v3100_v41 = vmax.f32 %v2972_v37, 0.0  ;;  %v8369_v4 = vld [vmem:[#allocation58_spill] sm:$0xff] }
 0x277   : > { %v2599_v63 = vpop.f32.mrf.mxu1  ;;  %v2079_v38 = vmul.f32 %v6926_v45, %v8366_v43  ;;  %v2077_v25 = vmul.f32 %v6926_v45, %v8368_v2  ;;  %v8371_v2 = vld [vmem:[#allocation60_spill] sm:$0xff] }
 0x278   : > { %v2973_v24 = vadd.f32 %v6967_v18, %v2608_v12  ;;  %v2600_v57 = vadd.f32 %v2599_v63, %v2074_v35  ;;  %5164 = vmatprep.mubr.msk.bf16.mxu0 %vm2177_vm3, %v3200_v33  ;;  %v8370_v12 = vmax.f32 %v8369_v4, 0.0  ;;  %v3098_v7 = vmax.f32 %v2970_v0, 0.0 }
 0x279   : > { %v5038_v61 = vpop.f32.mrf.mxu1  ;;  %v8372_v37 = vmax.f32 %v8371_v2, 0.0  ;;  %v8373_v0 = vmax.f32 %v6560_v50, 0.0 }
 0x27a   : > { %5165 = vmatmul.mubr.msk.bf16.gmra.mxu0 %vm2177_vm3, %v3201_v31  ;;  %v3101_v28 = vmax.f32 %v2973_v24, 0.0  ;;  %v2971_v6 = vadd.f32 %v6967_v18, %v2600_v57  ;;  %v2621_v39 = vadd.f32 %v5038_v61, %v2079_v38  ;;  %v2080_v33 = vmul.f32 %v6926_v45, %v8370_v12 }
 0x27b   : > { %v2612_v19 = vpop.f32.mrf.mxu1  ;;  %v2078_v24 = vmul.f32 %v6926_v45, %v8372_v37 }
 0x27c   : > { %v3203_v48 = vpack.c.bf16 %v3101_v28, %v3100_v41  ;;  %v3099_v35 = vmax.f32 %v2971_v6, 0.0  ;;  %v2613_v63 = vadd.f32 %v2612_v19, %v2077_v25  ;;  %v2976_v43 = vadd.f32 %v6967_v18, %v2621_v39  ;;  %v8374_v28 = vld [vmem:[#allocation61_spill] sm:$0xff] }
 0x27d   : > { %v5039_v49 = vpop.f32.mrf.mxu1  ;;  %v2083_v25 = vmul.f32 %v6926_v45, %v8373_v0  ;;  %v8375_v6 = vmax.f32 %v8374_v28, 0.0  ;;  %v8378_v28 = vld [vmem:[#allocation63_spill] sm:$0xff] }
 0x27e   : > { %v3202_v31 = vpack.c.bf16 %v3099_v35, %v3098_v7  ;;  %v2624_v42 = vadd.f32 %v5039_v49, %v2080_v33  ;;  %v2974_v38 = vadd.f32 %v6967_v18, %v2613_v63  ;;  %v3104_v19 = vmax.f32 %v2976_v43, 0.0  ;;  %v8376_v63 = vld [vmem:[#allocation62_spill] sm:$0xff] }
 0x27f   : > { %v2615_v57 = vpop.f32.mrf.mxu1  ;;  %v2081_v39 = vmul.f32 %v6926_v45, %v8375_v6  ;;  %v8377_v49 = vmax.f32 %v8376_v63, 0.0  ;;  %v8379_v43 = vmax.f32 %v8378_v28, 0.0 }
 0x280   : > { %v2977_v61 = vadd.f32 %v6967_v18, %v2624_v42  ;;  %v2616_v4 = vadd.f32 %v2615_v57, %v2078_v24  ;;  %5168 = vmatprep.mubr.msk.bf16.mxu0 %vm2177_vm3, %v3202_v31  ;;  %v3102_v50 = vmax.f32 %v2974_v38, 0.0  ;;  %v8380_v38 = vmax.f32 %v6598_v54, 0.0 }
 0x281   : > { %v5042_v41 = vpop.f32.mrf.mxu1  ;;  %v2084_v31 = vmul.f32 %v6926_v45, %v8377_v49 }
 0x282   : > { %5169 = vmatmul.mubr.msk.bf16.gmra.mxu0 %vm2177_vm3, %v3203_v48  ;;  %v3105_v12 = vmax.f32 %v2977_v61, 0.0  ;;  %v2975_v33 = vadd.f32 %v6967_v18, %v2616_v4  ;;  %v2637_v7 = vadd.f32 %v5042_v41, %v2083_v25  ;;  %v2082_v61 = vmul.f32 %v6926_v45, %v8379_v43 }
 0x283   : > { %v2628_v35 = vpop.f32.mrf.mxu1 }
 0x284   : > { %v3205_v42 = vpack.c.bf16 %v3105_v12, %v3104_v19  ;;  %v3103_v2 = vmax.f32 %v2975_v33, 0.0  ;;  %v2629_v37 = vadd.f32 %v2628_v35, %v2081_v39  ;;  %v2980_v57 = vadd.f32 %v6967_v18, %v2637_v7  ;;  %v8381_v12 = vld [vmem:[#allocation66_spill] sm:$0xff] }
 0x285   : > { %v5043_v24 = vpop.f32.mrf.mxu1  ;;  %v2087_v39 = vmul.f32 %v6926_v45, %v8380_v38  ;;  %v8382_v33 = vmax.f32 %v8381_v12, 0.0 }
 0x286   : > { %v3204_v48 = vpack.c.bf16 %v3103_v2, %v3102_v50  ;;  %v2640_v0 = vadd.f32 %v5043_v24, %v2084_v31  ;;  %v2978_v25 = vadd.f32 %v6967_v18, %v2629_v37  ;;  %v3108_v35 = vmax.f32 %v2980_v57, 0.0 }
 0x287   : > { %v2631_v4 = vpop.f32.mrf.mxu1  ;;  %v2085_v7 = vmul.f32 %v6926_v45, %v8382_v33  ;;  %v8383_v2 = vmax.f32 %v6594_v30, 0.0  ;;  %v8387_v33 = vmax.f32 %v6584_v32, 0.0 }
 0x288   : > { %v2981_v41 = vadd.f32 %v6967_v18, %v2640_v0  ;;  %v2632_v6 = vadd.f32 %v2631_v4, %v2082_v61  ;;  %5172 = vmatprep.mubr.msk.bf16.mxu0 %vm2177_vm3, %v3204_v48  ;;  %v3106_v54 = vmax.f32 %v2978_v25, 0.0  ;;  %v8384_v4 = vld [vmem:[#allocation67_spill] sm:$0xff]  ;;  %v8386_v25 = vmax.f32 %v6618_v21, 0.0 }
 0x289   : > { %v5046_v19 = vpop.f32.mrf.mxu1  ;;  %v2088_v37 = vmul.f32 %v6926_v45, %v8383_v2  ;;  %v8385_v57 = vmax.f32 %v8384_v4, 0.0  ;;  %v8388_v2 = vmax.f32 %v6622_v53, 0.0 }
 0x28a   : > { %5173 = vmatmul.mubr.msk.bf16.gmra.mxu0 %vm2177_vm3, %v3205_v42  ;;  %v3109_v63 = vmax.f32 %v2981_v41, 0.0  ;;  %v2979_v49 = vadd.f32 %v6967_v18, %v2632_v6  ;;  %v2653_v31 = vadd.f32 %v5046_v19, %v2087_v39  ;;  %v2091_v19 = vmul.f32 %v6926_v45, %v8386_v25  ;;  %v8392_v25 = vld [vmem:[#allocation68_spill] sm:$0xff] }
 0x28b   : > { %v2644_v50 = vpop.f32.mrf.mxu1  ;;  %v2086_v41 = vmul.f32 %v6926_v45, %v8385_v57 }
 0x28c   : > { %v3207_v24 = vpack.c.bf16 %v3109_v63, %v3108_v35  ;;  %v3107_v48 = vmax.f32 %v2979_v49, 0.0  ;;  %v2645_v0 = vadd.f32 %v2644_v50, %v2085_v7  ;;  %v2984_v43 = vadd.f32 %v6967_v18, %v2653_v31 }
 0x28d   : > { %v5047_v28 = vpop.f32.mrf.mxu1  ;;  %v2089_v7 = vmul.f32 %v6926_v45, %v8387_v33 }
 0x28e   : > { %v3206_v42 = vpack.c.bf16 %v3107_v48, %v3106_v54  ;;  %v2656_v61 = vadd.f32 %v5047_v28, %v2088_v37  ;;  %v2982_v38 = vadd.f32 %v6967_v18, %v2645_v0  ;;  %v3112_v35 = vmax.f32 %v2984_v43, 0.0 }
 0x28f   : > { %v2647_v6 = vpop.f32.mrf.mxu1  ;;  %v2092_v37 = vmul.f32 %v6926_v45, %v8388_v2 }
 0x290   : > { %v2985_v30 = vadd.f32 %v6967_v18, %v2656_v61  ;;  %v2648_v39 = vadd.f32 %v2647_v6, %v2086_v41  ;;  %5176 = vmatprep.mubr.msk.bf16.mxu0 %vm2177_vm3, %v3206_v42  ;;  %v3110_v21 = vmax.f32 %v2982_v38, 0.0  ;;  %v8389_v61 = vld [vmem:[#allocation65_spill] sm:$0xff]  ;;  %v8391_v38 = vmax.f32 %v6657_v29, 0.0 }
 0x291   : > { %v5050_v12 = vpop.f32.mrf.mxu1  ;;  %v8390_v43 = vmax.f32 %v8389_v61, 0.0 }
 0x292   : > { %5177 = vmatmul.mubr.msk.bf16.gmra.mxu0 %vm2177_vm3, %v3207_v24  ;;  %v3113_v63 = vmax.f32 %v2985_v30, 0.0  ;;  %v2983_v49 = vadd.f32 %v6967_v18, %v2648_v39  ;;  %v2669_v31 = vadd.f32 %v5050_v12, %v2091_v19  ;;  %v2095_v30 = vmul.f32 %v6926_v45, %v8391_v38 }
 0x293   : > { %v2660_v50 = vpop.f32.mrf.mxu1  ;;  %v2090_v4 = vmul.f32 %v6926_v45, %v8390_v43  ;;  %v8393_v19 = vmax.f32 %v8392_v25, 0.0 }
 0x294   : > { %v3209_v54 = vpack.c.bf16 %v3113_v63, %v3112_v35  ;;  %v3111_v48 = vmax.f32 %v2983_v49, 0.0  ;;  %v2661_v0 = vadd.f32 %v2660_v50, %v2089_v7  ;;  %v2988_v32 = vadd.f32 %v6967_v18, %v2669_v31 }
 0x295   : > { %v5051_v28 = vpop.f32.mrf.mxu1  ;;  %v2093_v12 = vmul.f32 %v6926_v45, %v8393_v19  ;;  %v8394_v31 = vmax.f32 %v6661_v1, 0.0 }
 0x296   : > { %v3208_v24 = vpack.c.bf16 %v3111_v48, %v3110_v21  ;;  %v2672_v42 = vadd.f32 %v5051_v28, %v2092_v37  ;;  %v2986_v41 = vadd.f32 %v6967_v18, %v2661_v0  ;;  %v3116_v33 = vmax.f32 %v2988_v32, 0.0 }
 0x297   : > { %v2663_v57 = vpop.f32.mrf.mxu1  ;;  %v2096_v50 = vmul.f32 %v6926_v45, %v8394_v31 }
 0x298   : > { %v2989_v53 = vadd.f32 %v6967_v18, %v2672_v42  ;;  %v2664_v6 = vadd.f32 %v2663_v57, %v2090_v4  ;;  %5180 = vmatprep.mubr.msk.bf16.mxu0 %vm2177_vm3, %v3208_v24  ;;  %v3114_v29 = vmax.f32 %v2986_v41, 0.0  ;;  %v8395_v24 = vld [vmem:[#allocation69_spill] sm:$0xff]  ;;  %v8397_v57 = vmax.f32 %v6691_v11, 0.0 }
 0x299   : > { %v5054_v39 = vpop.f32.mrf.mxu1  ;;  %v8396_v32 = vmax.f32 %v8395_v24, 0.0  ;;  %v8400_v11 = vmax.f32 %v6695_v56, 0.0  ;;  %v7489_v56 = vld [vmem:[%s7949_s4] ss:$0 sm:$0xff] }
 0x29a   : > { %5181 = vmatmul.mubr.msk.bf16.gmra.mxu0 %vm2177_vm3, %v3209_v54  ;;  %v3117_v7 = vmax.f32 %v2989_v53, 0.0  ;;  %v2987_v35 = vadd.f32 %v6967_v18, %v2664_v6  ;;  %v2685_v63 = vadd.f32 %v5054_v39, %v2095_v30  ;;  %v2099_v41 = vmul.f32 %v6926_v45, %v8397_v57  ;;  %v8398_v6 = vld [vmem:[#allocation70_spill] sm:$0xff] }
 0x29b   : > { %v2676_v49 = vpop.f32.mrf.mxu1  ;;  %v2094_v42 = vmul.f32 %v6926_v45, %v8396_v32  ;;  %v8399_v38 = vmax.f32 %v8398_v6, 0.0 }
 0x29c   : > { %v3211_v2 = vpack.c.bf16 %v3117_v7, %v3116_v33  ;;  %v3115_v37 = vmax.f32 %v2987_v35, 0.0  ;;  %v2677_v21 = vadd.f32 %v2676_v49, %v2093_v12  ;;  %v2992_v0 = vadd.f32 %v6967_v18, %v2685_v63  ;;  %v7476_v7 = vld [vmem:[%s7950_s5] ss:$0 sm:$0xff] }
 0x29d   : > { %v5055_v48 = vpop.f32.mrf.mxu1  ;;  %v2097_v30 = vmul.f32 %v6926_v45, %v8399_v38  ;;  %v2100_v35 = vmul.f32 %v7476_v7, %v8400_v11 }
 0x29e   : > { %v3210_v54 = vpack.c.bf16 %v3115_v37, %v3114_v29  ;;  %v2688_v28 = vadd.f32 %v5055_v48, %v2096_v50  ;;  %v2990_v43 = vadd.f32 %v6967_v18, %v2677_v21  ;;  %v3120_v39 = vmax.f32 %v2992_v0, 0.0  ;;  %v8401_v21 = vld [vmem:[#allocation71_spill] sm:$0xff] }
 0x29f   : > { %v2679_v61 = vpop.f32.mrf.mxu1  ;;  %v8402_v48 = vmax.f32 %v8401_v21, 0.0 }
 0x2a0   : > { %v2993_v1 = vadd.f32 %v6967_v18, %v2688_v28  ;;  %v2680_v4 = vadd.f32 %v2679_v61, %v2094_v42  ;;  %5184 = vmatprep.mubr.msk.bf16.mxu0 %vm2177_vm3, %v3210_v54  ;;  %v3118_v63 = vmax.f32 %v2990_v43, 0.0  ;;  %v8403_v42 = vmax.f32 %v6725_v59, 0.0 }
 0x2a1   : > { %v5058_v53 = vpop.f32.mrf.mxu1  ;;  %v2098_v54 = vmul.f32 %v7476_v7, %v8402_v48 }
 0x2a2   : > { %5185 = vmatmul.mubr.msk.bf16.gmra.mxu0 %vm2177_vm3, %v3211_v2  ;;  %v3121_v25 = vmax.f32 %v2993_v1, 0.0  ;;  %v2991_v19 = vadd.f32 %v6967_v18, %v2680_v4  ;;  %v2701_v12 = vadd.f32 %v5058_v53, %v2099_v41  ;;  %v2103_v61 = vmul.f32 %v7476_v7, %v8403_v42  ;;  %v8404_v1 = vld [vmem:[#allocation72_spill] sm:$0xff] }
 0x2a3   : > { %v2692_v33 = vpop.f32.mrf.mxu1  ;;  %v8405_v4 = vmax.f32 %v8404_v1, 0.0  ;;  %v8412_v1 = vmax.f32 %v6763_v8, 0.0 }
 0x2a4   : > { %v3213_v49 = vpack.c.bf16 %v3121_v25, %v3120_v39  ;;  %v3119_v31 = vmax.f32 %v2991_v19, 0.0  ;;  %v2693_v50 = vadd.f32 %v2692_v33, %v2097_v30  ;;  %v2996_v2 = vadd.f32 %v6967_v18, %v2701_v12 }
 0x2a5   : > { %v5059_v45 = vpop.f32.mrf.mxu1  ;;  %v8406_v30 = vmax.f32 %v6729_v34, 0.0 }
 0x2a6   : > { %v3212_v29 = vpack.c.bf16 %v3119_v31, %v3118_v63  ;;  %v2704_v37 = vadd.f32 %v5059_v45, %v2100_v35  ;;  %v2994_v28 = vadd.f32 %v6967_v18, %v2693_v50  ;;  %v2101_v18 = vmul.f32 %v7476_v7, %v8405_v4 }
 0x2a7   : > { %v2695_v0 = vpop.f32.mrf.mxu1  ;;  %v3124_v57 = vmax.f32 %v2996_v2, 0.0  ;;  %v2104_v39 = vmul.f32 %v7476_v7, %v8406_v30  ;;  %v2108_v4 = vmul.f32 %v7476_v7, %v8412_v1 }
 0x2a8   : > { %v2997_v24 = vadd.f32 %v7489_v56, %v2704_v37  ;;  %v2696_v32 = vadd.f32 %v2695_v0, %v2098_v54  ;;  %5188 = vmatprep.mubr.msk.bf16.mxu0 %vm2177_vm3, %v3212_v29  ;;  %v3122_v59 = vmax.f32 %v2994_v28, 0.0  ;;  %v8409_v37 = vmax.f32 %v6759_v36, 0.0  ;;  %v8410_v54 = vld [vmem:[#allocation74_spill] sm:$0xff] }
 0x2a9   : > { %v5062_v43 = vpop.f32.mrf.mxu1  ;;  %v8411_v0 = vmax.f32 %v8410_v54, 0.0 }
 0x2aa   : > { %5189 = vmatmul.mubr.msk.bf16.gmra.mxu0 %vm2177_vm3, %v3213_v49  ;;  %v3125_v41 = vmax.f32 %v2997_v24, 0.0  ;;  %v2995_v53 = vadd.f32 %v7489_v56, %v2696_v32  ;;  %v2717_v6 = vadd.f32 %v5062_v43, %v2103_v61  ;;  %v8407_v49 = vld [vmem:[#allocation73_spill] sm:$0xff]  ;;  %v2107_v21 = vmul.f32 %v7476_v7, %v8409_v37 }
 0x2ab   : > { %v2708_v38 = vpop.f32.mrf.mxu1  ;;  %v8408_v31 = vmax.f32 %v8407_v49, 0.0  ;;  %v2105_v28 = vmul.f32 %v7476_v7, %v8411_v0  ;;  %v8416_v49 = vld [vmem:[#allocation76_spill] sm:$0xff] }
 0x2ac   : > { %v3215_v25 = vpack.c.bf16 %v3125_v41, %v3124_v57  ;;  %v3123_v19 = vmax.f32 %v2995_v53, 0.0  ;;  %v2709_v12 = vadd.f32 %v2708_v38, %v2101_v18  ;;  %v3000_v35 = vadd.f32 %v7489_v56, %v2717_v6 }
 0x2ad   : > { %v5063_v33 = vpop.f32.mrf.mxu1  ;;  %v2102_v50 = vmul.f32 %v7476_v7, %v8408_v31  ;;  %v8417_v31 = vmax.f32 %v8416_v49, 0.0 }
 0x2ae   : > { %v3214_v11 = vpack.c.bf16 %v3123_v19, %v3122_v59  ;;  %v2720_v63 = vadd.f32 %v5063_v33, %v2104_v39  ;;  %v2998_v29 = vadd.f32 %v7489_v56, %v2709_v12  ;;  %v3128_v24 = vmax.f32 %v3000_v35, 0.0  ;;  %v8413_v39 = vld [vmem:[#allocation75_spill] sm:$0xff] }
 0x2af   : > { %v2711_v45 = vpop.f32.mrf.mxu1  ;;  %v8414_v59 = vmax.f32 %v8413_v39, 0.0 }
 0x2b0   : > { %v3001_v34 = vadd.f32 %v7489_v56, %v2720_v63  ;;  %v2712_v2 = vadd.f32 %v2711_v45, %v2102_v50  ;;  %5192 = vmatprep.mubr.msk.bf16.mxu0 %vm2177_vm3, %v3214_v11  ;;  %v3126_v36 = vmax.f32 %v2998_v29, 0.0  ;;  %v8415_v11 = vmax.f32 %v6793_v40, 0.0 }
 0x2b1   : > { %v5066_v48 = vpop.f32.mrf.mxu1  ;;  %v2109_v50 = vmul.f32 %v7476_v7, %v8417_v31 }
 0x2b2   : > { %5193 = vmatmul.mubr.msk.bf16.gmra.mxu0 %vm2177_vm3, %v3215_v25  ;;  %v3129_v32 = vmax.f32 %v3001_v34, 0.0  ;;  %v2999_v42 = vadd.f32 %v7489_v56, %v2712_v2  ;;  %v2733_v61 = vadd.f32 %v5066_v48, %v2107_v21  ;;  %v2106_v25 = vmul.f32 %v7476_v7, %v8414_v59 }
 0x2b3   : > { %v2724_v43 = vpop.f32.mrf.mxu1  ;;  %v2111_v35 = vmul.f32 %v7476_v7, %v8415_v11  ;;  %v8418_v21 = vmax.f32 %v6797_v52, 0.0  ;;  %v8425_v11 = vld [vmem:[#allocation81_spill] sm:$0xff] }
 0x2b4   : > { %v3217_v18 = vpack.c.bf16 %v3129_v32, %v3128_v24  ;;  %v3127_v57 = vmax.f32 %v2999_v42, 0.0  ;;  %v2725_v41 = vadd.f32 %v2724_v43, %v2105_v28  ;;  %v3004_v38 = vadd.f32 %v7489_v56, %v2733_v61  ;;  %v8419_v43 = vld [vmem:[#allocation77_spill] sm:$0xff] }
 0x2b5   : > { %v5067_v53 = vpop.f32.mrf.mxu1  ;;  %v2112_v48 = vmul.f32 %v7476_v7, %v8418_v21  ;;  %v8420_v1 = vmax.f32 %v8419_v43, 0.0  ;;  %v8427_v21 = vld [vmem:[#allocation79_spill] sm:$0xff] }
 0x2b6   : > { %v3216_v6 = vpack.c.bf16 %v3127_v57, %v3126_v36  ;;  %v2736_v30 = vadd.f32 %v5067_v53, %v2108_v4  ;;  %v3002_v12 = vadd.f32 %v7489_v56, %v2725_v41  ;;  %v3132_v45 = vmax.f32 %v3004_v38, 0.0  ;;  %v8421_v41 = vld [vmem:[#allocation80_spill] sm:$0xff] }
 0x2b7   : > { %v2727_v19 = vpop.f32.mrf.mxu1  ;;  %v2110_v4 = vmul.f32 %v7476_v7, %v8420_v1  ;;  %v8422_v53 = vmax.f32 %v8421_v41, 0.0  ;;  %v8431_v1 = vld [vmem:[#allocation82_spill] sm:$0xff] }
 0x2b8   : > { %v3005_v8 = vadd.f32 %v7489_v56, %v2736_v30  ;;  %v2728_v33 = vadd.f32 %v2727_v19, %v2106_v25  ;;  %5196 = vmatprep.mubr.msk.bf16.mxu0 %vm2177_vm3, %v3216_v6  ;;  %v3130_v40 = vmax.f32 %v3002_v12, 0.0  ;;  %v8423_v30 = vld [vmem:[#allocation78_spill] sm:$0xff] }
 0x2b9   : > { %v5070_v63 = vpop.f32.mrf.mxu1  ;;  %v2115_v6 = vmul.f32 %v7476_v7, %v8422_v53  ;;  %v8424_v39 = vmax.f32 %v8423_v30, 0.0 }
 0x2ba   : > { %5197 = vmatmul.mubr.msk.bf16.gmra.mxu0 %vm2177_vm3, %v3217_v18  ;;  %v3133_v29 = vmax.f32 %v3005_v8, 0.0  ;;  %v3003_v34 = vadd.f32 %v7489_v56, %v2728_v33  ;;  %v2749_v2 = vadd.f32 %v5070_v63, %v2111_v35  ;;  %v8426_v35 = vmax.f32 %v8425_v11, 0.0 }
 0x2bb   : > { %v2740_v37 = vpop.f32.mrf.mxu1  ;;  %v2113_v59 = vmul.f32 %v7476_v7, %v8424_v39 }
 0x2bc   : > { %v3219_v54 = vpack.c.bf16 %v3133_v29, %v3132_v45  ;;  %v3131_v0 = vmax.f32 %v3003_v34, 0.0  ;;  %v2741_v28 = vadd.f32 %v2740_v37, %v2109_v50  ;;  %v3008_v42 = vadd.f32 %v7489_v56, %v2749_v2 }
 0x2bd   : > { %v5071_v24 = vpop.f32.mrf.mxu1  ;;  %v2116_v63 = vmul.f32 %v7476_v7, %v8426_v35  ;;  %v8435_v35 = vld [vmem:[#allocation83_spill] sm:$0xff] }
 0x2be   : > { %v3218_v32 = vpack.c.bf16 %v3131_v0, %v3130_v40  ;;  %v2752_v61 = vadd.f32 %v5071_v24, %v2112_v48  ;;  %v3006_v18 = vadd.f32 %v7489_v56, %v2741_v28  ;;  %v3136_v25 = vmax.f32 %v3008_v42, 0.0 }
 0x2bf   : > { %v2743_v36 = vpop.f32.mrf.mxu1  ;;  %v8428_v48 = vmax.f32 %v8427_v21, 0.0 }
 0x2c0   : > { %v3009_v52 = vadd.f32 %v7489_v56, %v2752_v61  ;;  %v2744_v57 = vadd.f32 %v2743_v36, %v2110_v4  ;;  %5200 = vmatprep.mubr.msk.bf16.mxu0 %vm2177_vm3, %v3218_v32  ;;  %v3134_v49 = vmax.f32 %v3006_v18, 0.0  ;;  %v8429_v32 = vld [vmem:[#allocation84_spill] sm:$0xff]  ;;  %v8432_v4 = vmax.f32 %v8431_v1, 0.0 }
 0x2c1   : > { %v5074_v38 = vpop.f32.mrf.mxu1  ;;  %v2114_v40 = vmul.f32 %v7476_v7, %v8428_v48  ;;  %v8430_v42 = vmax.f32 %v8429_v32, 0.0  ;;  %v8439_v48 = vld [vmem:[#allocation86_spill] sm:$0xff] }
 0x2c2   : > { %5201 = vmatmul.mubr.msk.bf16.gmra.mxu0 %vm2177_vm3, %v3219_v54  ;;  %v3137_v19 = vmax.f32 %v3009_v52, 0.0  ;;  %v3007_v12 = vadd.f32 %v7489_v56, %v2744_v57  ;;  %v2765_v8 = vadd.f32 %v5074_v38, %v2115_v6  ;;  %v2117_v36 = vmul.f32 %v7476_v7, %v8432_v4  ;;  %v8433_v6 = vld [vmem:[#allocation85_spill] sm:$0xff] }
 0x2c3   : > { %v2756_v33 = vpop.f32.mrf.mxu1  ;;  %v2119_v61 = vmul.f32 %v7476_v7, %v8430_v42  ;;  %v8434_v38 = vmax.f32 %v8433_v6, 0.0 }
 0x2c4   : > { %v3221_v31 = vpack.c.bf16 %v3137_v19, %v3136_v25  ;;  %v3135_v50 = vmax.f32 %v3007_v12, 0.0  ;;  %v2757_v45 = vadd.f32 %v2756_v33, %v2113_v59  ;;  %v3012_v2 = vadd.f32 %v7489_v56, %v2765_v8 }
 0x2c5   : > { %v5075_v29 = vpop.f32.mrf.mxu1  ;;  %v2120_v30 = vmul.f32 %v7476_v7, %v8434_v38  ;;  %v8443_v38 = vld [vmem:[#allocation87_spill] sm:$0xff] }
 0x2c6   : > { %v3220_v34 = vpack.c.bf16 %v3135_v50, %v3134_v49  ;;  %v2768_v37 = vadd.f32 %v5075_v29, %v2116_v63  ;;  %v3010_v0 = vadd.f32 %v7489_v56, %v2757_v45  ;;  %v3140_v18 = vmax.f32 %v3012_v2, 0.0 }
 0x2c7   : > { %v2759_v54 = vpop.f32.mrf.mxu1  ;;  %v8436_v63 = vmax.f32 %v8435_v35, 0.0 }
 0x2c8   : > { %v3013_v28 = vadd.f32 %v7489_v56, %v2768_v37  ;;  %v2760_v24 = vadd.f32 %v2759_v54, %v2114_v40  ;;  %5204 = vmatprep.mubr.msk.bf16.mxu0 %vm2177_vm3, %v3220_v34  ;;  %v3138_v39 = vmax.f32 %v3010_v0, 0.0  ;;  %v8437_v34 = vld [vmem:[#allocation88_spill] sm:$0xff]  ;;  %v8440_v40 = vmax.f32 %v8439_v48, 0.0 }
 0x2c9   : > { %v5078_v43 = vpop.f32.mrf.mxu1  ;;  %v2118_v49 = vmul.f32 %v7476_v7, %v8436_v63  ;;  %v8438_v2 = vmax.f32 %v8437_v34, 0.0  ;;  %v8447_v63 = vld [vmem:[#allocation90_spill] sm:$0xff] }
 0x2ca   : > { %5205 = vmatmul.mubr.msk.bf16.gmra.mxu0 %vm2177_vm3, %v3221_v31  ;;  %v3141_v52 = vmax.f32 %v3013_v28, 0.0  ;;  %v3011_v57 = vadd.f32 %v7489_v56, %v2760_v24  ;;  %v2781_v41 = vadd.f32 %v5078_v43, %v2119_v61  ;;  %v2121_v54 = vmul.f32 %v7476_v7, %v8440_v40  ;;  %v8441_v61 = vld [vmem:[#allocation89_spill] sm:$0xff] }
 0x2cb   : > { %v2772_v53 = vpop.f32.mrf.mxu1  ;;  %v2123_v37 = vmul.f32 %v7476_v7, %v8438_v2  ;;  %v8442_v43 = vmax.f32 %v8441_v61, 0.0 }
 0x2cc   : > { %v3223_v59 = vpack.c.bf16 %v3141_v52, %v3140_v18  ;;  %v3139_v25 = vmax.f32 %v3011_v57, 0.0  ;;  %v2773_v19 = vadd.f32 %v2772_v53, %v2117_v36  ;;  %v3016_v33 = vadd.f32 %v7489_v56, %v2781_v41 }
 0x2cd   : > { %v5079_v12 = vpop.f32.mrf.mxu1  ;;  %v2124_v1 = vmul.f32 %v7476_v7, %v8442_v43  ;;  %v8451_v43 = vld [vmem:[#allocation91_spill] sm:$0xff] }
 0x2ce   : > { %v3222_v8 = vpack.c.bf16 %v3139_v25, %v3138_v39  ;;  %v2784_v11 = vadd.f32 %v5079_v12, %v2120_v30  ;;  %v3014_v50 = vadd.f32 %v7489_v56, %v2773_v19  ;;  %v3144_v0 = vmax.f32 %v3016_v33, 0.0 }
 0x2cf   : > { %v2775_v31 = vpop.f32.mrf.mxu1  ;;  %v8444_v30 = vmax.f32 %v8443_v38, 0.0 }
 0x2d0   : > { %v3017_v45 = vadd.f32 %v7489_v56, %v2784_v11  ;;  %v2776_v29 = vadd.f32 %v2775_v31, %v2118_v49  ;;  %5208 = vmatprep.mubr.msk.bf16.mxu0 %vm2177_vm3, %v3222_v8  ;;  %v3142_v4 = vmax.f32 %v3014_v50, 0.0  ;;  %v8445_v8 = vld [vmem:[#allocation92_spill] sm:$0xff]  ;;  %v8448_v49 = vmax.f32 %v8447_v63, 0.0 }
 0x2d1   : > { %v5082_v21 = vpop.f32.mrf.mxu1  ;;  %v2122_v39 = vmul.f32 %v7476_v7, %v8444_v30  ;;  %v8446_v33 = vmax.f32 %v8445_v8, 0.0 }
 0x2d2   : > { %5209 = vmatmul.mubr.msk.bf16.gmra.mxu0 %vm2177_vm3, %v3223_v59  ;;  %v3145_v28 = vmax.f32 %v3017_v45, 0.0  ;;  %v3015_v24 = vadd.f32 %v7489_v56, %v2776_v29  ;;  %v2797_v32 = vadd.f32 %v5082_v21, %v2123_v37  ;;  %v2125_v31 = vmul.f32 %v7476_v7, %v8448_v49  ;;  %v8449_v37 = vld [vmem:[#allocation93_spill] sm:$0xff]  ;;  %v7630_v49 = vld [vmem:[%s7952_s7] ss:$0 sm:$0xff] }
 0x2d3   : > { %v2788_v42 = vpop.f32.mrf.mxu1  ;;  %v2127_v11 = vmul.f32 %v7476_v7, %v8446_v33  ;;  %v8450_v21 = vmax.f32 %v8449_v37, 0.0 }
 0x2d4   : > { %v3225_v36 = vpack.c.bf16 %v3145_v28, %v3144_v0  ;;  %v3143_v18 = vmax.f32 %v3015_v24, 0.0  ;;  %v2789_v52 = vadd.f32 %v2788_v42, %v2121_v54  ;;  %v3020_v53 = vadd.f32 %v7489_v56, %v2797_v32 }
 0x2d5   : > { %v5083_v57 = vpop.f32.mrf.mxu1  ;;  %v2128_v48 = vmul.f32 %v7476_v7, %v8450_v21 }
 0x2d6   : > { %v3224_v41 = vpack.c.bf16 %v3143_v18, %v3142_v4  ;;  %v2800_v6 = vadd.f32 %v5083_v57, %v2124_v1  ;;  %v3018_v25 = vadd.f32 %v7489_v56, %v2789_v52  ;;  %v3148_v50 = vmax.f32 %v3020_v53, 0.0 }
 0x2d7   : > { %v2791_v59 = vpop.f32.mrf.mxu1  ;;  %v8452_v1 = vmax.f32 %v8451_v43, 0.0 }
 0x2d8   : > { %v3021_v19 = vadd.f32 %v7489_v56, %v2800_v6  ;;  %v2792_v12 = vadd.f32 %v2791_v59, %v2122_v39  ;;  %5212 = vmatprep.mubr.msk.bf16.mxu0 %vm2177_vm3, %v3224_v41  ;;  %v3146_v40 = vmax.f32 %v3018_v25, 0.0  ;;  %v8453_v41 = vmax.f32 %v6987_v17, 0.0 }
 0x2d9   : > { %v5086_v35 = vpop.f32.mrf.mxu1  ;;  %v2126_v4 = vmul.f32 %v7476_v7, %v8452_v1 }
 0x2da   : > { %5213 = vmatmul.mubr.msk.bf16.gmra.mxu0 %vm2177_vm3, %v3225_v36  ;;  %v3149_v45 = vmax.f32 %v3021_v19, 0.0  ;;  %v3019_v29 = vadd.f32 %v7489_v56, %v2792_v12  ;;  %v2813_v34 = vadd.f32 %v5086_v35, %v2127_v11  ;;  %v2131_v53 = vmul.f32 %v7476_v7, %v8453_v41  ;;  %v8454_v19 = vld [vmem:[#allocation94_spill] sm:$0xff] }
 0x2db   : > { %v2804_v2 = vpop.f32.mrf.mxu1  ;;  %v8455_v12 = vmax.f32 %v8454_v19, 0.0 }
 0x2dc   : > { %v3227_v54 = vpack.c.bf16 %v3149_v45, %v3148_v50  ;;  %v3147_v0 = vmax.f32 %v3019_v29, 0.0  ;;  %v2805_v28 = vadd.f32 %v2804_v2, %v2125_v31  ;;  %v3024_v42 = vadd.f32 %v7489_v56, %v2813_v34 }
 0x2dd   : > { %v5087_v24 = vpop.f32.mrf.mxu1  ;;  %v2129_v8 = vmul.f32 %v7476_v7, %v8455_v12  ;;  %v8456_v31 = vmax.f32 %v6991_v44, 0.0  ;;  %v8458_v44 = vmax.f32 %v7022_v13, 0.0 }
 0x2de   : > { %v3226_v32 = vpack.c.bf16 %v3147_v0, %v3146_v40  ;;  %v2816_v61 = vadd.f32 %v5087_v24, %v2128_v48  ;;  %v3022_v18 = vadd.f32 %v7489_v56, %v2805_v28  ;;  %v3152_v30 = vmax.f32 %v3024_v42, 0.0 }
 0x2df   : > { %v2807_v36 = vpop.f32.mrf.mxu1  ;;  %v2132_v50 = vmul.f32 %v7476_v7, %v8456_v31  ;;  %v8457_v40 = vmax.f32 %v6952_v46, 0.0 }
 0x2e0   : > { %v3025_v52 = vadd.f32 %v7489_v56, %v2816_v61  ;;  %v2808_v57 = vadd.f32 %v2807_v36, %v2126_v4  ;;  %5216 = vmatprep.mubr.msk.bf16.mxu0 %vm2177_vm3, %v3226_v32  ;;  %v3150_v35 = vmax.f32 %v3022_v18, 0.0  ;;  %v2135_v32 = vmul.f32 %v7476_v7, %v8458_v44 }
 0x2e1   : > { %v5090_v6 = vpop.f32.mrf.mxu1  ;;  %v5122_v38 = vpop.f32.mrf.mxu0 }
 0x2e2   : > { %5217 = vmatmul.mubr.msk.bf16.gmra.mxu0 %vm2177_vm3, %v3227_v54  ;;  %v3153_v39 = vmax.f32 %v3025_v52, 0.0  ;;  %v3023_v59 = vadd.f32 %v7489_v56, %v2808_v57  ;;  %v2829_v25 = vadd.f32 %v5090_v6, %v2131_v53  ;;  %v2130_v54 = vmul.f32 %v7476_v7, %v8457_v40 }
 0x2e3   : > { %v2820_v33 = vpop.f32.mrf.mxu1  ;;  %v3507_v11 = vpop.f32.mrf.mxu0  ;;  %v3516_v0 = vadd.f32 %v5122_v38, %v7630_v49  ;;  %v8459_v38 = vmax.f32 %v6995_v55, 0.0  ;;  %v8461_v55 = vld [vmem:[#allocation64_spill] sm:$0xff] }
 0x2e4   : > { %v3229_v63 = vpack.c.bf16 %v3153_v39, %v3152_v30  ;;  %v3151_v17 = vmax.f32 %v3023_v59, 0.0  ;;  %v3028_v45 = vadd.f32 %v7489_v56, %v2829_v25  ;;  %v2821_v29 = vadd.f32 %v2820_v33, %v2129_v8 }
 0x2e5   : > { %v3508_v34 = vadd.f32 %v7630_v49, %v3507_v11  ;;  %v5091_v2 = vpop.f32.mrf.mxu1  ;;  %v5123_v37 = vpop.f32.mrf.mxu0  ;;  %v4020_v6 = vmax.f32 %v3516_v0, 0.0  ;;  %v2133_v30 = vmul.f32 %v7476_v7, %v8459_v38  ;;  %v8460_v25 = vmax.f32 %v7026_v58, 0.0 }
 0x2e6   : > { %v3228_v21 = vpack.c.bf16 %v3151_v17, %v3150_v35  ;;  %v2832_v48 = vadd.f32 %v5091_v2, %v2132_v50  ;;  %v3026_v42 = vadd.f32 %v7489_v56, %v2821_v29  ;;  %v3156_v46 = vmax.f32 %v3028_v45, 0.0 }
 0x2e7   : > { %v2823_v28 = vpop.f32.mrf.mxu1  ;;  %v3510_v24 = vpop.f32.mrf.mxu0  ;;  %v4018_v4 = vmax.f32 %v3508_v34, 0.0  ;;  %v3519_v36 = vadd.f32 %v5123_v37, %v7630_v49  ;;  %v2136_v19 = vmul.f32 %v7476_v7, %v8460_v25  ;;  %v8462_v45 = vmax.f32 %v8461_v55, 0.0 }
 0x2e8   : > { %v3029_v61 = vadd.f32 %v7489_v56, %v2832_v48  ;;  %v2824_v43 = vadd.f32 %v2823_v28, %v2130_v54  ;;  %v3511_v1 = vadd.f32 %v7630_v49, %v3510_v24  ;;  %5220 = vmatprep.mubr.msk.bf16.mxu0 %vm2177_vm3, %v3228_v21  ;;  %v3154_v12 = vmax.f32 %v3026_v42, 0.0 }
 0x2e9   : > { %v5094_v18 = vpop.f32.mrf.mxu1  ;;  %v5126_v52 = vpop.f32.mrf.mxu0  ;;  %v2134_v29 = vmul.f32 %v7476_v7, %v8462_v45  ;;  %v4021_v34 = vmax.f32 %v3519_v36, 0.0  ;;  %v8464_v36 = vmax.f32 %v7038_v26, 0.0 }
 0x2ea   : > { %5221 = vmatmul.mubr.msk.bf16.gmra.mxu0 %vm2177_vm3, %v3229_v63  ;;  %v3157_v13 = vmax.f32 %v3029_v61, 0.0  ;;  %v3027_v57 = vadd.f32 %v7489_v56, %v2824_v43  ;;  %v4019_v41 = vmax.f32 %v3511_v1, 0.0  ;;  %v2845_v53 = vadd.f32 %v5094_v18, %v2135_v32 }
 0x2eb   : > { %v2836_v39 = vpop.f32.mrf.mxu1  ;;  %v3523_v59 = vpop.f32.mrf.mxu0  ;;  %v3532_v21 = vadd.f32 %v5126_v52, %v7630_v49  ;;  %v8463_v43 = vmax.f32 %v7086_v14, 0.0  ;;  %v2137_v18 = vmul.f32 %v7476_v7, %v8464_v36 }
 0x2ec   : > { %v3231_v8 = vpack.c.bf16 %v3157_v13, %v3156_v46  ;;  %v3155_v33 = vmax.f32 %v3027_v57, 0.0  ;;  %v4146_v11 = vadd.f32 %v4019_v41, %v4018_v4  ;;  %v3032_v35 = vadd.f32 %v7489_v56, %v2845_v53 }
 0x2ed   : > { %v2837_v63 = vadd.f32 %v2836_v39, %v2133_v30  ;;  %v3524_v17 = vadd.f32 %v7630_v49, %v3523_v59  ;;  %v5095_v31 = vpop.f32.mrf.mxu1  ;;  %v5127_v50 = vpop.f32.mrf.mxu0  ;;  %v2139_v1 = vmul.f32 %v7476_v7, %v8463_v43  ;;  %v4024_v53 = vmax.f32 %v3532_v21, 0.0 }
 0x2ee   : > { %v3230_v2 = vpack.c.bf16 %v3155_v33, %v3154_v12  ;;  %v4147_v58 = vadd.f32 %v4146_v11, %v4020_v6  ;;  %v2848_v37 = vadd.f32 %v5095_v31, %v2136_v19  ;;  %v3160_v42 = vmax.f32 %v3032_v35, 0.0 }
 0x2ef   : > { %v3030_v48 = vadd.f32 %v7489_v56, %v2837_v63  ;;  %v4022_v40 = vmax.f32 %v3524_v17, 0.0  ;;  %v2839_v54 = vpop.f32.mrf.mxu1  ;;  %v3526_v0 = vpop.f32.mrf.mxu0  ;;  %v3535_v61 = vadd.f32 %v5127_v50, %v7630_v49  ;;  %v8465_v39 = vmax.f32 %v7090_v10, 0.0 }
 0x2f0   : > { %v4148_v28 = vadd.f32 %v4147_v58, %v4021_v34  ;;  %v3033_v24 = vadd.f32 %v7489_v56, %v2848_v37  ;;  %v2840_v44 = vadd.f32 %v2839_v54, %v2134_v29  ;;  %v3527_v32 = vadd.f32 %v7630_v49, %v3526_v0  ;;  %5224 = vmatprep.mubr.msk.bf16.mxu0 %vm2177_vm3, %v3230_v2 }
 0x2f1   : > { %v5098_v46 = vpop.f32.mrf.mxu1  ;;  %v5130_v4 = vpop.f32.mrf.mxu0  ;;  %v3158_v6 = vmax.f32 %v3030_v48, 0.0  ;;  %v2140_v59 = vmul.f32 %v7476_v7, %v8465_v39  ;;  %v8466_v63 = vmax.f32 %v7042_v3, 0.0  ;;  %v4025_v31 = vmax.f32 %v3535_v61, 0.0 }
 0x2f2   : > { %5225 = vmatmul.mubr.msk.bf16.gmra.mxu0 %vm2177_vm3, %v3231_v8  ;;  %v4149_v52 = vadd.f32 %v4148_v28, %v4022_v40  ;;  %v3161_v13 = vmax.f32 %v3033_v24, 0.0  ;;  %v3031_v57 = vadd.f32 %v7489_v56, %v2840_v44  ;;  %v4023_v41 = vmax.f32 %v3527_v32, 0.0 }
 0x2f3   : > { %v2861_v38 = vadd.f32 %v5098_v46, %v2139_v1  ;;  %v2852_v30 = vpop.f32.mrf.mxu1  ;;  %v3539_v14 = vpop.f32.mrf.mxu0  ;;  %v2138_v17 = vmul.f32 %v7476_v7, %v8466_v63  ;;  %v8467_v2 = vmax.f32 %v7123_v47, 0.0  ;;  %v3548_v54 = vadd.f32 %v5130_v4, %v7630_v49 }
 0x2f4   : > { %v3233_v25 = vpack.c.bf16 %v3161_v13, %v3160_v42  ;;  %v3159_v19 = vmax.f32 %v3031_v57, 0.0  ;;  %v4150_v12 = vadd.f32 %v4149_v52, %v4023_v41  ;;  %v2853_v26 = vadd.f32 %v2852_v30, %v2137_v18 }
 0x2f5   : > { %v3036_v8 = vadd.f32 %v7489_v56, %v2861_v38  ;;  %v3540_v33 = vadd.f32 %v7630_v49, %v3539_v14  ;;  %v5099_v11 = vpop.f32.mrf.mxu1  ;;  %v5131_v35 = vpop.f32.mrf.mxu0  ;;  %v2143_v58 = vmul.f32 %v7476_v7, %v8467_v2  ;;  %v8468_v47 = vmax.f32 %v7094_v5, 0.0 }
 0x2f6   : > { %v3232_v50 = vpack.c.bf16 %v3159_v19, %v3158_v6  ;;  %v4151_v55 = vadd.f32 %v4150_v12, %v4024_v53  ;;  %v2864_v10 = vadd.f32 %v5099_v11, %v2140_v59  ;;  %v3034_v45 = vadd.f32 %v7489_v56, %v2853_v26  ;;  %v8470_v19 = vld [vmem:[#allocation10_spill] sm:$0xff] }
 0x2f7   : > { %v2855_v29 = vpop.f32.mrf.mxu1  ;;  %v3542_v34 = vpop.f32.mrf.mxu0  ;;  %v4026_v37 = vmax.f32 %v3540_v33, 0.0  ;;  %v3164_v3 = vmax.f32 %v3036_v8, 0.0  ;;  %v2141_v44 = vmul.f32 %v7476_v7, %v8468_v47  ;;  %v3551_v1 = vadd.f32 %v5131_v35, %v7630_v49 }
 0x2f8   : > { %v4152_v21 = vadd.f32 %v4151_v55, %v4025_v31  ;;  %v3037_v48 = vadd.f32 %v7489_v56, %v2864_v10  ;;  %v2856_v40 = vadd.f32 %v2855_v29, %v2138_v17  ;;  %5228 = vmatprep.mubr.msk.bf16.mxu0 %vm2177_vm3, %v3232_v50  ;;  %v3543_v0 = vadd.f32 %v7630_v49, %v3542_v34 }
 0x2f9   : > { %v5102_v28 = vpop.f32.mrf.mxu1  ;;  %v8469_v18 = vmax.f32 %v7127_v60, 0.0  ;;  %v3162_v13 = vmax.f32 %v3034_v45, 0.0  ;;  %v4028_v53 = vmax.f32 %v3548_v54, 0.0  ;;  %v8471_v12 = vmax.f32 %v8470_v19, 0.0 }
 0x2fa   : > { %v5134_v24 = vpop.f32.mrf.mxu0  ;;  %5229 = vmatmul.mubr.msk.bf16.gmra.mxu0 %vm2177_vm3, %v3233_v25  ;;  %v4153_v32 = vadd.f32 %v4152_v21, %v4026_v37  ;;  %v3165_v42 = vmax.f32 %v3037_v48, 0.0  ;;  %v3035_v61 = vadd.f32 %v7489_v56, %v2856_v40  ;;  %v2877_v43 = vadd.f32 %v5102_v28, %v2143_v58 }
 0x2fb   : > { %v4027_v46 = vmax.f32 %v3543_v0, 0.0  ;;  %v2868_v36 = vpop.f32.mrf.mxu1  ;;  %v2144_v52 = vmul.f32 %v7476_v7, %v8469_v18  ;;  %v2142_v60 = vmul.f32 %v7476_v7, %v8471_v12  ;;  %v4029_v26 = vmax.f32 %v3551_v1, 0.0 }
 0x2fc   : > { %v3555_v4 = vpop.f32.mrf.mxu0  ;;  %v3235_v57 = vpack.c.bf16 %v3165_v42, %v3164_v3  ;;  %v3163_v41 = vmax.f32 %v3035_v61, 0.0  ;;  %v2869_v5 = vadd.f32 %v2868_v36, %v2141_v44  ;;  %v3040_v38 = vadd.f32 %v7489_v56, %v2877_v43 }
 0x2fd   : > { %v4154_v6 = vadd.f32 %v4153_v32, %v4027_v46  ;;  %v3556_v30 = vadd.f32 %v7630_v49, %v3555_v4  ;;  %v5103_v14 = vpop.f32.mrf.mxu1  ;;  %v2147_v35 = vmul.f32 %v7476_v7, %v1940_v27  ;;  %v8472_v63 = vmax.f32 %v7139_v62, 0.0 }
 0x2fe   : > { %v5135_v39 = vpop.f32.mrf.mxu0  ;;  %v3234_v59 = vpack.c.bf16 %v3163_v41, %v3162_v13  ;;  %v2880_v25 = vadd.f32 %v5103_v14, %v2144_v52  ;;  %v3038_v31 = vadd.f32 %v7489_v56, %v2869_v5  ;;  %v3168_v45 = vmax.f32 %v3040_v38, 0.0 }
 0x2ff   : > { %v4155_v8 = vadd.f32 %v4154_v6, %v4028_v53  ;;  %v2871_v33 = vpop.f32.mrf.mxu1  ;;  %v2145_v17 = vmul.f32 %v7476_v7, %v8472_v63  ;;  %v3564_v29 = vadd.f32 %v5134_v24, %v7630_v49  ;;  %v4030_v34 = vmax.f32 %v3556_v30, 0.0 }
 0x300   : > { %v3558_v11 = vpop.f32.mrf.mxu0  ;;  %v3041_v50 = vadd.f32 %v7489_v56, %v2880_v25  ;;  %v2872_v55 = vadd.f32 %v2871_v33, %v2142_v60  ;;  %5232 = vmatprep.mubr.msk.bf16.mxu0 %vm2177_vm3, %v3234_v59  ;;  %v3567_v40 = vadd.f32 %v5135_v39, %v7630_v49  ;;  %v8473_v0 = vmax.f32 %v7186_v23, 0.0 }
 0x301   : > { %v3559_v10 = vadd.f32 %v7630_v49, %v3558_v11  ;;  %v4156_v9 = vadd.f32 %v4155_v8, %v4029_v26  ;;  %v5106_v2 = vpop.f32.mrf.mxu1  ;;  %v3166_v24 = vmax.f32 %v3038_v31, 0.0  ;;  %v4032_v42 = vmax.f32 %v3564_v29, 0.0 }
 0x302   : > { %v5138_v27 = vpop.f32.mrf.mxu0  ;;  %5233 = vmatmul.mubr.msk.bf16.gmra.mxu0 %vm2177_vm3, %v3235_v57  ;;  %v3169_v62 = vmax.f32 %v3041_v50, 0.0  ;;  %v3039_v58 = vadd.f32 %v7489_v56, %v2872_v55  ;;  %v2893_v21 = vadd.f32 %v5106_v2, %v2147_v35  ;;  %v2148_v28 = vmul.f32 %v7476_v7, %v8473_v0 }
 0x303   : > { %v4031_v37 = vmax.f32 %v3559_v10, 0.0  ;;  %v4157_v48 = vadd.f32 %v4156_v9, %v4030_v34  ;;  %v2884_v3 = vpop.f32.mrf.mxu1  ;;  %v8474_v52 = vmax.f32 %v7143_v22, 0.0  ;;  %v4033_v13 = vmax.f32 %v3567_v40, 0.0 }
 0x304   : > { %v3571_v54 = vpop.f32.mrf.mxu0  ;;  %v3237_v47 = vpack.c.bf16 %v3169_v62, %v3168_v45  ;;  %v3167_v44 = vmax.f32 %v3039_v58, 0.0  ;;  %v2885_v32 = vadd.f32 %v2884_v3, %v2145_v17  ;;  %v3044_v43 = vadd.f32 %v7489_v56, %v2893_v21 }
 0x305   : > { %v4158_v61 = vadd.f32 %v4157_v48, %v4031_v37  ;;  %v3572_v1 = vadd.f32 %v7630_v49, %v3571_v54  ;;  %v5107_v46 = vpop.f32.mrf.mxu1  ;;  %v2146_v23 = vmul.f32 %v7476_v7, %v8474_v52  ;;  %v3580_v41 = vadd.f32 %v5138_v27, %v7630_v49 }
 0x306   : > { %v5139_v36 = vpop.f32.mrf.mxu0  ;;  %v3236_v4 = vpack.c.bf16 %v3167_v44, %v3166_v24  ;;  %v2896_v18 = vadd.f32 %v5107_v46, %v2148_v28  ;;  %v8475_v6 = vmax.f32 %v7227_v15, 0.0  ;;  %v3042_v30 = vadd.f32 %v7489_v56, %v2885_v32 }
 0x307   : > { %v4159_v57 = vadd.f32 %v4158_v61, %v4032_v42  ;;  %v2887_v5 = vpop.f32.mrf.mxu1  ;;  %v3172_v25 = vmax.f32 %v3044_v43, 0.0  ;;  %v4034_v19 = vmax.f32 %v3572_v1, 0.0  ;;  %v3583_v12 = vadd.f32 %v5139_v36, %v7630_v49 }
 0x308   : > { %v3574_v53 = vpop.f32.mrf.mxu0  ;;  %v2151_v38 = vmul.f32 %v7476_v7, %v8475_v6  ;;  %v3045_v14 = vadd.f32 %v7489_v56, %v2896_v18  ;;  %v2888_v39 = vadd.f32 %v2887_v5, %v2146_v23  ;;  %5236 = vmatprep.mubr.msk.bf16.mxu0 %vm2177_vm3, %v3236_v4  ;;  %v4036_v35 = vmax.f32 %v3580_v41, 0.0 }
 0x309   : > { %v3575_v59 = vadd.f32 %v7630_v49, %v3574_v53  ;;  %v7736_v22 = vadd.f32 %v4159_v57, %v4033_v13  ;;  %v5110_v60 = vpop.f32.mrf.mxu1  ;;  %v8476_v63 = vmax.f32 %v7190_v51, 0.0  ;;  %v8477_v55 = vmax.f32 %v7231_v20, 0.0 }
 0x30a   : > { %v5142_v26 = vpop.f32.mrf.mxu0  ;;  %5237 = vmatmul.mubr.msk.bf16.gmra.mxu0 %vm2177_vm3, %v3237_v47  ;;  %v3173_v15 = vmax.f32 %v3045_v14, 0.0  ;;  %v3043_v8 = vadd.f32 %v7489_v56, %v2888_v39  ;;  %v2909_v11 = vadd.f32 %v5110_v60, %v2151_v38  ;;  %v3170_v45 = vmax.f32 %v3042_v30, 0.0 }
 0x30b   : > { %v4035_v33 = vmax.f32 %v3575_v59, 0.0  ;;  %v2149_v17 = vmul.f32 %v7476_v7, %v8476_v63  ;;  %v2900_v31 = vpop.f32.mrf.mxu1  ;;  %v2152_v10 = vmul.f32 %v7476_v7, %v8477_v55  ;;  %v8478_v51 = vmax.f32 %v7194_v16, 0.0 }
 0x30c   : > { %v3587_v50 = vpop.f32.mrf.mxu0  ;;  %v3239_v29 = vpack.c.bf16 %v3173_v15, %v3172_v25  ;;  %v3171_v34 = vmax.f32 %v3043_v8, 0.0  ;;  %v3048_v2 = vadd.f32 %v7489_v56, %v2909_v11  ;;  %v4037_v48 = vmax.f32 %v3583_v12, 0.0 }
 0x30d   : > { %v4167_v9 = vadd.f32 %v4035_v33, %v4034_v19  ;;  %v2901_v27 = vadd.f32 %v2900_v31, %v2149_v17  ;;  %v3588_v62 = vadd.f32 %v7630_v49, %v3587_v50  ;;  %v5111_v58 = vpop.f32.mrf.mxu1  ;;  %v2150_v21 = vmul.f32 %v7476_v7, %v8478_v51 }
 0x30e   : > { %v5143_v37 = vpop.f32.mrf.mxu0  ;;  %v3238_v40 = vpack.c.bf16 %v3171_v34, %v3170_v45  ;;  %v2912_v3 = vadd.f32 %v5111_v58, %v2152_v10  ;;  %v3596_v54 = vadd.f32 %v5142_v26, %v7630_v49  ;;  %v3176_v16 = vmax.f32 %v3048_v2, 0.0 }
 0x30f   : > { %v4168_v20 = vadd.f32 %v4167_v9, %v4036_v35  ;;  %v3046_v0 = vadd.f32 %v7489_v56, %v2901_v27  ;;  %v4038_v28 = vmax.f32 %v3588_v62, 0.0  ;;  %v2903_v24 = vpop.f32.mrf.mxu1  ;;  %v3599_v7 = vadd.f32 %v5143_v37, %v7630_v49 }
 0x310   : > { %v3590_v47 = vpop.f32.mrf.mxu0  ;;  %v3049_v32 = vadd.f32 %v7489_v56, %v2912_v3  ;;  %v2904_v42 = vadd.f32 %v2903_v24, %v2150_v21  ;;  %5240 = vmatprep.mubr.msk.bf16.mxu0 %vm2177_vm3, %v3238_v40  ;;  %v4040_v18 = vmax.f32 %v3596_v54, 0.0  ;;  %v4161_v31 = vrot.slane %v7736_v22, 4 }
 0x311   : > { %v4169_v44 = vadd.f32 %v4168_v20, %v4037_v48  ;;  %v3591_v61 = vadd.f32 %v7630_v49, %v3590_v47  ;;  %v3174_v52 = vmax.f32 %v3046_v0, 0.0  ;;  %v4041_v6 = vmax.f32 %v3599_v7, 0.0 }
 0x312   : > { %v5146_v43 = vpop.f32.mrf.mxu0  ;;  %5241 = vmatmul.mubr.msk.bf16.gmra.mxu0 %vm2177_vm3, %v3239_v29  ;;  %v3177_v46 = vmax.f32 %v3049_v32, 0.0  ;;  %v3047_v36 = vadd.f32 %v7489_v56, %v2904_v42  ;;  %v4162_v62 = vadd.f32 %v4161_v31, %v7736_v22 }
 0x313   : > { %v4170_v1 = vadd.f32 %v4169_v44, %v4038_v28  ;;  %v4039_v4 = vmax.f32 %v3591_v61, 0.0  ;;  %v3612_v39 = vadd.f32 %v5146_v43, %v7630_v49 }
 0x314   : > { %v3603_v23 = vpop.f32.mrf.mxu0  ;;  %v3241_v13 = vpack.c.bf16 %v3177_v46, %v3176_v16  ;;  %v3175_v57 = vmax.f32 %v3047_v36, 0.0  ;;  %v4163_v3 = vrot.slane %v4162_v62, 2 }
 0x315   : > { %v4171_v41 = vadd.f32 %v4170_v1, %v4039_v4  ;;  %v3604_v5 = vadd.f32 %v7630_v49, %v3603_v23  ;;  %v4044_v8 = vmax.f32 %v3612_v39, 0.0 }
 0x316   : > { %v5147_v53 = vpop.f32.mrf.mxu0  ;;  %v3240_v38 = vpack.c.bf16 %v3175_v57, %v3174_v52  ;;  %v4164_v61 = vadd.f32 %v4163_v3, %v4162_v62 }
 0x317   : > { %v4172_v30 = vadd.f32 %v4171_v41, %v4040_v18  ;;  %v4042_v59 = vmax.f32 %v3604_v5, 0.0  ;;  %v3615_v60 = vadd.f32 %v5147_v53, %v7630_v49 }
 0x318   : > { %v3606_v14 = vpop.f32.mrf.mxu0  ;;  %5244 = vmatprep.mubr.msk.bf16.mxu0 %vm2177_vm3, %v3240_v38  ;;  %v4165_v23 = vrot.slane %v4164_v61, 1 }
 0x319   : > { %v4173_v25 = vadd.f32 %v4172_v30, %v4041_v6  ;;  %v3607_v56 = vadd.f32 %v7630_v49, %v3606_v14  ;;  %v4045_v63 = vmax.f32 %v3615_v60, 0.0 }
 0x31a   : > { %v5150_v19 = vpop.f32.mrf.mxu0  ;;  %5245 = vmatmul.mubr.msk.bf16.gmra.mxu0 %vm2177_vm3, %v3241_v13 }
 0x31b   : > { %v4174_v12 = vadd.f32 %v4173_v25, %v4042_v59  ;;  %v4043_v26 = vmax.f32 %v3607_v56, 0.0  ;;  %v3628_v55 = vadd.f32 %v5150_v19, %v7630_v49  ;;  %v4166_v25 = vadd.f32 %v4165_v23, %v4164_v61 }
 0x31c   : > { %v3619_v15 = vpop.f32.mrf.mxu0 }
 0x31d   : > { %v4175_v33 = vadd.f32 %v4174_v12, %v4043_v26  ;;  %v3620_v11 = vadd.f32 %v7630_v49, %v3619_v15  ;;  %v4048_v37 = vmax.f32 %v3628_v55, 0.0 }
 0x31e   : > { %v5151_v35 = vpop.f32.mrf.mxu0 }
 0x31f   : > { %v4176_v17 = vadd.f32 %v4175_v33, %v4044_v8  ;;  %v4046_v10 = vmax.f32 %v3620_v11, 0.0  ;;  %v3631_v2 = vadd.f32 %v5151_v35, %v7630_v49 }
 0x320   : > { %v3622_v50 = vpop.f32.mrf.mxu0 }
 0x321   : > { %v4177_v45 = vadd.f32 %v4176_v17, %v4045_v63  ;;  %v3623_v29 = vadd.f32 %v7630_v49, %v3622_v50  ;;  %v4049_v48 = vmax.f32 %v3631_v2, 0.0 }
 0x322   : > { %v5154_v34 = vpop.f32.mrf.mxu0 }
 0x323   : > { %v4178_v9 = vadd.f32 %v4177_v45, %v4046_v10  ;;  %v4047_v27 = vmax.f32 %v3623_v29, 0.0  ;;  %v3644_v28 = vadd.f32 %v5154_v34, %v7630_v49 }
 0x324   : > { %v3635_v58 = vpop.f32.mrf.mxu0 }
 0x325   : > { %v4179_v51 = vadd.f32 %v4178_v9, %v4047_v27  ;;  %v3636_v20 = vadd.f32 %v7630_v49, %v3635_v58  ;;  %v4052_v43 = vmax.f32 %v3644_v28, 0.0 }
 0x326   : > { %v5155_v21 = vpop.f32.mrf.mxu0 }
 0x327   : > { %v4180_v40 = vadd.f32 %v4179_v51, %v4048_v37  ;;  %v4050_v32 = vmax.f32 %v3636_v20, 0.0  ;;  %v3647_v22 = vadd.f32 %v5155_v21, %v7630_v49 }
 0x328   : > { %v3638_v54 = vpop.f32.mrf.mxu0 }
 0x329   : > { %v4181_v0 = vadd.f32 %v4180_v40, %v4049_v48  ;;  %v3639_v24 = vadd.f32 %v7630_v49, %v3638_v54  ;;  %v4053_v18 = vmax.f32 %v3647_v22, 0.0 }
 0x32a   : > { %v5158_v47 = vpop.f32.mrf.mxu0 }
 0x32b   : > { %v4182_v44 = vrot.slane %v4181_v0, 4  ;;  %v4051_v42 = vmax.f32 %v3639_v24, 0.0  ;;  %v3660_v13 = vadd.f32 %v5158_v47, %v7630_v49 }
 0x32c   : > { %v3651_v16 = vpop.f32.mrf.mxu0 }
 0x32d   : > { %v4183_v7 = vadd.f32 %v4182_v44, %v4181_v0  ;;  %v4188_v1 = vadd.f32 %v4051_v42, %v4050_v32  ;;  %v3652_v46 = vadd.f32 %v7630_v49, %v3651_v16  ;;  %v4056_v12 = vmax.f32 %v3660_v13, 0.0 }
 0x32e   : > { %v5159_v36 = vpop.f32.mrf.mxu0 }
 0x32f   : > { %v4184_v4 = vrot.slane %v4183_v7, 2  ;;  %v4189_v52 = vadd.f32 %v4188_v1, %v4052_v43  ;;  %v4054_v5 = vmax.f32 %v3652_v46, 0.0  ;;  %v3663_v39 = vadd.f32 %v5159_v36, %v7630_v49 }
 0x330   : > { %v3654_v57 = vpop.f32.mrf.mxu0 }
 0x331   : > { %v4185_v41 = vadd.f32 %v4184_v4, %v4183_v7  ;;  %v4190_v53 = vadd.f32 %v4189_v52, %v4053_v18  ;;  %v3655_v6 = vadd.f32 %v7630_v49, %v3654_v57  ;;  %v4057_v33 = vmax.f32 %v3663_v39, 0.0 }
 0x332   : > { %v5162_v38 = vpop.f32.mrf.mxu0 }
 0x333   : > { %v4186_v30 = vrot.slane %v4185_v41, 1  ;;  %v4191_v14 = vadd.f32 %v4190_v53, %v4054_v5  ;;  %v4055_v59 = vmax.f32 %v3655_v6, 0.0  ;;  %v3676_v63 = vadd.f32 %v5162_v38, %v7630_v49 }
 0x334   : > { %v3667_v56 = vpop.f32.mrf.mxu0 }
 0x335   : > { %v4187_v19 = vadd.f32 %v4186_v30, %v4185_v41  ;;  %v4192_v60 = vadd.f32 %v4191_v14, %v4055_v59  ;;  %v3668_v26 = vadd.f32 %v7630_v49, %v3667_v56  ;;  %v4060_v9 = vmax.f32 %v3676_v63, 0.0 }
 0x336   : > { %v5163_v15 = vpop.f32.mrf.mxu0 }
 0x337   : > { %v7782_v8 = vsel %vm1266_vm0, %v4166_v25, %v4187_v19  ;;  %v4193_v11 = vadd.f32 %v4192_v60, %v4056_v12  ;;  %v4058_v17 = vmax.f32 %v3668_v26, 0.0  ;;  %v3679_v45 = vadd.f32 %v5163_v15, %v7630_v49 }
 0x338   : > { %v3670_v35 = vpop.f32.mrf.mxu0 }
 0x339   : > { %v4194_v31 = vadd.f32 %v4193_v11, %v4057_v33  ;;  %v3671_v50 = vadd.f32 %v7630_v49, %v3670_v35  ;;  %v4061_v58 = vmax.f32 %v3679_v45, 0.0 }
 0x33a   : > { %v5166_v55 = vpop.f32.mrf.mxu0 }
 0x33b   : > { %v4195_v10 = vadd.f32 %v4194_v31, %v4058_v17  ;;  %v4059_v29 = vmax.f32 %v3671_v50, 0.0  ;;  %v3692_v21 = vadd.f32 %v5166_v55, %v7630_v49 }
 0x33c   : > { %v3683_v34 = vpop.f32.mrf.mxu0 }
 0x33d   : > { %v4196_v2 = vadd.f32 %v4195_v10, %v4059_v29  ;;  %v3684_v27 = vadd.f32 %v7630_v49, %v3683_v34  ;;  %v4064_v47 = vmax.f32 %v3692_v21, 0.0 }
 0x33e   : > { %v5167_v62 = vpop.f32.mrf.mxu0 }
 0x33f   : > { %v4197_v37 = vadd.f32 %v4196_v2, %v4060_v9  ;;  %v4062_v48 = vmax.f32 %v3684_v27, 0.0  ;;  %v3695_v0 = vadd.f32 %v5167_v62, %v7630_v49 }
 0x340   : > { %v3686_v51 = vpop.f32.mrf.mxu0 }
 0x341   : > { %v4198_v40 = vadd.f32 %v4197_v37, %v4061_v58  ;;  %v3687_v20 = vadd.f32 %v7630_v49, %v3686_v51  ;;  %v4065_v22 = vmax.f32 %v3695_v0, 0.0 }
 0x342   : > { %v5170_v3 = vpop.f32.mrf.mxu0 }
 0x343   : > { %v4199_v54 = vadd.f32 %v4198_v40, %v4062_v48  ;;  %v4063_v28 = vmax.f32 %v3687_v20, 0.0  ;;  %v3708_v43 = vadd.f32 %v5170_v3, %v7630_v49 }
 0x344   : > { %v3699_v24 = vpop.f32.mrf.mxu0 }
 0x345   : > { %v4200_v44 = vadd.f32 %v4199_v54, %v4063_v28  ;;  %v3700_v61 = vadd.f32 %v7630_v49, %v3699_v24  ;;  %v4068_v57 = vmax.f32 %v3708_v43, 0.0 }
 0x346   : > { %v5171_v32 = vpop.f32.mrf.mxu0 }
 0x347   : > { %v4201_v42 = vadd.f32 %v4200_v44, %v4064_v47  ;;  %v4066_v4 = vmax.f32 %v3700_v61, 0.0  ;;  %v3711_v18 = vadd.f32 %v5171_v32, %v7630_v49 }
 0x348   : > { %v3702_v16 = vpop.f32.mrf.mxu0 }
 0x349   : > { %v4202_v7 = vadd.f32 %v4201_v42, %v4065_v22  ;;  %v3703_v1 = vadd.f32 %v7630_v49, %v3702_v16  ;;  %v4069_v38 = vmax.f32 %v3711_v18, 0.0 }
 0x34a   : > { %v5174_v46 = vpop.f32.mrf.mxu0 }
 0x34b   : > { %v4203_v36 = vrot.slane %v4202_v7, 4  ;;  %v4067_v52 = vmax.f32 %v3703_v1, 0.0  ;;  %v3724_v14 = vadd.f32 %v5174_v46, %v7630_v49 }
 0x34c   : > { %v3715_v23 = vpop.f32.mrf.mxu0 }
 0x34d   : > { %v4204_v13 = vadd.f32 %v4203_v36, %v4202_v7  ;;  %v4209_v41 = vadd.f32 %v4067_v52, %v4066_v4  ;;  %v3716_v5 = vadd.f32 %v7630_v49, %v3715_v23  ;;  %v4072_v63 = vmax.f32 %v3724_v14, 0.0 }
 0x34e   : > { %v5175_v53 = vpop.f32.mrf.mxu0 }
 0x34f   : > { %v4205_v6 = vrot.slane %v4204_v13, 2  ;;  %v4210_v30 = vadd.f32 %v4209_v41, %v4068_v57  ;;  %v4070_v25 = vmax.f32 %v3716_v5, 0.0  ;;  %v3727_v15 = vadd.f32 %v5175_v53, %v7630_v49 }
 0x350   : > { %v3718_v39 = vpop.f32.mrf.mxu0 }
 0x351   : > { %v4206_v59 = vadd.f32 %v4205_v6, %v4204_v13  ;;  %v4211_v56 = vadd.f32 %v4210_v30, %v4069_v38  ;;  %v3719_v19 = vadd.f32 %v7630_v49, %v3718_v39  ;;  %v4073_v10 = vmax.f32 %v3727_v15, 0.0 }
 0x352   : > { %v5178_v12 = vpop.f32.mrf.mxu0 }
 0x353   : > { %v4207_v60 = vrot.slane %v4206_v59, 1  ;;  %v4212_v26 = vadd.f32 %v4211_v56, %v4070_v25  ;;  %v4071_v33 = vmax.f32 %v3719_v19, 0.0  ;;  %v3740_v34 = vadd.f32 %v5178_v12, %v7630_v49 }
 0x354   : > { %v3731_v11 = vpop.f32.mrf.mxu0 }
 0x355   : > { %v4208_v35 = vadd.f32 %v4207_v60, %v4206_v59  ;;  %v4213_v17 = vadd.f32 %v4212_v26, %v4071_v33  ;;  %v3732_v31 = vadd.f32 %v7630_v49, %v3731_v11  ;;  %v4076_v48 = vmax.f32 %v3740_v34, 0.0 }
 0x356   : > { %v5179_v50 = vpop.f32.mrf.mxu0 }
 0x357   : > { %v7802_v55 = vsel %vm1267_vm1, %v7782_v8, %v4208_v35  ;;  %v4214_v45 = vadd.f32 %v4213_v17, %v4072_v63  ;;  %v4074_v9 = vmax.f32 %v3732_v31, 0.0  ;;  %v3743_v37 = vadd.f32 %v5179_v50, %v7630_v49 }
 0x358   : > { %v3734_v29 = vpop.f32.mrf.mxu0 }
 0x359   : > { %v4215_v2 = vadd.f32 %v4214_v45, %v4073_v10  ;;  %v3735_v27 = vadd.f32 %v7630_v49, %v3734_v29  ;;  %v4077_v3 = vmax.f32 %v3743_v37, 0.0 }
 0x35a   : > { %v5182_v62 = vpop.f32.mrf.mxu0 }
 0x35b   : > { %v4216_v58 = vadd.f32 %v4215_v2, %v4074_v9  ;;  %v4075_v51 = vmax.f32 %v3735_v27, 0.0  ;;  %v3756_v28 = vadd.f32 %v5182_v62, %v7630_v49 }
 0x35c   : > { %v3747_v21 = vpop.f32.mrf.mxu0 }
 0x35d   : > { %v4217_v40 = vadd.f32 %v4216_v58, %v4075_v51  ;;  %v3748_v8 = vadd.f32 %v7630_v49, %v3747_v21  ;;  %v4080_v7 = vmax.f32 %v3756_v28, 0.0 }
 0x35e   : > { %v5183_v20 = vpop.f32.mrf.mxu0 }
 0x35f   : > { %v4218_v54 = vadd.f32 %v4217_v40, %v4076_v48  ;;  %v4078_v24 = vmax.f32 %v3748_v8, 0.0  ;;  %v3759_v42 = vadd.f32 %v5183_v20, %v7630_v49 }
 0x360   : > { %v3750_v0 = vpop.f32.mrf.mxu0 }
 0x361   : > { %v4219_v47 = vadd.f32 %v4218_v54, %v4077_v3  ;;  %v3751_v44 = vadd.f32 %v7630_v49, %v3750_v0  ;;  %v4081_v46 = vmax.f32 %v3759_v42, 0.0 }
 0x362   : > { %v5186_v32 = vpop.f32.mrf.mxu0 }
 0x363   : > { %v4220_v22 = vadd.f32 %v4219_v47, %v4078_v24  ;;  %v4079_v61 = vmax.f32 %v3751_v44, 0.0  ;;  %v3772_v23 = vadd.f32 %v5186_v32, %v7630_v49 }
 0x364   : > { %v3763_v16 = vpop.f32.mrf.mxu0 }
 0x365   : > { %v4221_v43 = vadd.f32 %v4220_v22, %v4079_v61  ;;  %v3764_v4 = vadd.f32 %v7630_v49, %v3763_v16  ;;  %v4084_v14 = vmax.f32 %v3772_v23, 0.0 }
 0x366   : > { %v5187_v1 = vpop.f32.mrf.mxu0 }
 0x367   : > { %v4222_v36 = vadd.f32 %v4221_v43, %v4080_v7  ;;  %v4082_v5 = vmax.f32 %v3764_v4, 0.0  ;;  %v3775_v53 = vadd.f32 %v5187_v1, %v7630_v49 }
 0x368   : > { %v3766_v18 = vpop.f32.mrf.mxu0 }
 0x369   : > { %v4223_v52 = vadd.f32 %v4222_v36, %v4081_v46  ;;  %v3767_v13 = vadd.f32 %v7630_v49, %v3766_v18  ;;  %v4085_v19 = vmax.f32 %v3775_v53, 0.0 }
 0x36a   : > { %v5190_v57 = vpop.f32.mrf.mxu0 }
 0x36b   : > { %v4224_v41 = vrot.slane %v4223_v52, 4  ;;  %v4083_v6 = vmax.f32 %v3767_v13, 0.0  ;;  %v3788_v60 = vadd.f32 %v5190_v57, %v7630_v49 }
 0x36c   : > { %v3779_v38 = vpop.f32.mrf.mxu0 }
 0x36d   : > { %v4225_v30 = vadd.f32 %v4224_v41, %v4223_v52  ;;  %v4230_v39 = vadd.f32 %v4083_v6, %v4082_v5  ;;  %v3780_v59 = vadd.f32 %v7630_v49, %v3779_v38  ;;  %v4088_v34 = vmax.f32 %v3788_v60, 0.0 }
 0x36e   : > { %v5191_v25 = vpop.f32.mrf.mxu0 }
 0x36f   : > { %v4226_v56 = vrot.slane %v4225_v30, 2  ;;  %v4231_v12 = vadd.f32 %v4230_v39, %v4084_v14  ;;  %v4086_v33 = vmax.f32 %v3780_v59, 0.0  ;;  %v3791_v50 = vadd.f32 %v5191_v25, %v7630_v49 }
 0x370   : > { %v3782_v26 = vpop.f32.mrf.mxu0 }
 0x371   : > { %v4227_v15 = vadd.f32 %v4226_v56, %v4225_v30  ;;  %v4232_v11 = vadd.f32 %v4231_v12, %v4085_v19  ;;  %v3783_v35 = vadd.f32 %v7630_v49, %v3782_v26  ;;  %v4089_v62 = vmax.f32 %v3791_v50, 0.0 }
 0x372   : > { %v5194_v63 = vpop.f32.mrf.mxu0 }
 0x373   : > { %v4228_v17 = vrot.slane %v4227_v15, 1  ;;  %v4233_v31 = vadd.f32 %v4232_v11, %v4086_v33  ;;  %v4087_v10 = vmax.f32 %v3783_v35, 0.0  ;;  %v3804_v21 = vadd.f32 %v5194_v63, %v7630_v49 }
 0x374   : > { %v3795_v45 = vpop.f32.mrf.mxu0 }
 0x375   : > { %v4229_v29 = vadd.f32 %v4228_v17, %v4227_v15  ;;  %v4234_v9 = vadd.f32 %v4233_v31, %v4087_v10  ;;  %v3796_v2 = vadd.f32 %v7630_v49, %v3795_v45  ;;  %v4092_v24 = vmax.f32 %v3804_v21, 0.0 }
 0x376   : > { %v5195_v27 = vpop.f32.mrf.mxu0 }
 0x377   : > { %v4235_v58 = vadd.f32 %v4234_v9, %v4088_v34  ;;  %v7821_v37 = vsel %vm4316_vm4, %v7802_v55, %v4229_v29  ;;  %v4090_v48 = vmax.f32 %v3796_v2, 0.0  ;;  %v3807_v54 = vadd.f32 %v5195_v27, %v7630_v49  ;;  %v7840_v27 = vld [vmem:[%s7952_s7] ss:$0 sm:$0xff] }
 0x378   : > { %v3798_v51 = vpop.f32.mrf.mxu0 }
 0x379   : > { %v4236_v40 = vadd.f32 %v4235_v58, %v4089_v62  ;;  %v3799_v8 = vadd.f32 %v7630_v49, %v3798_v51  ;;  %v4093_v55 = vmax.f32 %v3807_v54, 0.0 }
 0x37a   : > { %v5198_v20 = vpop.f32.mrf.mxu0 }
 0x37b   : > { %v4237_v3 = vadd.f32 %v4236_v40, %v4090_v48  ;;  %v4091_v0 = vmax.f32 %v3799_v8, 0.0  ;;  %v3820_v61 = vadd.f32 %v5198_v20, %v7630_v49 }
 0x37c   : > { %v3811_v28 = vpop.f32.mrf.mxu0 }
 0x37d   : > { %v4238_v47 = vadd.f32 %v4237_v3, %v4091_v0  ;;  %v3812_v44 = vadd.f32 %v7630_v49, %v3811_v28  ;;  %v4096_v52 = vmax.f32 %v3820_v61, 0.0 }
 0x37e   : > { %v5199_v32 = vpop.f32.mrf.mxu0 }
 0x37f   : > { %v4239_v22 = vadd.f32 %v4238_v47, %v4092_v24  ;;  %v4094_v16 = vmax.f32 %v3812_v44, 0.0  ;;  %v3823_v36 = vadd.f32 %v5199_v32, %v7630_v49 }
 0x380   : > { %v3814_v42 = vpop.f32.mrf.mxu0 }
 0x381   : > { %v4240_v7 = vadd.f32 %v4239_v22, %v4093_v55  ;;  %v3815_v43 = vadd.f32 %v7630_v49, %v3814_v42  ;;  %v4097_v57 = vmax.f32 %v3823_v36, 0.0 }
 0x382   : > { %v5202_v1 = vpop.f32.mrf.mxu0 }
 0x383   : > { %v4241_v46 = vadd.f32 %v4240_v7, %v4094_v16  ;;  %v4095_v4 = vmax.f32 %v3815_v43, 0.0  ;;  %v3836_v38 = vadd.f32 %v5202_v1, %v7630_v49 }
 0x384   : > { %v3827_v18 = vpop.f32.mrf.mxu0 }
 0x385   : > { %v4242_v23 = vadd.f32 %v4241_v46, %v4095_v4  ;;  %v3828_v5 = vadd.f32 %v7630_v49, %v3827_v18  ;;  %v4100_v60 = vmax.f32 %v3836_v38, 0.0 }
 0x386   : > { %v5203_v13 = vpop.f32.mrf.mxu0 }
 0x387   : > { %v4243_v41 = vadd.f32 %v4242_v23, %v4096_v52  ;;  %v4098_v59 = vmax.f32 %v3828_v5, 0.0  ;;  %v3839_v25 = vadd.f32 %v5203_v13, %v7630_v49 }
 0x388   : > { %v3830_v53 = vpop.f32.mrf.mxu0 }
 0x389   : > { %v4244_v6 = vadd.f32 %v4243_v41, %v4097_v57  ;;  %v3831_v30 = vadd.f32 %v7630_v49, %v3830_v53  ;;  %v4101_v35 = vmax.f32 %v3839_v25, 0.0 }
 0x38a   : > { %v5206_v14 = vpop.f32.mrf.mxu0 }
 0x38b   : > { %v4245_v39 = vrot.slane %v4244_v6, 4  ;;  %v4099_v56 = vmax.f32 %v3831_v30, 0.0  ;;  %v3852_v17 = vadd.f32 %v5206_v14, %v7630_v49 }
 0x38c   : > { %v3843_v19 = vpop.f32.mrf.mxu0 }
 0x38d   : > { %v4246_v12 = vadd.f32 %v4245_v39, %v4244_v6  ;;  %v4251_v26 = vadd.f32 %v4099_v56, %v4098_v59  ;;  %v3844_v15 = vadd.f32 %v7630_v49, %v3843_v19  ;;  %v4104_v48 = vmax.f32 %v3852_v17, 0.0 }
 0x38e   : > { %v5207_v33 = vpop.f32.mrf.mxu0 }
 0x38f   : > { %v4247_v11 = vrot.slane %v4246_v12, 2  ;;  %v4252_v63 = vadd.f32 %v4251_v26, %v4100_v60  ;;  %v4102_v10 = vmax.f32 %v3844_v15, 0.0  ;;  %v3855_v62 = vadd.f32 %v7840_v27, %v5207_v33 }
 0x390   : > { %v3846_v31 = vpop.f32.mrf.mxu0 }
 0x391   : > { %v4248_v50 = vadd.f32 %v4247_v11, %v4246_v12  ;;  %v4253_v45 = vadd.f32 %v4252_v63, %v4101_v35  ;;  %v3847_v29 = vadd.f32 %v7630_v49, %v3846_v31  ;;  %v4105_v49 = vmax.f32 %v3855_v62, 0.0 }
 0x392   : > { %v5210_v34 = vpop.f32.mrf.mxu0 }
 0x393   : > { %v4249_v9 = vrot.slane %v4248_v50, 1  ;;  %v4254_v2 = vadd.f32 %v4253_v45, %v4102_v10  ;;  %v4103_v58 = vmax.f32 %v3847_v29, 0.0  ;;  %v3868_v28 = vadd.f32 %v7840_v27, %v5210_v34 }
 0x394   : > { %v3859_v51 = vpop.f32.mrf.mxu0 }
 0x395   : > { %v4250_v21 = vadd.f32 %v4249_v9, %v4248_v50  ;;  %v4255_v40 = vadd.f32 %v4254_v2, %v4103_v58  ;;  %v3860_v8 = vadd.f32 %v7840_v27, %v3859_v51  ;;  %v4108_v16 = vmax.f32 %v3868_v28, 0.0 }
 0x396   : > { %v5211_v20 = vpop.f32.mrf.mxu0 }
 0x397   : > { %v4256_v3 = vadd.f32 %v4255_v40, %v4104_v48  ;;  %v7845_v54 = vsel %vm4318_vm5, %v7821_v37, %v4250_v21  ;;  %v4106_v24 = vmax.f32 %v3860_v8, 0.0  ;;  %v3871_v22 = vadd.f32 %v7840_v27, %v5211_v20 }
 0x398   : > { %v3862_v0 = vpop.f32.mrf.mxu0 }
 0x399   : > { %v4257_v47 = vadd.f32 %v4256_v3, %v4105_v49  ;;  %v3863_v44 = vadd.f32 %v7840_v27, %v3862_v0  ;;  %v4109_v37 = vmax.f32 %v3871_v22, 0.0 }
 0x39a   : > { %v5214_v32 = vpop.f32.mrf.mxu0 }
 0x39b   : > { %v4258_v55 = vadd.f32 %v4257_v47, %v4106_v24  ;;  %v4107_v42 = vmax.f32 %v3863_v44, 0.0  ;;  %v3884_v4 = vadd.f32 %v7840_v27, %v5214_v32 }
 0x39c   : > { %v3875_v61 = vpop.f32.mrf.mxu0 }
 0x39d   : > { %v4259_v7 = vadd.f32 %v4258_v55, %v4107_v42  ;;  %v3876_v43 = vadd.f32 %v7840_v27, %v3875_v61  ;;  %v4112_v6 = vmax.f32 %v3884_v4, 0.0 }
 0x39e   : > { %v5215_v1 = vpop.f32.mrf.mxu0 }
 0x39f   : > { %v4260_v46 = vadd.f32 %v4259_v7, %v4108_v16  ;;  %v4110_v18 = vmax.f32 %v3876_v43, 0.0  ;;  %v3887_v41 = vadd.f32 %v7840_v27, %v5215_v1 }
 0x3a0   : > { %v3878_v36 = vpop.f32.mrf.mxu0 }
 0x3a1   : > { %v4261_v52 = vadd.f32 %v4260_v46, %v4109_v37  ;;  %v3879_v23 = vadd.f32 %v7840_v27, %v3878_v36  ;;  %v4113_v14 = vmax.f32 %v3887_v41, 0.0 }
 0x3a2   : > { %v5218_v13 = vpop.f32.mrf.mxu0 }
 0x3a3   : > { %v4262_v57 = vadd.f32 %v4261_v52, %v4110_v18  ;;  %v4111_v5 = vmax.f32 %v3879_v23, 0.0  ;;  %v3900_v19 = vadd.f32 %v7840_v27, %v5218_v13 }
 0x3a4   : > { %v3891_v53 = vpop.f32.mrf.mxu0 }
 0x3a5   : > { %v4263_v38 = vadd.f32 %v4262_v57, %v4111_v5  ;;  %v3892_v59 = vadd.f32 %v7840_v27, %v3891_v53  ;;  %v4116_v17 = vmax.f32 %v3900_v19, 0.0 }
 0x3a6   : > { %v5219_v30 = vpop.f32.mrf.mxu0 }
 0x3a7   : > { %v4264_v39 = vadd.f32 %v4263_v38, %v4112_v6  ;;  %v4114_v15 = vmax.f32 %v3892_v59, 0.0  ;;  %v3903_v33 = vadd.f32 %v7840_v27, %v5219_v30 }
 0x3a8   : > { %v3894_v25 = vpop.f32.mrf.mxu0 }
 0x3a9   : > { %v4265_v56 = vadd.f32 %v4264_v39, %v4113_v14  ;;  %v3895_v12 = vadd.f32 %v7840_v27, %v3894_v25  ;;  %v4117_v29 = vmax.f32 %v3903_v33, 0.0 }
 0x3aa   : > { %v5222_v60 = vpop.f32.mrf.mxu0 }
 0x3ab   : > { %v4266_v26 = vrot.slane %v4265_v56, 4  ;;  %v4115_v11 = vmax.f32 %v3895_v12, 0.0  ;;  %v3916_v9 = vadd.f32 %v7840_v27, %v5222_v60 }
 0x3ac   : > { %v3907_v35 = vpop.f32.mrf.mxu0 }
 0x3ad   : > { %v4267_v63 = vadd.f32 %v4266_v26, %v4265_v56  ;;  %v4272_v31 = vadd.f32 %v4115_v11, %v4114_v15  ;;  %v3908_v50 = vadd.f32 %v7840_v27, %v3907_v35  ;;  %v4120_v28 = vmax.f32 %v3916_v9, 0.0 }
 0x3ae   : > { %v5223_v10 = vpop.f32.mrf.mxu0 }
 0x3af   : > { %v4268_v45 = vrot.slane %v4267_v63, 2  ;;  %v4273_v34 = vadd.f32 %v4272_v31, %v4116_v17  ;;  %v4118_v58 = vmax.f32 %v3908_v50, 0.0  ;;  %v3919_v49 = vadd.f32 %v7840_v27, %v5223_v10 }
 0x3b0   : > { %v3910_v2 = vpop.f32.mrf.mxu0 }
 0x3b1   : > { %v4269_v62 = vadd.f32 %v4268_v45, %v4267_v63  ;;  %v4274_v51 = vadd.f32 %v4273_v34, %v4117_v29  ;;  %v3911_v21 = vadd.f32 %v7840_v27, %v3910_v2  ;;  %v4121_v55 = vmax.f32 %v3919_v49, 0.0 }
 0x3b2   : > { %v5226_v48 = vpop.f32.mrf.mxu0 }
 0x3b3   : > { %v4270_v40 = vrot.slane %v4269_v62, 1  ;;  %v4275_v8 = vadd.f32 %v4274_v51, %v4118_v58  ;;  %v4119_v20 = vmax.f32 %v3911_v21, 0.0  ;;  %v3932_v4 = vadd.f32 %v7840_v27, %v5226_v48 }
 0x3b4   : > { %v3923_v3 = vpop.f32.mrf.mxu0 }
 0x3b5   : > { %v4271_v0 = vadd.f32 %v4270_v40, %v4269_v62  ;;  %v4276_v24 = vadd.f32 %v4275_v8, %v4119_v20  ;;  %v3924_v22 = vadd.f32 %v7840_v27, %v3923_v3 }
 0x3b6   : > { %v5227_v47 = vpop.f32.mrf.mxu0 }
 0x3b7   : > { %v4277_v44 = vadd.f32 %v4276_v24, %v4120_v28  ;;  %v7863_v32 = vsel %vm4320_vm6, %v7845_v54, %v4271_v0  ;;  %v4122_v43 = vmax.f32 %v3924_v22, 0.0  ;;  %v4124_v54 = vmax.f32 %v3932_v4, 0.0 }
 0x3b8   : > { %v3926_v42 = vpop.f32.mrf.mxu0  ;;  %v3935_v13 = vadd.f32 %v7840_v27, %v5227_v47 }
 0x3b9   : > { %v4278_v61 = vadd.f32 %v4277_v44, %v4121_v55  ;;  %v3927_v16 = vadd.f32 %v7840_v27, %v3926_v42 }
 0x3ba   : > { %v5230_v7 = vpop.f32.mrf.mxu0  ;;  %v4125_v6 = vmax.f32 %v3935_v13, 0.0 }
 0x3bb   : > { %v4279_v37 = vadd.f32 %v4278_v61, %v4122_v43  ;;  %v4123_v46 = vmax.f32 %v3927_v16, 0.0  ;;  %v3948_v45 = vadd.f32 %v7840_v27, %v5230_v7 }
 0x3bc   : > { %v3939_v1 = vpop.f32.mrf.mxu0 }
 0x3bd   : > { %v4280_v52 = vadd.f32 %v4279_v37, %v4123_v46  ;;  %v3940_v38 = vadd.f32 %v7840_v27, %v3939_v1  ;;  %v4128_v8 = vmax.f32 %v3948_v45, 0.0 }
 0x3be   : > { %v5231_v36 = vpop.f32.mrf.mxu0 }
 0x3bf   : > { %v4281_v41 = vadd.f32 %v4280_v52, %v4124_v54  ;;  %v4126_v26 = vmax.f32 %v3940_v38, 0.0  ;;  %v3951_v20 = vadd.f32 %v7840_v27, %v5231_v36 }
 0x3c0   : > { %v3942_v18 = vpop.f32.mrf.mxu0 }
 0x3c1   : > { %v4282_v59 = vadd.f32 %v4281_v41, %v4125_v6  ;;  %v3943_v25 = vadd.f32 %v7840_v27, %v3942_v18  ;;  %v4129_v22 = vmax.f32 %v3951_v20, 0.0 }
 0x3c2   : > { %v5234_v23 = vpop.f32.mrf.mxu0 }
 0x3c3   : > { %v3964_v14 = vadd.f32 %v7840_v27, %v5234_v23  ;;  %v4283_v63 = vadd.f32 %v4282_v59, %v4126_v26  ;;  %v4127_v17 = vmax.f32 %v3943_v25, 0.0 }
 0x3c4   : > { %v3955_v57 = vpop.f32.mrf.mxu0 }
 0x3c5   : > { %v3956_v53 = vadd.f32 %v7840_v27, %v3955_v57  ;;  %v4132_v33 = vmax.f32 %v3964_v14, 0.0  ;;  %v4284_v58 = vadd.f32 %v4283_v63, %v4127_v17 }
 0x3c6   : > { %v5235_v5 = vpop.f32.mrf.mxu0 }
 0x3c7   : > { %v4130_v19 = vmax.f32 %v3956_v53, 0.0  ;;  %v3967_v12 = vadd.f32 %v7840_v27, %v5235_v5  ;;  %v4285_v24 = vadd.f32 %v4284_v58, %v4128_v8 }
 0x3c8   : > { %v3958_v30 = vpop.f32.mrf.mxu0 }
 0x3c9   : > { %v3959_v39 = vadd.f32 %v7840_v27, %v3958_v30  ;;  %v4133_v50 = vmax.f32 %v3967_v12, 0.0  ;;  %v4286_v1 = vadd.f32 %v4285_v24, %v4129_v22 }
 0x3ca   : > { %v5238_v56 = vpop.f32.mrf.mxu0 }
 0x3cb   : > { %v4131_v60 = vmax.f32 %v3959_v39, 0.0  ;;  %v3980_v34 = vadd.f32 %v7840_v27, %v5238_v56  ;;  %v4287_v13 = vrot.slane %v4286_v1, 4 }
 0x3cc   : > { %v3971_v15 = vpop.f32.mrf.mxu0 }
 0x3cd   : > { %v4293_v11 = vadd.f32 %v4131_v60, %v4130_v19  ;;  %v3972_v35 = vadd.f32 %v7840_v27, %v3971_v15  ;;  %v4136_v3 = vmax.f32 %v3980_v34, 0.0  ;;  %v4288_v39 = vadd.f32 %v4287_v13, %v4286_v1 }
 0x3ce   : > { %v5239_v31 = vpop.f32.mrf.mxu0 }
 0x3cf   : > { %v4294_v10 = vadd.f32 %v4293_v11, %v4132_v33  ;;  %v4134_v9 = vmax.f32 %v3972_v35, 0.0  ;;  %v3983_v48 = vadd.f32 %v7840_v27, %v5239_v31  ;;  %v4289_v60 = vrot.slane %v4288_v39, 2 }
 0x3d0   : > { %v3974_v29 = vpop.f32.mrf.mxu0 }
 0x3d1   : > { %v4295_v2 = vadd.f32 %v4294_v10, %v4133_v50  ;;  %v3975_v62 = vadd.f32 %v7840_v27, %v3974_v29  ;;  %v4137_v44 = vmax.f32 %v3983_v48, 0.0  ;;  %v4290_v11 = vadd.f32 %v4289_v60, %v4288_v39 }
 0x3d2   : > { %v5242_v51 = vpop.f32.mrf.mxu0 }
 0x3d3   : > { %v4296_v21 = vadd.f32 %v4295_v2, %v4134_v9  ;;  %v4135_v40 = vmax.f32 %v3975_v62, 0.0  ;;  %v3996_v61 = vadd.f32 %v7840_v27, %v5242_v51  ;;  %v4291_v17 = vrot.slane %v4290_v11, 1  ;;  %v4326_v9 = vld [vmem:[%s5876_s24] sm:$0xff] }
 0x3d4   : > { %v3987_v49 = vpop.f32.mrf.mxu0 }
 0x3d5   : > { %v4297_v0 = vadd.f32 %v4296_v21, %v4135_v40  ;;  %v3988_v28 = vadd.f32 %v7840_v27, %v3987_v49  ;;  %v4140_v52 = vmax.f32 %v3996_v61, 0.0  ;;  %v4292_v10 = vadd.f32 %v4291_v17, %v4290_v11 }
 0x3d6   : > { %v5243_v47 = vpop.f32.mrf.mxu0 }
 0x3d7   : > { %v4298_v55 = vadd.f32 %v4297_v0, %v4136_v3  ;;  %v4138_v16 = vmax.f32 %v3988_v28, 0.0  ;;  %v3999_v36 = vadd.f32 %v7840_v27, %v5243_v47  ;;  %v4323_v29 = vsel %vm4322_vm7, %v7863_v32, %v4292_v10 }
 0x3d8   : > { %v3990_v42 = vpop.f32.mrf.mxu0 }
 0x3d9   : > { %v4299_v7 = vadd.f32 %v4298_v55, %v4137_v44  ;;  %v3991_v43 = vadd.f32 %v7840_v27, %v3990_v42  ;;  %v4141_v41 = vmax.f32 %v3999_v36, 0.0 }
 0x3da   : > { %v5246_v37 = vpop.f32.mrf.mxu0 }
 0x3db   : > { %v4300_v46 = vadd.f32 %v4299_v7, %v4138_v16  ;;  %v4139_v4 = vmax.f32 %v3991_v43, 0.0  ;;  %v4012_v6 = vadd.f32 %v7840_v27, %v5246_v37 }
 0x3dc   : > { %v4003_v18 = vpop.f32.mrf.mxu0 }
 0x3dd   : > { %v4301_v23 = vadd.f32 %v4300_v46, %v4139_v4  ;;  %v4004_v54 = vadd.f32 %v7840_v27, %v4003_v18  ;;  %v4144_v19 = vmax.f32 %v4012_v6, 0.0 }
 0x3de   : > { %v5247_v57 = vpop.f32.mrf.mxu0 }
 0x3df   : > { %v4302_v5 = vadd.f32 %v4301_v23, %v4140_v52  ;;  %v4142_v38 = vmax.f32 %v4004_v54, 0.0  ;;  %v4015_v25 = vadd.f32 %v7840_v27, %v5247_v57 }
 0x3e0   : > { %v4006_v53 = vpop.f32.mrf.mxu0 }
 0x3e1   : > { %v4303_v30 = vadd.f32 %v4302_v5, %v4141_v41  ;;  %v4007_v14 = vadd.f32 %v7840_v27, %v4006_v53  ;;  %v4145_v26 = vmax.f32 %v4015_v25, 0.0 }
 0x3e3   : > { %v4304_v59 = vadd.f32 %v4303_v30, %v4142_v38  ;;  %v4143_v56 = vmax.f32 %v4007_v14, 0.0 }
 0x3e5   : > { %v4305_v12 = vadd.f32 %v4304_v59, %v4143_v56 }
 0x3e7   : > { %v4306_v15 = vadd.f32 %v4305_v12, %v4144_v19 }
 0x3e9   : > { %v4307_v33 = vadd.f32 %v4306_v15, %v4145_v26 }
 0x3eb   : > { %v4308_v35 = vrot.slane %v4307_v33, 4 }
 0x3ed   : > { %v4309_v63 = vadd.f32 %v4308_v35, %v4307_v33 }
 0x3ef   : > { %v4310_v31 = vrot.slane %v4309_v63, 2 }
 0x3f1   : > { %v4311_v50 = vadd.f32 %v4310_v31, %v4309_v63 }
 0x3f3   : > { %v4312_v27 = vrot.slane %v4311_v50, 1 }
 0x3f5   : > { %v4313_v45 = vadd.f32 %v4312_v27, %v4311_v50 }
 0x3f7   : > { %v4325_v34 = vsel %vm4324_vm8, %v4323_v29, %v4313_v45 }
 0x3f8   : > { %v4327_v2 = vmul.f32 0.00390625, %v4325_v34 }
 0x3fa   : > { %v4328_v62 = vadd.f32 %v4327_v2, %v4326_v9 }
 0x3fc   : > { %4329 = vst [vmem:[%s5876_s24] sm:$0xff] %v4328_v62 }
 0x3fd   : > { %5364 = shalt.err (!%p5361_p11)
}
 0x3fe   : > { %s5365_s19 = scalar_lea.hbm %s4342_s16, 128  ;;  %s5369_s21 = scalar_lea.hbm %s7953_s8, 256 }
 0x3ff   : > { %p5366_p13 = scmp.ne.s32.totalorder %s4342_s16, %s5365_s19  ;;  %p5370_p2 = scmp.lt.s32.totalorder %s4342_s16, %s7953_s8 }
 0x400   : > { %p5371_p3 = scmp.lt.s32.totalorder %s5369_s21, %s5365_s19 }
 0x401   : > { %p5367_p0 = pnand %p5366_p13, %p5581_p7 }
 0x402   : > { %p5372_p4 = por %p5371_p3, %p5370_p2 }
 0x403   : > { %p5368_p1 = pneg %p5367_p0 }
 0x405   : > { %p5373_p5 = pnand %p5372_p4, %p5368_p1 }
 0x407   : > { %5376 = shalt.err (!%p5373_p5)
}
 0x408   : > { %5250 = dma.vmem_to_hbm [thread:$0]  (%p5581_p7), %s4345_s27, 128, %s4342_s16, %s4331_s25  }
 0x409 PF: > { %s8479_s22 = sld [smem:[#allocation6_spill]]  ;;  %p5256_p6 = scmp.ge.s32.totalorder %s5459_s14, 2 }
 0x40b   : > { %p5253_p8 = pnand %p5256_p6, %p5589_p12 }
 0x40d   : > { %p5254_p9 = pneg %p5253_p8 }
 0x40f   : > { %s4356_s10 = sand.u32 1, %s8479_s22  }
 0x410   : > { %s4357_s11 = scalar_lea.sflag [#allocation4], %s4356_s10 }
 0x411   : > { %5418 = dma.done.wait (%p5254_p9), %s4357_s11, 128  }
 0x412   : > { %5420 = vsyncadd (%p5254_p9), %s4357_s11, 4294967168  ;;  %s21_s14 = sadd.s32 1, %s5459_s14   ;;  %s8481_s23 = sld [smem:[#allocation7_spill]] }
 0x413   : > { %p18_p10 = scmp.ge.s32.totalorder %s21_s14, 6   ;;  %s8482_s16 = sld [smem:[#allocation8_spill]] }
 0x414   : > { %s8483_s27 = smov %s5427_s28  ;;  %s8484_s28 = smov %s5431_s29 }
 0x415   : > { %s8485_s29 = smov %s5594_s17  ;;  %s8486_s30 = smov %s5439_s9 }
 0x416   : > { %s8487_s9 = smov %s5597_s15  ;;  %s8488_s10 = smov %s5451_s12 }
 0x417   : > { %s8489_s11 = smov %s5455_s13  ;;  %20 = sbr.rel (!%p18_p10) target bundleno = 6 (0x6), region = 134 }
 0x418   : > { %s8490_s12 = smov %s8481_s23 }
 0x419   : > { %s8491_s13 = smov %s8482_s16 }
 0x41c   :  { %4362 = vsyncpa [#allocation4], 1 }
 0x41d   :  { %4364 = vsyncpa [#allocation4 + $0x1], 1 }

</bundles_post_ra>
